<compile_context>
chip_gen: v7x
topology: tpu7x:2x2x1
jax: 0.10.0
libtpu: 0.0.40
codegen_flags: <defaults>
</compile_context>

<pallas_src>
import functools

import jax
import jax.numpy as jnp
from jax.experimental import pallas as pl
from jax.experimental.pallas import tpu as pltpu


_HID = 750           # reference hidden width (nn.Linear(..., 750))
_HID_PAD = 768       # padded to a multiple of 128 lanes
_LANE = 128
_BF16_SUBLANE = 16   # bf16 packs 16 rows per vreg
_BATCH_TILE = 256    # MXU-height-friendly batch tile (256x256 MXU on v6e/v7x)


def _round_up(x, m):
    return -(-x // m) * m


# ----------------------------- fused kernel ---------------------------------


def _vae_fwd_kernel(x_ref,
                    w_e1s_ref, w_e1a_ref,
                    w_e2_ref,
                    w_h_ref,
                    w_d1s_ref, w_d1z_ref,
                    w_d2_ref,
                    w_d3_ref,
                    bias_ref,
                    out_ref,
                    *, max_action, sp, ap, lp):
    f32 = jnp.float32
    bf16 = jnp.bfloat16

    # Packed activation tile: [ state | action | eps ] at lane-aligned offsets.
    x = x_ref[...]
    s = x[:, :sp].astype(bf16)
    a = x[:, sp:sp + ap].astype(bf16)
    eps = x[:, sp + ap:sp + ap + lp]                 # stays f32

    # Packed bias slab (one DMA): rows = [e1, e2, d1, d2, heads, d3, 0, 0].
    hp = w_e2_ref.shape[0]
    bias = bias_ref[...]
    b_e1 = bias[0:1, :hp]
    b_e2 = bias[1:2, :hp]
    b_d1 = bias[2:3, :hp]
    b_d2 = bias[3:4, :hp]
    b_heads = bias[4:5, :2 * lp]
    b_d3 = bias[5:6, :ap]

    # ---- encoder: h = relu(e2(relu(e1([state, action])))) ----
    h = (jnp.dot(s, w_e1s_ref[...], preferred_element_type=f32)
         + jnp.dot(a, w_e1a_ref[...], preferred_element_type=f32)
         + b_e1)
    h = jnp.maximum(h, 0.0)
    h = (jnp.dot(h.astype(bf16), w_e2_ref[...], preferred_element_type=f32)
         + b_e2)
    h = jnp.maximum(h, 0.0)

    # ---- latent heads: one matmul for [mean ++ log_std], lane-aligned split ----
    heads = (jnp.dot(h.astype(bf16), w_h_ref[...], preferred_element_type=f32)
             + b_heads)
    mean = heads[:, :lp]
    log_std = jnp.clip(heads[:, lp:2 * lp], -4.0, 15.0)
    std = jnp.exp(log_std)
    z = mean + std * eps                              # reparameterization trick

    # ---- decoder: u = max_action * tanh(d3(relu(d2(relu(d1([state, z])))))) ----
    # Padded z lanes (>= latent_dim) hit zero rows of w_d1z, so they contribute 0.
    d = (jnp.dot(s, w_d1s_ref[...], preferred_element_type=f32)
         + jnp.dot(z.astype(bf16), w_d1z_ref[...], preferred_element_type=f32)
         + b_d1)
    d = jnp.maximum(d, 0.0)
    d = (jnp.dot(d.astype(bf16), w_d2_ref[...], preferred_element_type=f32)
         + b_d2)
    d = jnp.maximum(d, 0.0)
    d = (jnp.dot(d.astype(bf16), w_d3_ref[...], preferred_element_type=f32)
         + b_d3)
    u = max_action * jnp.tanh(d)

    # ---- single lane-dense output slab: [ u | mean | std ] ----
    out_ref[:, :ap] = u.astype(out_ref.dtype)
    out_ref[:, ap:ap + lp] = mean.astype(out_ref.dtype)
    out_ref[:, ap + lp:ap + 2 * lp] = std.astype(out_ref.dtype)


# --------------------------- pallas wrapper ----------------------------------


def _fused_forward_call(x_p, params, *, max_action, sp, ap, lp, tile):
    Bp, xw = x_p.shape
    out_w = ap + 2 * lp

    weights = (params["w_e1s"], params["w_e1a"], params["w_e2"],
               params["w_heads"], params["w_d1s"], params["w_d1z"],
               params["w_d2"], params["w_d3"], params["biases"])

    def act_map(b):        # activation / output tiles advance with the grid
        return (b, 0)

    def const_map(b):      # weights/biases: constant block -> fetched once,
        return (0, 0)      # stay VMEM-resident across all batch tiles

    in_specs = ([pl.BlockSpec((tile, xw), act_map)]
                + [pl.BlockSpec(w.shape, const_map) for w in weights])
    out_specs = pl.BlockSpec((tile, out_w), act_map)

    kern = functools.partial(_vae_fwd_kernel, max_action=max_action,
                             sp=sp, ap=ap, lp=lp)

    return pl.pallas_call(
        kern,
        out_shape=jax.ShapeDtypeStruct((Bp, out_w), jnp.float32),
        grid=(Bp // tile,),
        in_specs=in_specs,
        out_specs=out_specs,
        compiler_params=pltpu.CompilerParams(
            # batch tiles are independent -> shard across v7x's 2 TensorCores
            dimension_semantics=("parallel",),
            vmem_limit_bytes=32 * 1024 * 1024),
    )(x_p, *weights)


def _vae_forward(params, state, action, key, *, max_action, dims):
    """Jitted end-to-end forward: pack+pad -> batch-tiled Pallas kernel -> slice."""
    S, A, L = dims
    B = state.shape[0]
    SP = params["w_e1s"].shape[0]
    AP = params["w_e1a"].shape[0]
    LP = params["w_d1z"].shape[0]

    # Batch tiling: multiples of 16 (bf16 sublane packing); 256-row tiles
    # (MXU height) once the batch is large enough to need more than one tile.
    if B <= _BATCH_TILE:
        tile = _round_up(max(B, _BF16_SUBLANE), _BF16_SUBLANE)
    else:
        tile = _BATCH_TILE
    Bp = _round_up(B, tile)

    # randn_like (host/XLA PRNG); fuses into the same XLA program under jit.
    eps = jax.random.normal(key, (B, L), dtype=jnp.float32)

    # One packed activation slab => one input DMA stream per tile.
    x_p = jnp.zeros((Bp, SP + AP + LP), jnp.float32)
    x_p = x_p.at[:B, :S].set(state)
    x_p = x_p.at[:B, SP:SP + A].set(action)
    x_p = x_p.at[:B, SP + AP:SP + AP + L].set(eps)

    out_p = _fused_forward_call(x_p, params, max_action=max_action,
                                sp=SP, ap=AP, lp=LP, tile=tile)

    u = out_p[:B, :A]
    mean = out_p[:B, AP:AP + L]
    std = out_p[:B, AP + LP:AP + LP + L]
    return u, mean, std


# ------------------------------- VAE model -----------------------------------


class VAEPallas:
    def __init__(self, state_dim, action_dim, latent_dim, max_action, key):
        self.state_dim = state_dim
        self.action_dim = action_dim
        self.latent_dim = latent_dim
        self.max_action = float(max_action)

        H, HP = _HID, _HID_PAD
        SP = _round_up(max(state_dim, 1), _LANE)
        AP = _round_up(max(action_dim, 1), _LANE)
        LP = _round_up(max(latent_dim, 1), _LANE)

        def init_linear(k, fan_in, fan_out):
            # PyTorch default: U(-1/sqrt(fan_in), 1/sqrt(fan_in))
            kw, kb = jax.random.split(k)
            bound = float(fan_in) ** -0.5
            w = jax.random.uniform(kw, (fan_in, fan_out), jnp.float32, -bound, bound)
            b = jax.random.uniform(kb, (fan_out,), jnp.float32, -bound, bound)
            return w, b

        def pad_w(w, rows, cols):
            out = jnp.zeros((rows, cols), jnp.float32)
            return out.at[:w.shape[0], :w.shape[1]].set(w)

        keys = jax.random.split(key, 7)
        w_e1, b_e1 = init_linear(keys[0], state_dim + action_dim, H)
        w_e2, b_e2 = init_linear(keys[1], H, H)
        w_m, b_m = init_linear(keys[2], H, latent_dim)
        w_ls, b_ls = init_linear(keys[3], H, latent_dim)
        w_d1, b_d1 = init_linear(keys[4], state_dim + latent_dim, H)
        w_d2, b_d2 = init_linear(keys[5], H, H)
        w_d3, b_d3 = init_linear(keys[6], H, action_dim)

        bf16 = jnp.bfloat16

        # fused mean ++ log_std head, each in its own 128-lane slab
        w_heads = pad_w(w_m, HP, 2 * LP).at[:H, LP:LP + latent_dim].set(w_ls)

        # all biases coalesced into one (8, W) f32 slab -> single DMA
        bias_w = max(HP, 2 * LP, AP)
        biases = jnp.zeros((8, bias_w), jnp.float32)
        biases = biases.at[0, :H].set(b_e1)
        biases = biases.at[1, :H].set(b_e2)
        biases = biases.at[2, :H].set(b_d1)
        biases = biases.at[3, :H].set(b_d2)
        biases = biases.at[4, :latent_dim].set(b_m)
        biases = biases.at[4, LP:LP + latent_dim].set(b_ls)
        biases = biases.at[5, :action_dim].set(b_d3)

        self.params = {
            # e1 split into state / action parts (no XLA concat needed)
            "w_e1s": pad_w(w_e1[:state_dim], SP, HP).astype(bf16),
            "w_e1a": pad_w(w_e1[state_dim:], AP, HP).astype(bf16),
            "w_e2": pad_w(w_e2, HP, HP).astype(bf16),
            "w_heads": w_heads.astype(bf16),
            # d1 split into state / z parts (rows >= latent_dim are zero)
            "w_d1s": pad_w(w_d1[:state_dim], SP, HP).astype(bf16),
            "w_d1z": pad_w(w_d1[state_dim:], LP, HP).astype(bf16),
            "w_d2": pad_w(w_d2, HP, HP).astype(bf16),
            "w_d3": pad_w(w_d3, HP, AP).astype(bf16),
            "biases": biases,
        }

        self._jit_forward = jax.jit(functools.partial(
            _vae_forward,
            max_action=self.max_action,
            dims=(state_dim, action_dim, latent_dim)))

    def forward(self, state, action, rng_key):
        return self._jit_forward(self.params, state, action, rng_key)

    __call__ = forward


# --------------------------------- main ---------------------------------------

if __name__ == "__main__":
    key = jax.random.PRNGKey(0)
    k_param, k_state, k_action, k_eps = jax.random.split(key, 4)

    batch = 2
    state_dim = 8
    action_dim = 4
    latent_dim = 4
    max_action = 1.0

    vae = VAEPallas(state_dim, action_dim, latent_dim, max_action, k_param)

    state = jax.random.normal(k_state, (batch, state_dim), dtype=jnp.float32)
    action = jax.random.normal(k_action, (batch, action_dim), dtype=jnp.float32)

    u, mean, std = vae.forward(state, action, k_eps)
    jax.block_until_ready((u, mean, std))

    assert u.shape == (batch, action_dim)
    assert mean.shape == (batch, latent_dim)
    assert std.shape == (batch, latent_dim)
    assert bool(jnp.all(jnp.isfinite(u)))
    assert bool(jnp.all(jnp.isfinite(mean)))
    assert bool(jnp.all(jnp.abs(u) <= max_action + 1e-6))
    assert bool(jnp.all(std > 0))

    # Also exercise the multi-tile, pipelined (and megacore-parallel) path.
    big_batch = 300
    ks2, ka2, ke2 = jax.random.split(jax.random.PRNGKey(1), 3)
    state_b = jax.random.normal(ks2, (big_batch, state_dim), dtype=jnp.float32)
    action_b = jax.random.normal(ka2, (big_batch, action_dim), dtype=jnp.float32)
    u_b, mean_b, std_b = vae.forward(state_b, action_b, ke2)
    jax.block_until_ready((u_b, mean_b, std_b))

    assert u_b.shape == (big_batch, action_dim)
    assert mean_b.shape == (big_batch, latent_dim)
    assert std_b.shape == (big_batch, latent_dim)
    assert bool(jnp.all(jnp.isfinite(u_b)))
    assert bool(jnp.all(jnp.abs(u_b) <= max_action + 1e-6))
    assert bool(jnp.all(std_b > 0))

    print("KERNEL_OK")
</pallas_src>

<mosaic_0001>
module attributes {stable_mosaic.version = 11 : i64} {
  func.func @_vae_fwd_kernel(%arg0: i32, %arg1: memref<16x384xf32, #tpu.memory_space<vmem>>, %arg2: memref<128x768xbf16, #tpu.memory_space<vmem>>, %arg3: memref<128x768xbf16, #tpu.memory_space<vmem>>, %arg4: memref<768x768xbf16, #tpu.memory_space<vmem>>, %arg5: memref<768x256xbf16, #tpu.memory_space<vmem>>, %arg6: memref<128x768xbf16, #tpu.memory_space<vmem>>, %arg7: memref<128x768xbf16, #tpu.memory_space<vmem>>, %arg8: memref<768x768xbf16, #tpu.memory_space<vmem>>, %arg9: memref<768x128xbf16, #tpu.memory_space<vmem>>, %arg10: memref<8x768xf32, #tpu.memory_space<vmem>>, %arg11: memref<16x384xf32, #tpu.memory_space<vmem>>) attributes {dimension_semantics = [#tpu.dimension_semantics<parallel>], iteration_bounds = array<i64: 1>, scalar_prefetch = 0 : i64, scratch_operands = 0 : i64, tpu.core_type = #tpu.core_type<tc>, window_params = [{transform_indices = @transform_0, window_bounds = array<i64: 16, 384>}, {pipeline_mode = #tpu.pipeline_mode<synchronous>, transform_indices = @transform_1, window_bounds = array<i64: 128, 768>}, {pipeline_mode = #tpu.pipeline_mode<synchronous>, transform_indices = @transform_2, window_bounds = array<i64: 128, 768>}, {pipeline_mode = #tpu.pipeline_mode<synchronous>, transform_indices = @transform_3, window_bounds = array<i64: 768, 768>}, {pipeline_mode = #tpu.pipeline_mode<synchronous>, transform_indices = @transform_4, window_bounds = array<i64: 768, 256>}, {pipeline_mode = #tpu.pipeline_mode<synchronous>, transform_indices = @transform_5, window_bounds = array<i64: 128, 768>}, {pipeline_mode = #tpu.pipeline_mode<synchronous>, transform_indices = @transform_6, window_bounds = array<i64: 128, 768>}, {pipeline_mode = #tpu.pipeline_mode<synchronous>, transform_indices = @transform_7, window_bounds = array<i64: 768, 768>}, {pipeline_mode = #tpu.pipeline_mode<synchronous>, transform_indices = @transform_8, window_bounds = array<i64: 768, 128>}, {pipeline_mode = #tpu.pipeline_mode<synchronous>, transform_indices = @transform_9, window_bounds = array<i64: 8, 768>}, {transform_indices = @transform_10, window_bounds = array<i64: 16, 384>}]} {
    %c0 = arith.constant 0 : index
    %c0_0 = arith.constant 0 : index
    %0 = vector.load %arg1[%c0, %c0_0] : memref<16x384xf32, #tpu.memory_space<vmem>>, vector<16x384xf32>
    %1 = vector.extract_strided_slice %0 {offsets = [0, 0], sizes = [16, 128], strides = [1, 1]} : vector<16x384xf32> to vector<16x128xf32>
    %2 = arith.truncf %1 : vector<16x128xf32> to vector<16x128xbf16>
    %3 = vector.extract_strided_slice %0 {offsets = [0, 128], sizes = [16, 128], strides = [1, 1]} : vector<16x384xf32> to vector<16x128xf32>
    %4 = arith.truncf %3 : vector<16x128xf32> to vector<16x128xbf16>
    %5 = vector.extract_strided_slice %0 {offsets = [0, 256], sizes = [16, 128], strides = [1, 1]} : vector<16x384xf32> to vector<16x128xf32>
    %c0_1 = arith.constant 0 : index
    %c0_2 = arith.constant 0 : index
    %6 = vector.load %arg10[%c0_1, %c0_2] : memref<8x768xf32, #tpu.memory_space<vmem>>, vector<8x768xf32>
    %7 = vector.extract_strided_slice %6 {offsets = [0, 0], sizes = [1, 768], strides = [1, 1]} : vector<8x768xf32> to vector<1x768xf32>
    %8 = vector.extract_strided_slice %6 {offsets = [1, 0], sizes = [1, 768], strides = [1, 1]} : vector<8x768xf32> to vector<1x768xf32>
    %9 = vector.extract_strided_slice %6 {offsets = [2, 0], sizes = [1, 768], strides = [1, 1]} : vector<8x768xf32> to vector<1x768xf32>
    %10 = vector.extract_strided_slice %6 {offsets = [3, 0], sizes = [1, 768], strides = [1, 1]} : vector<8x768xf32> to vector<1x768xf32>
    %11 = vector.extract_strided_slice %6 {offsets = [4, 0], sizes = [1, 256], strides = [1, 1]} : vector<8x768xf32> to vector<1x256xf32>
    %12 = vector.extract_strided_slice %6 {offsets = [5, 0], sizes = [1, 128], strides = [1, 1]} : vector<8x768xf32> to vector<1x128xf32>
    %c0_3 = arith.constant 0 : index
    %c0_4 = arith.constant 0 : index
    %13 = vector.load %arg2[%c0_3, %c0_4] : memref<128x768xbf16, #tpu.memory_space<vmem>>, vector<128x768xbf16>
    %cst = arith.constant dense<0.000000e+00> : vector<16x768xf32>
    %14 = tpu.matmul %2, %13, %cst {dimension_numbers = #tpu.dot_dimension_numbers<[1], [0], [0], [1], [0, 0, 1, 1], [], []>} : vector<16x128xbf16>, vector<128x768xbf16>, vector<16x768xf32> -> vector<16x768xf32>
    %c0_5 = arith.constant 0 : index
    %c0_6 = arith.constant 0 : index
    %15 = vector.load %arg3[%c0_5, %c0_6] : memref<128x768xbf16, #tpu.memory_space<vmem>>, vector<128x768xbf16>
    %cst_7 = arith.constant dense<0.000000e+00> : vector<16x768xf32>
    %16 = tpu.matmul %4, %15, %cst_7 {dimension_numbers = #tpu.dot_dimension_numbers<[1], [0], [0], [1], [0, 0, 1, 1], [], []>} : vector<16x128xbf16>, vector<128x768xbf16>, vector<16x768xf32> -> vector<16x768xf32>
    %17 = arith.addf %14, %16 : vector<16x768xf32>
    %18 = vector.broadcast %7 : vector<1x768xf32> to vector<16x768xf32>
    %19 = arith.addf %17, %18 : vector<16x768xf32>
    %cst_8 = arith.constant 0.000000e+00 : f32
    %20 = vector.broadcast %cst_8 : f32 to vector<16x768xf32>
    %21 = arith.maximumf %19, %20 : vector<16x768xf32>
    %22 = arith.truncf %21 : vector<16x768xf32> to vector<16x768xbf16>
    %c0_9 = arith.constant 0 : index
    %c0_10 = arith.constant 0 : index
    %23 = vector.load %arg4[%c0_9, %c0_10] : memref<768x768xbf16, #tpu.memory_space<vmem>>, vector<768x768xbf16>
    %cst_11 = arith.constant dense<0.000000e+00> : vector<16x768xf32>
    %24 = tpu.matmul %22, %23, %cst_11 {dimension_numbers = #tpu.dot_dimension_numbers<[1], [0], [0], [1], [0, 0, 1, 1], [], []>} : vector<16x768xbf16>, vector<768x768xbf16>, vector<16x768xf32> -> vector<16x768xf32>
    %25 = vector.broadcast %8 : vector<1x768xf32> to vector<16x768xf32>
    %26 = arith.addf %24, %25 : vector<16x768xf32>
    %cst_12 = arith.constant 0.000000e+00 : f32
    %27 = vector.broadcast %cst_12 : f32 to vector<16x768xf32>
    %28 = arith.maximumf %26, %27 : vector<16x768xf32>
    %29 = arith.truncf %28 : vector<16x768xf32> to vector<16x768xbf16>
    %c0_13 = arith.constant 0 : index
    %c0_14 = arith.constant 0 : index
    %30 = vector.load %arg5[%c0_13, %c0_14] : memref<768x256xbf16, #tpu.memory_space<vmem>>, vector<768x256xbf16>
    %cst_15 = arith.constant dense<0.000000e+00> : vector<16x256xf32>
    %31 = tpu.matmul %29, %30, %cst_15 {dimension_numbers = #tpu.dot_dimension_numbers<[1], [0], [0], [1], [0, 0, 1, 1], [], []>} : vector<16x768xbf16>, vector<768x256xbf16>, vector<16x256xf32> -> vector<16x256xf32>
    %32 = vector.broadcast %11 : vector<1x256xf32> to vector<16x256xf32>
    %33 = arith.addf %31, %32 : vector<16x256xf32>
    %34 = vector.extract_strided_slice %33 {offsets = [0, 0], sizes = [16, 128], strides = [1, 1]} : vector<16x256xf32> to vector<16x128xf32>
    %35 = vector.extract_strided_slice %33 {offsets = [0, 128], sizes = [16, 128], strides = [1, 1]} : vector<16x256xf32> to vector<16x128xf32>
    %cst_16 = arith.constant -4.000000e+00 : f32
    %cst_17 = arith.constant 1.500000e+01 : f32
    %36 = vector.broadcast %cst_16 : f32 to vector<16x128xf32>
    %37 = arith.maximumf %36, %35 : vector<16x128xf32>
    %38 = vector.broadcast %cst_17 : f32 to vector<16x128xf32>
    %39 = arith.minimumf %38, %37 : vector<16x128xf32>
    %40 = math.exp %39 : vector<16x128xf32>
    %41 = arith.mulf %40, %5 : vector<16x128xf32>
    %42 = arith.addf %34, %41 : vector<16x128xf32>
    %c0_18 = arith.constant 0 : index
    %c0_19 = arith.constant 0 : index
    %43 = vector.load %arg6[%c0_18, %c0_19] : memref<128x768xbf16, #tpu.memory_space<vmem>>, vector<128x768xbf16>
    %cst_20 = arith.constant dense<0.000000e+00> : vector<16x768xf32>
    %44 = tpu.matmul %2, %43, %cst_20 {dimension_numbers = #tpu.dot_dimension_numbers<[1], [0], [0], [1], [0, 0, 1, 1], [], []>} : vector<16x128xbf16>, vector<128x768xbf16>, vector<16x768xf32> -> vector<16x768xf32>
    %45 = arith.truncf %42 : vector<16x128xf32> to vector<16x128xbf16>
    %c0_21 = arith.constant 0 : index
    %c0_22 = arith.constant 0 : index
    %46 = vector.load %arg7[%c0_21, %c0_22] : memref<128x768xbf16, #tpu.memory_space<vmem>>, vector<128x768xbf16>
    %cst_23 = arith.constant dense<0.000000e+00> : vector<16x768xf32>
    %47 = tpu.matmul %45, %46, %cst_23 {dimension_numbers = #tpu.dot_dimension_numbers<[1], [0], [0], [1], [0, 0, 1, 1], [], []>} : vector<16x128xbf16>, vector<128x768xbf16>, vector<16x768xf32> -> vector<16x768xf32>
    %48 = arith.addf %44, %47 : vector<16x768xf32>
    %49 = vector.broadcast %9 : vector<1x768xf32> to vector<16x768xf32>
    %50 = arith.addf %48, %49 : vector<16x768xf32>
    %cst_24 = arith.constant 0.000000e+00 : f32
    %51 = vector.broadcast %cst_24 : f32 to vector<16x768xf32>
    %52 = arith.maximumf %50, %51 : vector<16x768xf32>
    %53 = arith.truncf %52 : vector<16x768xf32> to vector<16x768xbf16>
    %c0_25 = arith.constant 0 : index
    %c0_26 = arith.constant 0 : index
    %54 = vector.load %arg8[%c0_25, %c0_26] : memref<768x768xbf16, #tpu.memory_space<vmem>>, vector<768x768xbf16>
    %cst_27 = arith.constant dense<0.000000e+00> : vector<16x768xf32>
    %55 = tpu.matmul %53, %54, %cst_27 {dimension_numbers = #tpu.dot_dimension_numbers<[1], [0], [0], [1], [0, 0, 1, 1], [], []>} : vector<16x768xbf16>, vector<768x768xbf16>, vector<16x768xf32> -> vector<16x768xf32>
    %56 = vector.broadcast %10 : vector<1x768xf32> to vector<16x768xf32>
    %57 = arith.addf %55, %56 : vector<16x768xf32>
    %cst_28 = arith.constant 0.000000e+00 : f32
    %58 = vector.broadcast %cst_28 : f32 to vector<16x768xf32>
    %59 = arith.maximumf %57, %58 : vector<16x768xf32>
    %60 = arith.truncf %59 : vector<16x768xf32> to vector<16x768xbf16>
    %c0_29 = arith.constant 0 : index
    %c0_30 = arith.constant 0 : index
    %61 = vector.load %arg9[%c0_29, %c0_30] : memref<768x128xbf16, #tpu.memory_space<vmem>>, vector<768x128xbf16>
    %cst_31 = arith.constant dense<0.000000e+00> : vector<16x128xf32>
    %62 = tpu.matmul %60, %61, %cst_31 {dimension_numbers = #tpu.dot_dimension_numbers<[1], [0], [0], [1], [0, 0, 1, 1], [], []>} : vector<16x768xbf16>, vector<768x128xbf16>, vector<16x128xf32> -> vector<16x128xf32>
    %63 = vector.broadcast %12 : vector<1x128xf32> to vector<16x128xf32>
    %64 = arith.addf %62, %63 : vector<16x128xf32>
    %65 = math.tanh %64 : vector<16x128xf32>
    %cst_32 = arith.constant 1.000000e+00 : f32
    %66 = vector.broadcast %cst_32 : f32 to vector<16x128xf32>
    %67 = arith.mulf %66, %65 : vector<16x128xf32>
    %c0_33 = arith.constant 0 : index
    %c0_34 = arith.constant 0 : index
    %68 = vector.load %arg11[%c0_33, %c0_34] : memref<16x384xf32, #tpu.memory_space<vmem>>, vector<16x128xf32>
    tpu.vector_store %arg11[%c0_33, %c0_34], %67 {strides = array<i32>} : memref<16x384xf32, #tpu.memory_space<vmem>>, vector<16x128xf32>,
    %c0_35 = arith.constant 0 : index
    %c128 = arith.constant 128 : index
    %69 = vector.load %arg11[%c0_35, %c128] : memref<16x384xf32, #tpu.memory_space<vmem>>, vector<16x128xf32>
    tpu.vector_store %arg11[%c0_35, %c128], %34 {strides = array<i32>} : memref<16x384xf32, #tpu.memory_space<vmem>>, vector<16x128xf32>,
    %c0_36 = arith.constant 0 : index
    %c256 = arith.constant 256 : index
    %70 = vector.load %arg11[%c0_36, %c256] : memref<16x384xf32, #tpu.memory_space<vmem>>, vector<16x128xf32>
    tpu.vector_store %arg11[%c0_36, %c256], %40 {strides = array<i32>} : memref<16x384xf32, #tpu.memory_space<vmem>>, vector<16x128xf32>,
    return
  }
  func.func @transform_0(%arg0: i32) -> (i32, i32) {
    %c0_i32 = arith.constant 0 : i32
    %c0_i32_0 = arith.constant 0 : i32
    return %arg0, %c0_i32 : i32, i32
  }
  func.func @transform_1(%arg0: i32) -> (i32, i32) {
    %c0_i32 = arith.constant 0 : i32
    %c0_i32_0 = arith.constant 0 : i32
    %c0_i32_1 = arith.constant 0 : i32
    return %c0_i32, %c0_i32_0 : i32, i32
  }
  func.func @transform_2(%arg0: i32) -> (i32, i32) {
    %c0_i32 = arith.constant 0 : i32
    %c0_i32_0 = arith.constant 0 : i32
    %c0_i32_1 = arith.constant 0 : i32
    return %c0_i32, %c0_i32_0 : i32, i32
  }
  func.func @transform_3(%arg0: i32) -> (i32, i32) {
    %c0_i32 = arith.constant 0 : i32
    %c0_i32_0 = arith.constant 0 : i32
    %c0_i32_1 = arith.constant 0 : i32
    return %c0_i32, %c0_i32_0 : i32, i32
  }
  func.func @transform_4(%arg0: i32) -> (i32, i32) {
    %c0_i32 = arith.constant 0 : i32
    %c0_i32_0 = arith.constant 0 : i32
    %c0_i32_1 = arith.constant 0 : i32
    return %c0_i32, %c0_i32_0 : i32, i32
  }
  func.func @transform_5(%arg0: i32) -> (i32, i32) {
    %c0_i32 = arith.constant 0 : i32
    %c0_i32_0 = arith.constant 0 : i32
    %c0_i32_1 = arith.constant 0 : i32
    return %c0_i32, %c0_i32_0 : i32, i32
  }
  func.func @transform_6(%arg0: i32) -> (i32, i32) {
    %c0_i32 = arith.constant 0 : i32
    %c0_i32_0 = arith.constant 0 : i32
    %c0_i32_1 = arith.constant 0 : i32
    return %c0_i32, %c0_i32_0 : i32, i32
  }
  func.func @transform_7(%arg0: i32) -> (i32, i32) {
    %c0_i32 = arith.constant 0 : i32
    %c0_i32_0 = arith.constant 0 : i32
    %c0_i32_1 = arith.constant 0 : i32
    return %c0_i32, %c0_i32_0 : i32, i32
  }
  func.func @transform_8(%arg0: i32) -> (i32, i32) {
    %c0_i32 = arith.constant 0 : i32
    %c0_i32_0 = arith.constant 0 : i32
    %c0_i32_1 = arith.constant 0 : i32
    return %c0_i32, %c0_i32_0 : i32, i32
  }
  func.func @transform_9(%arg0: i32) -> (i32, i32) {
    %c0_i32 = arith.constant 0 : i32
    %c0_i32_0 = arith.constant 0 : i32
    %c0_i32_1 = arith.constant 0 : i32
    return %c0_i32, %c0_i32_0 : i32, i32
  }
  func.func @transform_10(%arg0: i32) -> (i32, i32) {
    %c0_i32 = arith.constant 0 : i32
    %c0_i32_0 = arith.constant 0 : i32
    return %arg0, %c0_i32 : i32, i32
  }
}

</mosaic_0001>

<bundles_post_ra>
// kernel: _vae_forward.1
= control target key start
LH: loop header
LB: loop body
LE: loop exit
PB: predicated region body
PF: predicated region fallthrough
CT: control target
= control target key end

     0   :  { %15 = vsyncpa [#allocation3], 0  ;;  %s10612_s0 = inlined_call_operand.vmem [shape: f32[16,384], index: 0, kind: input, shape index: {}]   ;;  %s10613_s1 = inlined_call_operand.hbm [shape: bf16[128,768], index: 1, kind: input, shape index: {}]   ;;  %s10614_s2 = inlined_call_operand.hbm [shape: bf16[128,768], index: 2, kind: input, shape index: {}]   ;;  %s10615_s3 = inlined_call_operand.hbm [shape: bf16[768,768], index: 3, kind: input, shape index: {}]   ;;  %s10616_s4 = inlined_call_operand.hbm [shape: bf16[768,256], index: 4, kind: input, shape index: {}]   ;;  %s10617_s5 = inlined_call_operand.hbm [shape: bf16[128,768], index: 5, kind: input, shape index: {}]   ;;  %s10618_s6 = inlined_call_operand.hbm [shape: bf16[128,768], index: 6, kind: input, shape index: {}]   ;;  %s10619_s7 = inlined_call_operand.hbm [shape: bf16[768,768], index: 7, kind: input, shape index: {}]   ;;  %s10620_s8 = inlined_call_operand.hbm [shape: bf16[768,128], index: 8, kind: input, shape index: {}]   ;;  %s10621_s9 = inlined_call_operand.hbm [shape: f32[8,768], index: 9, kind: input, shape index: {}]   ;;  %s10622_s10 = inlined_call_operand.vmem [shape: f32[16,384], index: 10, kind: output, shape index: {}]  }
   0x1   :  { %16 = vsyncpa [#allocation5], 0 }
   0x2   :  { %17 = vsyncpa [#allocation8], 0 }
   0x3   :  { %18 = vsyncpa [#allocation11], 0 }
   0x4   :  { %19 = vsyncpa [#allocation14], 0  ;;  %s10190_s13 = smov [#allocation4]   ;;  %s10191_s15 = smov [#allocation7]  }
   0x5   :  { %s39_s14 = sshll.u32 %s10190_s13, 4  ;;  %s63_s16 = sshll.u32 %s10191_s15, 4  ;;  %s40_s14 = int_to_ptr.vmem [resolvable:$true] %s39_s14  ;;  %s10261_s16 = int_to_ptr.vmem [resolvable:$true] %s63_s16 }
   0x6   :  { %s9982_s19 = scalar_lea.hbm %s10614_s2, 6144 }
   0x7   :  { %p9983_p0 = scmp.ne.s32.totalorder %s10614_s2, %s9982_s19  ;;  %p9986_p1 = scmp.lt.u32.totalorder %s9982_s19, %s10614_s2 }
   0x9   :  { %p9988_p2 = pnand %p9986_p1, %p9983_p0 }
   0xb   :  { %9991 = shalt.err (!%p9988_p2)
}
   0xc   :  { %s9992_s24 = scalar_lea.vmem %s40_s14, 6144  ;;  %p9997_p4 = scmp.lt.s32.totalorder %s40_s14, %s40_s14 }
   0xd   :  { %p9993_p3 = scmp.ne.s32.totalorder %s40_s14, %s9992_s24  ;;  %p9998_p5 = scmp.lt.s32.totalorder %s9992_s24, %s9992_s24 }
   0xf   :  { %p9999_p6 = por %p9998_p5, %p9997_p4 }
  0x11   :  { %p10000_p7 = pnand %p9999_p6, %p9993_p3 }
  0x13   :  { %10003 = shalt.err (!%p10000_p7)
}
  0x14   :  { %s10192_s25 = smov 384   ;;  %s10193_s26 = smov 24  }
  0x15   :  { %45 = dma.hbm_to_vmem [thread:$0]  %s10614_s2, 6144, %s40_s14, [#allocation5], %s10192_s25, %s10192_s25, %s10193_s26  }
  0x16   :  { %s10004_s11 = scalar_lea.hbm %s10616_s4, 12288 }
  0x17   :  { %p10005_p8 = scmp.ne.s32.totalorder %s10616_s4, %s10004_s11  ;;  %p10008_p9 = scmp.lt.u32.totalorder %s10004_s11, %s10616_s4 }
  0x19   :  { %p10010_p10 = pnand %p10008_p9, %p10005_p8 }
  0x1b   :  { %10013 = shalt.err (!%p10010_p10)
}
  0x1c   :  { %s10014_s18 = scalar_lea.vmem %s10261_s16, 12288  ;;  %p10019_p12 = scmp.lt.s32.totalorder %s10261_s16, %s10261_s16 }
  0x1d   :  { %p10015_p11 = scmp.ne.s32.totalorder %s10261_s16, %s10014_s18  ;;  %p10020_p13 = scmp.lt.s32.totalorder %s10014_s18, %s10014_s18 }
  0x1f   :  { %p10021_p0 = por %p10020_p13, %p10019_p12 }
  0x21   :  { %p10022_p1 = pnand %p10021_p0, %p10015_p11 }
  0x23   :  { %10025 = shalt.err (!%p10022_p1)
}
  0x24   :  { %s10194_s2 = smov 128   ;;  %s10195_s14 = smov 8  }
  0x25   :  { %69 = dma.hbm_to_vmem [thread:$0]  %s10616_s4, 12288, %s10261_s16, [#allocation8], %s10194_s2, %s10194_s2, %s10195_s14  }
  0x26   :  { %s10196_s21 = smov [#allocation10]   ;;  %s10197_s23 = smov [#allocation13]  }
  0x27   :  { %s87_s22 = sshll.u32 %s10196_s21, 4  ;;  %s111_s24 = sshll.u32 %s10197_s23, 4  ;;  %s88_s22 = int_to_ptr.vmem [resolvable:$true] %s87_s22  ;;  %s10295_s24 = int_to_ptr.vmem [resolvable:$true] %s111_s24 }
  0x28   :  { %s10026_s29 = scalar_lea.hbm %s10618_s6, 6144 }
  0x29   :  { %p10027_p2 = scmp.ne.s32.totalorder %s10618_s6, %s10026_s29  ;;  %p10030_p3 = scmp.lt.u32.totalorder %s10026_s29, %s10618_s6 }
  0x2b   :  { %p10032_p4 = pnand %p10030_p3, %p10027_p2 }
  0x2d   :  { %10035 = shalt.err (!%p10032_p4)
}
  0x2e   :  { %s10036_s4 = scalar_lea.vmem %s88_s22, 6144  ;;  %p10041_p6 = scmp.lt.s32.totalorder %s88_s22, %s88_s22 }
  0x2f   :  { %p10037_p5 = scmp.ne.s32.totalorder %s88_s22, %s10036_s4  ;;  %p10042_p7 = scmp.lt.s32.totalorder %s10036_s4, %s10036_s4 }
  0x31   :  { %p10043_p8 = por %p10042_p7, %p10041_p6 }
  0x33   :  { %p10044_p9 = pnand %p10043_p8, %p10037_p5 }
  0x35   :  { %10047 = shalt.err (!%p10044_p9)
}
  0x36   :  { %93 = dma.hbm_to_vmem [thread:$0]  %s10618_s6, 6144, %s88_s22, [#allocation11], %s10192_s25, %s10192_s25, %s10193_s26  }
  0x37   :  { %s10048_s2 = scalar_lea.hbm %s10620_s8, 6144 }
  0x38   :  { %p10049_p10 = scmp.ne.s32.totalorder %s10620_s8, %s10048_s2  ;;  %p10052_p11 = scmp.lt.u32.totalorder %s10048_s2, %s10620_s8 }
  0x3a   :  { %p10054_p12 = pnand %p10052_p11, %p10049_p10 }
  0x3c   :  { %10057 = shalt.err (!%p10054_p12)
}
  0x3d   :  { %s10058_s23 = scalar_lea.vmem %s10295_s24, 6144  ;;  %p10063_p0 = scmp.lt.s32.totalorder %s10295_s24, %s10295_s24 }
  0x3e   :  { %p10059_p13 = scmp.ne.s32.totalorder %s10295_s24, %s10058_s23  ;;  %p10064_p1 = scmp.lt.s32.totalorder %s10058_s23, %s10058_s23 }
  0x40   :  { %p10065_p2 = por %p10064_p1, %p10063_p0 }
  0x42   :  { %p10066_p3 = pnand %p10065_p2, %p10059_p13 }
  0x44   :  { %10069 = shalt.err (!%p10066_p3)
}
  0x45   :  { %s10198_s6 = smov 64   ;;  %s10199_s22 = smov 4  }
  0x46   :  { %117 = dma.hbm_to_vmem [thread:$0]  %s10620_s8, 6144, %s10295_s24, [#allocation14], %s10198_s6, %s10198_s6, %s10199_s22  }
  0x47   :  { %s10200_s29 = smov [#allocation2]   ;;  %s10201_s11 = smov [#allocation6]  }
  0x48   :  { %s27_s30 = sshll.u32 %s10200_s29, 4  ;;  %s51_s12 = sshll.u32 %s10201_s11, 4  ;;  %s28_s30 = int_to_ptr.vmem [resolvable:$true] %s27_s30  ;;  %s10329_s12 = int_to_ptr.vmem [resolvable:$true] %s51_s12 }
  0x49   :  { %s10070_s16 = scalar_lea.hbm %s10613_s1, 6144 }
  0x4a   :  { %p10071_p4 = scmp.ne.s32.totalorder %s10613_s1, %s10070_s16  ;;  %p10074_p5 = scmp.lt.u32.totalorder %s10070_s16, %s10613_s1 }
  0x4c   :  { %p10076_p6 = pnand %p10074_p5, %p10071_p4 }
  0x4e   :  { %10079 = shalt.err (!%p10076_p6)
}
  0x4f   :  { %s10080_s8 = scalar_lea.vmem %s28_s30, 6144  ;;  %p10085_p8 = scmp.lt.s32.totalorder %s28_s30, %s28_s30 }
  0x50   :  { %p10081_p7 = scmp.ne.s32.totalorder %s28_s30, %s10080_s8  ;;  %p10086_p9 = scmp.lt.s32.totalorder %s10080_s8, %s10080_s8 }
  0x52   :  { %p10087_p10 = por %p10086_p9, %p10085_p8 }
  0x54   :  { %p10088_p11 = pnand %p10087_p10, %p10081_p7 }
  0x56   :  { %10091 = shalt.err (!%p10088_p11)
}
  0x57   :  { %33 = dma.hbm_to_vmem [thread:$0]  %s10613_s1, 6144, %s28_s30, [#allocation3], %s10192_s25, %s10192_s25, %s10193_s26  }
  0x58   :  { %s10092_s21 = scalar_lea.hbm %s10615_s3, 36864 }
  0x59   :  { %p10093_p12 = scmp.ne.s32.totalorder %s10615_s3, %s10092_s21  ;;  %p10096_p13 = scmp.lt.u32.totalorder %s10092_s21, %s10615_s3 }
  0x5b   :  { %p10098_p0 = pnand %p10096_p13, %p10093_p12 }
  0x5d   :  { %10101 = shalt.err (!%p10098_p0)
}
  0x5e   :  { %s10102_s28 = scalar_lea.vmem %s10329_s12, 36864  ;;  %p10107_p2 = scmp.lt.s32.totalorder %s10329_s12, %s10329_s12 }
  0x5f   :  { %p10103_p1 = scmp.ne.s32.totalorder %s10329_s12, %s10102_s28  ;;  %p10108_p3 = scmp.lt.s32.totalorder %s10102_s28, %s10102_s28 }
  0x61   :  { %p10109_p4 = por %p10108_p3, %p10107_p2 }
  0x63   :  { %p10110_p5 = pnand %p10109_p4, %p10103_p1 }
  0x65   :  { %10113 = shalt.err (!%p10110_p5)
}
  0x66   :  { %57 = dma.hbm_to_vmem [thread:$0]  %s10615_s3, 36864, %s10329_s12, [#allocation5], %s10192_s25, %s10192_s25, %s10193_s26  }
  0x67   :  { %s10202_s30 = smov [#allocation9]   ;;  %s10203_s13 = smov [#allocation12]  }
  0x68   :  { %s75_s11 = sshll.u32 %s10202_s30, 4  ;;  %s99_s4 = sshll.u32 %s10203_s13, 4  ;;  %s76_s11 = int_to_ptr.vmem [resolvable:$true] %s75_s11  ;;  %s10366_s4 = int_to_ptr.vmem [resolvable:$true] %s99_s4 }
  0x69   :  { %s10114_s17 = scalar_lea.hbm %s10617_s5, 6144 }
  0x6a   :  { %p10115_p6 = scmp.ne.s32.totalorder %s10617_s5, %s10114_s17  ;;  %p10118_p7 = scmp.lt.u32.totalorder %s10114_s17, %s10617_s5 }
  0x6c   :  { %p10120_p8 = pnand %p10118_p7, %p10115_p6 }
  0x6e   :  { %10123 = shalt.err (!%p10120_p8)
}
  0x6f   :  { %s10124_s3 = scalar_lea.vmem %s76_s11, 6144  ;;  %p10129_p10 = scmp.lt.s32.totalorder %s76_s11, %s76_s11 }
  0x70   :  { %p10125_p9 = scmp.ne.s32.totalorder %s76_s11, %s10124_s3  ;;  %p10130_p11 = scmp.lt.s32.totalorder %s10124_s3, %s10124_s3 }
  0x72   :  { %p10131_p12 = por %p10130_p11, %p10129_p10 }
  0x74   :  { %p10132_p13 = pnand %p10131_p12, %p10125_p9 }
  0x76   :  { %10135 = shalt.err (!%p10132_p13)
}
  0x77   :  { %81 = dma.hbm_to_vmem [thread:$0]  %s10617_s5, 6144, %s76_s11, [#allocation8], %s10192_s25, %s10192_s25, %s10193_s26  }
  0x78   :  { %s10136_s21 = scalar_lea.hbm %s10619_s7, 36864 }
  0x79   :  { %p10137_p0 = scmp.ne.s32.totalorder %s10619_s7, %s10136_s21  ;;  %p10140_p1 = scmp.lt.u32.totalorder %s10136_s21, %s10619_s7 }
  0x7b   :  { %p10142_p2 = pnand %p10140_p1, %p10137_p0 }
  0x7d   :  { %10145 = shalt.err (!%p10142_p2)
}
  0x7e   :  { %s10146_s28 = scalar_lea.vmem %s10366_s4, 36864  ;;  %p10151_p4 = scmp.lt.s32.totalorder %s10366_s4, %s10366_s4 }
  0x7f   :  { %p10147_p3 = scmp.ne.s32.totalorder %s10366_s4, %s10146_s28  ;;  %p10152_p5 = scmp.lt.s32.totalorder %s10146_s28, %s10146_s28 }
  0x81   :  { %p10153_p6 = por %p10152_p5, %p10151_p4 }
  0x83   :  { %p10154_p7 = pnand %p10153_p6, %p10147_p3 }
  0x85   :  { %10157 = shalt.err (!%p10154_p7)
}
  0x86   :  { %105 = dma.hbm_to_vmem [thread:$0]  %s10619_s7, 36864, %s10366_s4, [#allocation11], %s10192_s25, %s10192_s25, %s10193_s26  }
  0x87   :  { %s10204_s29 = smov [#allocation15]   ;;  %s10158_s16 = scalar_lea.hbm %s10621_s9, 768 }
  0x88   :  { %s124_s30 = sshll.u32 %s10204_s29, 4  ;;  %p10159_p8 = scmp.ne.s32.totalorder %s10621_s9, %s10158_s16  ;;  %s125_s30 = int_to_ptr.vmem [resolvable:$true] %s124_s30 }
  0x89   :  { %p10162_p9 = scmp.lt.u32.totalorder %s10158_s16, %s10621_s9 }
  0x8b   :  { %p10164_p10 = pnand %p10162_p9, %p10159_p8 }
  0x8d   :  { %10167 = shalt.err (!%p10164_p10)
}
  0x8e   :  { %s10168_s8 = scalar_lea.vmem %s125_s30, 768  ;;  %p10173_p12 = scmp.lt.s32.totalorder %s125_s30, %s125_s30 }
  0x8f   :  { %p10169_p11 = scmp.ne.s32.totalorder %s125_s30, %s10168_s8  ;;  %p10174_p13 = scmp.lt.s32.totalorder %s10168_s8, %s10168_s8 }
  0x91   :  { %p10175_p0 = por %p10174_p13, %p10173_p12 }
  0x93   :  { %p10176_p1 = pnand %p10175_p0, %p10169_p11 }
  0x95   :  { %10179 = shalt.err (!%p10176_p1)
}
  0x96   :  { %127 = dma.hbm_to_vmem [thread:$0]  %s10621_s9, 768, %s125_s30, [#allocation14]  }
  0x97   :  { %10180 = dma.done.wait [#allocation3], 6144  }
  0x98   :  { %10181 = vsyncadd [#allocation3], 4294961152 }
  0x99   :  { %10182 = dma.done.wait [#allocation5], 43008  }
  0x9a   :  { %10183 = vsyncadd [#allocation5], 4294924288 }
  0x9b   :  { %10184 = dma.done.wait [#allocation8], 18432  }
  0x9c   :  { %10185 = vsyncadd [#allocation8], 4294948864 }
  0x9d   :  { %10186 = dma.done.wait [#allocation11], 43008  }
  0x9e   :  { %10187 = vsyncadd [#allocation11], 4294924288 }
  0x9f   :  { %10188 = dma.done.wait [#allocation14], 6912  }
  0xa0   :  { %10189 = vsyncadd [#allocation14], 4294960384  ;;  %v10205_v0 = vmov 0   ;;  %v8616_v1 = vld [vmem:[#allocation4 + $0x4] ss:$24 sps:$4 sm:$0xff]   ;;  %v157_v33 = vld [vmem:[%s10612_s0 + $0x8] sm:$0xff] }
  0xa1   :  { %538 = vmatprep.mubr.bf16.mxu1 %v10205_v0  ;;  %624 = vmatprep.mubr.bf16.mxu0 %v10205_v0  ;;  %v8618_v2 = vld [vmem:[#allocation4 + $0x14] ss:$24 sps:$4 sm:$0xff]   ;;  %v8620_v3 = vld [vmem:[#allocation4] ss:$24 sps:$4 sm:$0xff]   ;;  %v8621_v4 = vld [vmem:[#allocation4 + $0x10] ss:$24 sps:$4 sm:$0xff]  }
  0xa2   :  { %506 = vmatprep.subr.bf16.mxu1 %v8616_v1  ;;  %592 = vmatprep.subr.bf16.mxu0 %v8618_v2  ;;  %v8622_v5 = vld [vmem:[#allocation4 + $0x34] ss:$24 sps:$4 sm:$0xff]   ;;  %v8624_v6 = vld [vmem:[#allocation4 + $0x44] ss:$24 sps:$4 sm:$0xff]   ;;  %v8626_v7 = vld [vmem:[#allocation4 + $0x30] ss:$24 sps:$4 sm:$0xff]  }
  0xa3   :  { %507 = vmatpush1.bf16.msra.mxu1 %v8620_v3  ;;  %593 = vmatpush1.bf16.msra.mxu0 %v8621_v4  ;;  %v8627_v8 = vld [vmem:[#allocation4 + $0x40] ss:$24 sps:$4 sm:$0xff]   ;;  %v8628_v9 = vld [vmem:[#allocation4 + $0x64] ss:$24 sps:$4 sm:$0xff]   ;;  %v8630_v10 = vld [vmem:[#allocation4 + $0x74] ss:$24 sps:$4 sm:$0xff]  }
  0xa4   :  { %508 = vmatprep.subr.bf16.mxu1 %v8622_v5  ;;  %594 = vmatprep.subr.bf16.mxu0 %v8624_v6  ;;  %v8632_v11 = vld [vmem:[#allocation4 + $0x60] ss:$24 sps:$4 sm:$0xff]   ;;  %v8633_v12 = vld [vmem:[#allocation4 + $0x70] ss:$24 sps:$4 sm:$0xff]   ;;  %v8634_v13 = vld [vmem:[#allocation4 + $0x94] ss:$24 sps:$4 sm:$0xff]  }
  0xa5   :  { %v8636_v14 = vld [vmem:[#allocation4 + $0xa4] ss:$24 sps:$4 sm:$0xff]   ;;  %v8638_v15 = vld [vmem:[#allocation4 + $0x90] ss:$24 sps:$4 sm:$0xff]   ;;  %v8639_v16 = vld [vmem:[#allocation4 + $0xa0] ss:$24 sps:$4 sm:$0xff]  }
  0xa6   :  { %v8640_v17 = vld [vmem:[#allocation4 + $0xc4] ss:$24 sps:$4 sm:$0xff]   ;;  %v8642_v18 = vld [vmem:[#allocation4 + $0xd4] ss:$24 sps:$4 sm:$0xff]   ;;  %v8644_v19 = vld [vmem:[#allocation4 + $0xc0] ss:$24 sps:$4 sm:$0xff]  }
  0xa7   :  { %509 = vmatpush1.bf16.msra.mxu1 %v8626_v7  ;;  %595 = vmatpush1.bf16.msra.mxu0 %v8627_v8  ;;  %v8645_v20 = vld [vmem:[#allocation4 + $0xd0] ss:$24 sps:$4 sm:$0xff]   ;;  %v8646_v21 = vld [vmem:[#allocation4 + $0xf4] ss:$24 sps:$4 sm:$0xff]   ;;  %v8648_v22 = vld [vmem:[#allocation4 + $0x104] ss:$24 sps:$4 sm:$0xff]  }
  0xa8   :  { %510 = vmatprep.subr.bf16.mxu1 %v8628_v9  ;;  %596 = vmatprep.subr.bf16.mxu0 %v8630_v10  ;;  %v8650_v23 = vld [vmem:[#allocation4 + $0xf0] ss:$24 sps:$4 sm:$0xff]   ;;  %v8651_v24 = vld [vmem:[#allocation4 + $0x100] ss:$24 sps:$4 sm:$0xff]   ;;  %v8652_v25 = vld [vmem:[#allocation4 + $0x124] ss:$24 sps:$4 sm:$0xff]  }
  0xa9   :  { %v8654_v26 = vld [vmem:[#allocation4 + $0x134] ss:$24 sps:$4 sm:$0xff]   ;;  %v8656_v27 = vld [vmem:[#allocation4 + $0x120] ss:$24 sps:$4 sm:$0xff]   ;;  %v8657_v28 = vld [vmem:[#allocation4 + $0x130] ss:$24 sps:$4 sm:$0xff]  }
  0xaa   :  { %v8658_v29 = vld [vmem:[#allocation4 + $0x154] ss:$24 sps:$4 sm:$0xff]   ;;  %v8660_v30 = vld [vmem:[#allocation4 + $0x164] ss:$24 sps:$4 sm:$0xff]   ;;  %v8662_v31 = vld [vmem:[#allocation4 + $0x150] ss:$24 sps:$4 sm:$0xff]  }
  0xab   :  { %511 = vmatpush1.bf16.msra.mxu1 %v8632_v11  ;;  %597 = vmatpush1.bf16.msra.mxu0 %v8633_v12  ;;  %v8663_v32 = vld [vmem:[#allocation4 + $0x160] ss:$24 sps:$4 sm:$0xff]   ;;  %v8666_v35 = vld [vmem:[#allocation4 + $0xc] ss:$24 sps:$4 sm:$0xff]   ;;  %v8672_v40 = vld [vmem:[#allocation4 + $0x3c] ss:$24 sps:$4 sm:$0xff]  }
  0xac   :  { %512 = vmatprep.subr.bf16.mxu1 %v8634_v13  ;;  %598 = vmatprep.subr.bf16.mxu0 %v8636_v14  ;;  %v160_v34 = vld [vmem:[%s10612_s0 + $0x20] sm:$0xff]  ;;  %v8675_v41 = vld [vmem:[#allocation2 + $0x34] ss:$24 sps:$4 sm:$0xff]   ;;  %v8670_v42 = vld [vmem:[#allocation4 + $0x38] ss:$24 sps:$4 sm:$0xff]  }
  0xad   :  { %v8669_v36 = vld [vmem:[#allocation2 + $0x4] ss:$24 sps:$4 sm:$0xff]   ;;  %v10423_v37 = vpack.c.bf16 %v160_v34, %v157_v33  ;;  %v8664_v38 = vld [vmem:[#allocation4 + $0x8] ss:$24 sps:$4 sm:$0xff]   ;;  %v8687_v49 = vld [vmem:[#allocation2 + $0x94] ss:$24 sps:$4 sm:$0xff]  }
  0xae   :  { %v8667_v39 = vld [vmem:[#allocation2] ss:$24 sps:$4 sm:$0xff]   ;;  %v8673_v43 = vld [vmem:[#allocation2 + $0x30] ss:$24 sps:$4 sm:$0xff]   ;;  %v8678_v44 = vld [vmem:[#allocation4 + $0x6c] ss:$24 sps:$4 sm:$0xff]  }
  0xaf   :  { %513 = vmatpush1.bf16.msra.mxu1 %v8638_v15  ;;  %599 = vmatpush1.bf16.msra.mxu0 %v8639_v16  ;;  %v8681_v45 = vld [vmem:[#allocation2 + $0x64] ss:$24 sps:$4 sm:$0xff]   ;;  %v8676_v46 = vld [vmem:[#allocation4 + $0x68] ss:$24 sps:$4 sm:$0xff]   ;;  %v8682_v50 = vld [vmem:[#allocation4 + $0x98] ss:$24 sps:$4 sm:$0xff]  }
  0xb0   :  { %514 = vmatprep.subr.bf16.mxu1 %v8640_v17  ;;  %600 = vmatprep.subr.bf16.mxu0 %v8642_v18  ;;  %v8679_v47 = vld [vmem:[#allocation2 + $0x60] ss:$24 sps:$4 sm:$0xff]   ;;  %v8684_v48 = vld [vmem:[#allocation4 + $0x9c] ss:$24 sps:$4 sm:$0xff]   ;;  %v8685_v51 = vld [vmem:[#allocation2 + $0x90] ss:$24 sps:$4 sm:$0xff]  }
  0xb1   :  { %v8690_v52 = vld [vmem:[#allocation4 + $0xcc] ss:$24 sps:$4 sm:$0xff]   ;;  %v8688_v54 = vld [vmem:[#allocation4 + $0xc8] ss:$24 sps:$4 sm:$0xff]   ;;  %v8696_v56 = vld [vmem:[#allocation4 + $0xfc] ss:$24 sps:$4 sm:$0xff]  }
  0xb2   :  { %v8693_v53 = vld [vmem:[#allocation2 + $0xc4] ss:$24 sps:$4 sm:$0xff]   ;;  %v8691_v55 = vld [vmem:[#allocation2 + $0xc0] ss:$24 sps:$4 sm:$0xff]   ;;  %v8699_v57 = vld [vmem:[#allocation2 + $0xf4] ss:$24 sps:$4 sm:$0xff]  }
  0xb3   :  { %515 = vmatpush1.bf16.msra.mxu1 %v8644_v19  ;;  %601 = vmatpush1.bf16.msra.mxu0 %v8645_v20  ;;  %v8694_v58 = vld [vmem:[#allocation4 + $0xf8] ss:$24 sps:$4 sm:$0xff]   ;;  %v8702_v60 = vld [vmem:[#allocation4 + $0x12c] ss:$24 sps:$4 sm:$0xff]   ;;  %v8700_v62 = vld [vmem:[#allocation4 + $0x128] ss:$24 sps:$4 sm:$0xff]  }
  0xb4   :  { %516 = vmatprep.subr.bf16.mxu1 %v8646_v21  ;;  %602 = vmatprep.subr.bf16.mxu0 %v8648_v22  ;;  %v8697_v59 = vld [vmem:[#allocation2 + $0xf0] ss:$24 sps:$4 sm:$0xff]   ;;  %v8705_v61 = vld [vmem:[#allocation2 + $0x124] ss:$24 sps:$4 sm:$0xff]   ;;  %v8703_v63 = vld [vmem:[#allocation2 + $0x120] ss:$24 sps:$4 sm:$0xff]  }
  0xb5   :  { %v8708_v1 = vld [vmem:[#allocation4 + $0x15c] ss:$24 sps:$4 sm:$0xff]   ;;  %v8706_v3 = vld [vmem:[#allocation4 + $0x158] ss:$24 sps:$4 sm:$0xff]   ;;  %v156_v5 = vld [vmem:[%s10612_s0] sm:$0xff] }
  0xb6   :  { %v8711_v2 = vld [vmem:[#allocation2 + $0x154] ss:$24 sps:$4 sm:$0xff]   ;;  %v8709_v4 = vld [vmem:[#allocation2 + $0x150] ss:$24 sps:$4 sm:$0xff]   ;;  %v159_v6 = vld [vmem:[%s10612_s0 + $0x18] sm:$0xff] }
  0xb7   :  { %517 = vmatpush1.bf16.msra.mxu1 %v8650_v23  ;;  %603 = vmatpush1.bf16.msra.mxu0 %v8651_v24  ;;  %v8714_v7 = vld [vmem:[#allocation2 + $0xc] ss:$24 sps:$4 sm:$0xff]   ;;  %v10435_v9 = vpack.c.bf16 %v159_v6, %v156_v5  ;;  %v8712_v10 = vld [vmem:[#allocation2 + $0x8] ss:$24 sps:$4 sm:$0xff]   ;;  %v8720_v12 = vld [vmem:[#allocation2 + $0x3c] ss:$24 sps:$4 sm:$0xff]  }
  0xb8   :  { %518 = vmatprep.subr.bf16.mxu1 %v8652_v25  ;;  %604 = vmatprep.subr.bf16.mxu0 %v8654_v26  ;;  %v8717_v8 = vld [vmem:[#allocation2 + $0x14] ss:$24 sps:$4 sm:$0xff]   ;;  %v8715_v11 = vld [vmem:[#allocation2 + $0x10] ss:$24 sps:$4 sm:$0xff]   ;;  %v8723_v13 = vld [vmem:[#allocation2 + $0x44] ss:$24 sps:$4 sm:$0xff]  }
  0xb9   :  { %v8718_v14 = vld [vmem:[#allocation2 + $0x38] ss:$24 sps:$4 sm:$0xff]   ;;  %v8726_v16 = vld [vmem:[#allocation2 + $0x6c] ss:$24 sps:$4 sm:$0xff]   ;;  %v8724_v18 = vld [vmem:[#allocation2 + $0x68] ss:$24 sps:$4 sm:$0xff]  }
  0xba   :  { %v8721_v15 = vld [vmem:[#allocation2 + $0x40] ss:$24 sps:$4 sm:$0xff]   ;;  %v8729_v17 = vld [vmem:[#allocation2 + $0x74] ss:$24 sps:$4 sm:$0xff]   ;;  %v8727_v19 = vld [vmem:[#allocation2 + $0x70] ss:$24 sps:$4 sm:$0xff]  }
  0xbb   :  { %519 = vmatpush1.bf16.msra.mxu1 %v8656_v27  ;;  %605 = vmatpush1.bf16.msra.mxu0 %v8657_v28  ;;  %v8732_v20 = vld [vmem:[#allocation2 + $0x9c] ss:$24 sps:$4 sm:$0xff]   ;;  %v8730_v22 = vld [vmem:[#allocation2 + $0x98] ss:$24 sps:$4 sm:$0xff]   ;;  %v8738_v24 = vld [vmem:[#allocation2 + $0xcc] ss:$24 sps:$4 sm:$0xff]  }
  0xbc   :  { %520 = vmatprep.subr.bf16.mxu1 %v8658_v29  ;;  %606 = vmatprep.subr.bf16.mxu0 %v8660_v30  ;;  %v8735_v21 = vld [vmem:[#allocation2 + $0xa4] ss:$24 sps:$4 sm:$0xff]   ;;  %v8733_v23 = vld [vmem:[#allocation2 + $0xa0] ss:$24 sps:$4 sm:$0xff]   ;;  %v8741_v25 = vld [vmem:[#allocation2 + $0xd4] ss:$24 sps:$4 sm:$0xff]  }
  0xbd   :  { %v8736_v26 = vld [vmem:[#allocation2 + $0xc8] ss:$24 sps:$4 sm:$0xff]   ;;  %v8744_v28 = vld [vmem:[#allocation2 + $0xfc] ss:$24 sps:$4 sm:$0xff]   ;;  %v8742_v30 = vld [vmem:[#allocation2 + $0xf8] ss:$24 sps:$4 sm:$0xff]  }
  0xbe   :  { %v8739_v27 = vld [vmem:[#allocation2 + $0xd0] ss:$24 sps:$4 sm:$0xff]   ;;  %v8747_v29 = vld [vmem:[#allocation2 + $0x104] ss:$24 sps:$4 sm:$0xff]   ;;  %v8753_v33 = vld [vmem:[#allocation2 + $0x134] ss:$24 sps:$4 sm:$0xff]  }
  0xbf   :  { %521 = vmatpush1.bf16.msra.mxu1 %v8662_v31  ;;  %607 = vmatpush1.bf16.msra.mxu0 %v8663_v32  ;;  %v8745_v31 = vld [vmem:[#allocation2 + $0x100] ss:$24 sps:$4 sm:$0xff]   ;;  %v8750_v32 = vld [vmem:[#allocation2 + $0x12c] ss:$24 sps:$4 sm:$0xff]   ;;  %v8807_v6 = vld [vmem:[#allocation6 + $0x15c] ss:$24 sps:$4 sm:$0xff]  }
  0xc0   :  { %549 = vmatprep.subr.bf16.mxu1 %v8666_v35  ;;  %875 = vmatprep.subr.bf16.mxu0 %v8669_v36  ;;  %v8748_v34 = vld [vmem:[#allocation2 + $0x128] ss:$24 sps:$4 sm:$0xff]   ;;  %v8756_v36 = vld [vmem:[#allocation2 + $0x15c] ss:$24 sps:$4 sm:$0xff]  }
  0xc1   :  { %v8751_v35 = vld [vmem:[#allocation2 + $0x130] ss:$24 sps:$4 sm:$0xff]   ;;  %v8804_v5 = vld [vmem:[#allocation6 + $0x154] ss:$24 sps:$4 sm:$0xff]  }
  0xc2   :  { %539 = vmatmul.mubr.bf16.vlgmr.msra.gmra.mrb[0].mxu1 %v10423_v37  ;;  %625 = vmatmul.mubr.bf16.vlgmr.msra.gmra.mrb[0].mxu0 %v10423_v37 }
  0xc3   :  { %550 = vmatpush1.bf16.msra.mxu1 %v8664_v38  ;;  %876 = vmatpush1.bf16.msra.mxu0 %v8667_v39  ;;  %v8754_v38 = vld [vmem:[#allocation2 + $0x158] ss:$24 sps:$4 sm:$0xff]  }
  0xc4   :  { %551 = vmatprep.subr.bf16.mxu1 %v8672_v40  ;;  %877 = vmatprep.subr.bf16.mxu0 %v8675_v41  ;;  %v8757_v39 = vld [vmem:[#allocation2 + $0x160] ss:$24 sps:$4 sm:$0xff]   ;;  %v8762_v40 = vld [vmem:[#allocation6 + $0x4] ss:$24 sps:$4 sm:$0xff]  }
  0xc5   :  { %907 = vmatprep.mubr.bf16.mxu0 %v10205_v0  ;;  %581 = vmatprep.mubr.bf16.mxu1 %v10205_v0  ;;  %v8765_v41 = vld [vmem:[#allocation6 + $0xc] ss:$24 sps:$4 sm:$0xff]  }
  0xc7   :  { %552 = vmatpush1.bf16.msra.mxu1 %v8670_v42  ;;  %878 = vmatpush1.bf16.msra.mxu0 %v8673_v43  ;;  %v8760_v42 = vld [vmem:[#allocation6] ss:$24 sps:$4 sm:$0xff]  }
  0xc8   :  { %553 = vmatprep.subr.bf16.mxu1 %v8678_v44  ;;  %879 = vmatprep.subr.bf16.mxu0 %v8681_v45  ;;  %v8763_v43 = vld [vmem:[#allocation6 + $0x8] ss:$24 sps:$4 sm:$0xff]   ;;  %v8768_v44 = vld [vmem:[#allocation6 + $0x34] ss:$24 sps:$4 sm:$0xff]  }
  0xc9   :  { %v8771_v45 = vld [vmem:[#allocation6 + $0x3c] ss:$24 sps:$4 sm:$0xff]  }
  0xcb   :  { %554 = vmatpush1.bf16.msra.mxu1 %v8676_v46  ;;  %880 = vmatpush1.bf16.msra.mxu0 %v8679_v47  ;;  %v8766_v46 = vld [vmem:[#allocation6 + $0x30] ss:$24 sps:$4 sm:$0xff]  }
  0xcc   :  { %555 = vmatprep.subr.bf16.mxu1 %v8684_v48  ;;  %881 = vmatprep.subr.bf16.mxu0 %v8687_v49  ;;  %v8769_v47 = vld [vmem:[#allocation6 + $0x38] ss:$24 sps:$4 sm:$0xff]   ;;  %v8774_v48 = vld [vmem:[#allocation6 + $0x64] ss:$24 sps:$4 sm:$0xff]  }
  0xcd   :  { %v8777_v49 = vld [vmem:[#allocation6 + $0x6c] ss:$24 sps:$4 sm:$0xff]  }
  0xcf   :  { %556 = vmatpush1.bf16.msra.mxu1 %v8682_v50  ;;  %882 = vmatpush1.bf16.msra.mxu0 %v8685_v51  ;;  %v8772_v50 = vld [vmem:[#allocation6 + $0x60] ss:$24 sps:$4 sm:$0xff]  }
  0xd0   :  { %557 = vmatprep.subr.bf16.mxu1 %v8690_v52  ;;  %883 = vmatprep.subr.bf16.mxu0 %v8693_v53  ;;  %v8775_v51 = vld [vmem:[#allocation6 + $0x68] ss:$24 sps:$4 sm:$0xff]   ;;  %v8780_v52 = vld [vmem:[#allocation6 + $0x94] ss:$24 sps:$4 sm:$0xff]  }
  0xd1   :  { %v8783_v53 = vld [vmem:[#allocation6 + $0x9c] ss:$24 sps:$4 sm:$0xff]  }
  0xd3   :  { %558 = vmatpush1.bf16.msra.mxu1 %v8688_v54  ;;  %884 = vmatpush1.bf16.msra.mxu0 %v8691_v55  ;;  %v8778_v54 = vld [vmem:[#allocation6 + $0x90] ss:$24 sps:$4 sm:$0xff]  }
  0xd4   :  { %559 = vmatprep.subr.bf16.mxu1 %v8696_v56  ;;  %885 = vmatprep.subr.bf16.mxu0 %v8699_v57  ;;  %v8781_v55 = vld [vmem:[#allocation6 + $0x98] ss:$24 sps:$4 sm:$0xff]   ;;  %v8786_v56 = vld [vmem:[#allocation6 + $0xc4] ss:$24 sps:$4 sm:$0xff]  }
  0xd5   :  { %v8789_v57 = vld [vmem:[#allocation6 + $0xcc] ss:$24 sps:$4 sm:$0xff]  }
  0xd7   :  { %560 = vmatpush1.bf16.msra.mxu1 %v8694_v58  ;;  %886 = vmatpush1.bf16.msra.mxu0 %v8697_v59  ;;  %v8784_v58 = vld [vmem:[#allocation6 + $0xc0] ss:$24 sps:$4 sm:$0xff]  }
  0xd8   :  { %561 = vmatprep.subr.bf16.mxu1 %v8702_v60  ;;  %887 = vmatprep.subr.bf16.mxu0 %v8705_v61  ;;  %v8787_v59 = vld [vmem:[#allocation6 + $0xc8] ss:$24 sps:$4 sm:$0xff]   ;;  %v8792_v60 = vld [vmem:[#allocation6 + $0xf4] ss:$24 sps:$4 sm:$0xff]  }
  0xd9   :  { %v8795_v61 = vld [vmem:[#allocation6 + $0xfc] ss:$24 sps:$4 sm:$0xff]  }
  0xdb   :  { %562 = vmatpush1.bf16.msra.mxu1 %v8700_v62  ;;  %888 = vmatpush1.bf16.msra.mxu0 %v8703_v63  ;;  %v8790_v62 = vld [vmem:[#allocation6 + $0xf0] ss:$24 sps:$4 sm:$0xff]  }
  0xdc   :  { %563 = vmatprep.subr.bf16.mxu1 %v8708_v1  ;;  %889 = vmatprep.subr.bf16.mxu0 %v8711_v2  ;;  %v8793_v63 = vld [vmem:[#allocation6 + $0xf8] ss:$24 sps:$4 sm:$0xff]   ;;  %v8798_v1 = vld [vmem:[#allocation6 + $0x124] ss:$24 sps:$4 sm:$0xff]  }
  0xdd   :  { %v8801_v2 = vld [vmem:[#allocation6 + $0x12c] ss:$24 sps:$4 sm:$0xff]  }
  0xdf   :  { %564 = vmatpush1.bf16.msra.mxu1 %v8706_v3  ;;  %890 = vmatpush1.bf16.msra.mxu0 %v8709_v4  ;;  %v8796_v3 = vld [vmem:[#allocation6 + $0x120] ss:$24 sps:$4 sm:$0xff]  }
  0xe0   :  { %918 = vmatprep.subr.bf16.mxu1 %v8714_v7  ;;  %961 = vmatprep.subr.bf16.mxu0 %v8717_v8  ;;  %v8799_v4 = vld [vmem:[#allocation6 + $0x128] ss:$24 sps:$4 sm:$0xff]   ;;  %v8805_v8 = vld [vmem:[#allocation6 + $0x158] ss:$24 sps:$4 sm:$0xff]  }
  0xe1   :  { %v8802_v7 = vld [vmem:[#allocation6 + $0x150] ss:$24 sps:$4 sm:$0xff]  }
  0xe2   :  { %908 = vmatmul.mubr.bf16.vlgmr.msra.gmra.mrb[4].mxu0 %v10435_v9  ;;  %582 = vmatmul.mubr.bf16.vlgmr.msra.gmra.mrb[4].mxu1 %v10423_v37  ;;  %v8759_v37 = vld [vmem:[#allocation2 + $0x164] ss:$24 sps:$4 sm:$0xff]  }
  0xe3   :  { %919 = vmatpush1.bf16.msra.mxu1 %v8712_v10  ;;  %962 = vmatpush1.bf16.msra.mxu0 %v8715_v11  ;;  %v8810_v10 = vld [vmem:[#allocation6 + $0x184] ss:$24 sps:$4 sm:$0xff]  }
  0xe4   :  { %920 = vmatprep.subr.bf16.mxu1 %v8720_v12  ;;  %963 = vmatprep.subr.bf16.mxu0 %v8723_v13  ;;  %v8813_v11 = vld [vmem:[#allocation6 + $0x18c] ss:$24 sps:$4 sm:$0xff]   ;;  %v8808_v12 = vld [vmem:[#allocation6 + $0x180] ss:$24 sps:$4 sm:$0xff]  }
  0xe5   :  { %950 = vmatprep.mubr.bf16.mxu1 %v10205_v0  ;;  %993 = vmatprep.mubr.bf16.mxu0 %v10205_v0  ;;  %v8811_v13 = vld [vmem:[#allocation6 + $0x188] ss:$24 sps:$4 sm:$0xff]  }
  0xe7   :  { %921 = vmatpush1.bf16.msra.mxu1 %v8718_v14  ;;  %964 = vmatpush1.bf16.msra.mxu0 %v8721_v15  ;;  %v8816_v14 = vld [vmem:[#allocation6 + $0x1b4] ss:$24 sps:$4 sm:$0xff]  }
  0xe8   :  { %922 = vmatprep.subr.bf16.mxu1 %v8726_v16  ;;  %965 = vmatprep.subr.bf16.mxu0 %v8729_v17  ;;  %v8819_v15 = vld [vmem:[#allocation6 + $0x1bc] ss:$24 sps:$4 sm:$0xff]   ;;  %v8814_v16 = vld [vmem:[#allocation6 + $0x1b0] ss:$24 sps:$4 sm:$0xff]  }
  0xe9   :  { %v8817_v17 = vld [vmem:[#allocation6 + $0x1b8] ss:$24 sps:$4 sm:$0xff]  }
  0xeb   :  { %923 = vmatpush1.bf16.msra.mxu1 %v8724_v18  ;;  %966 = vmatpush1.bf16.msra.mxu0 %v8727_v19  ;;  %v8822_v18 = vld [vmem:[#allocation6 + $0x1e4] ss:$24 sps:$4 sm:$0xff]  }
  0xec   :  { %924 = vmatprep.subr.bf16.mxu1 %v8732_v20  ;;  %967 = vmatprep.subr.bf16.mxu0 %v8735_v21  ;;  %v8825_v19 = vld [vmem:[#allocation6 + $0x1ec] ss:$24 sps:$4 sm:$0xff]   ;;  %v8820_v20 = vld [vmem:[#allocation6 + $0x1e0] ss:$24 sps:$4 sm:$0xff]  }
  0xed   :  { %v8823_v21 = vld [vmem:[#allocation6 + $0x1e8] ss:$24 sps:$4 sm:$0xff]  }
  0xef   :  { %925 = vmatpush1.bf16.msra.mxu1 %v8730_v22  ;;  %968 = vmatpush1.bf16.msra.mxu0 %v8733_v23  ;;  %v8828_v22 = vld [vmem:[#allocation6 + $0x214] ss:$24 sps:$4 sm:$0xff]  }
  0xf0   :  { %926 = vmatprep.subr.bf16.mxu1 %v8738_v24  ;;  %969 = vmatprep.subr.bf16.mxu0 %v8741_v25  ;;  %v8831_v23 = vld [vmem:[#allocation6 + $0x21c] ss:$24 sps:$4 sm:$0xff]   ;;  %v8826_v24 = vld [vmem:[#allocation6 + $0x210] ss:$24 sps:$4 sm:$0xff]  }
  0xf1   :  { %v8829_v25 = vld [vmem:[#allocation6 + $0x218] ss:$24 sps:$4 sm:$0xff]  }
  0xf3   :  { %927 = vmatpush1.bf16.msra.mxu1 %v8736_v26  ;;  %970 = vmatpush1.bf16.msra.mxu0 %v8739_v27  ;;  %v8834_v26 = vld [vmem:[#allocation6 + $0x244] ss:$24 sps:$4 sm:$0xff]  }
  0xf4   :  { %928 = vmatprep.subr.bf16.mxu1 %v8744_v28  ;;  %971 = vmatprep.subr.bf16.mxu0 %v8747_v29  ;;  %v8837_v27 = vld [vmem:[#allocation6 + $0x24c] ss:$24 sps:$4 sm:$0xff]   ;;  %v8832_v28 = vld [vmem:[#allocation6 + $0x240] ss:$24 sps:$4 sm:$0xff]  }
  0xf5   :  { %v8835_v29 = vld [vmem:[#allocation6 + $0x248] ss:$24 sps:$4 sm:$0xff]  }
  0xf7   :  { %929 = vmatpush1.bf16.msra.mxu1 %v8742_v30  ;;  %972 = vmatpush1.bf16.msra.mxu0 %v8745_v31  ;;  %v8840_v30 = vld [vmem:[#allocation6 + $0x274] ss:$24 sps:$4 sm:$0xff]  }
  0xf8   :  { %930 = vmatprep.subr.bf16.mxu1 %v8750_v32  ;;  %973 = vmatprep.subr.bf16.mxu0 %v8753_v33  ;;  %v8843_v31 = vld [vmem:[#allocation6 + $0x27c] ss:$24 sps:$4 sm:$0xff]   ;;  %v8838_v32 = vld [vmem:[#allocation6 + $0x270] ss:$24 sps:$4 sm:$0xff]  }
  0xf9   :  { %v8841_v33 = vld [vmem:[#allocation6 + $0x278] ss:$24 sps:$4 sm:$0xff]  }
  0xfb   :  { %931 = vmatpush1.bf16.msra.mxu1 %v8748_v34  ;;  %974 = vmatpush1.bf16.msra.mxu0 %v8751_v35  ;;  %v8846_v34 = vld [vmem:[#allocation6 + $0x2a4] ss:$24 sps:$4 sm:$0xff]  }
  0xfc   :  { %932 = vmatprep.subr.bf16.mxu1 %v8756_v36  ;;  %975 = vmatprep.subr.bf16.mxu0 %v8759_v37  ;;  %v8849_v35 = vld [vmem:[#allocation6 + $0x2ac] ss:$24 sps:$4 sm:$0xff]   ;;  %v8844_v36 = vld [vmem:[#allocation6 + $0x2a0] ss:$24 sps:$4 sm:$0xff]  }
  0xfd   :  { %v8847_v37 = vld [vmem:[#allocation6 + $0x2a8] ss:$24 sps:$4 sm:$0xff]  }
  0xff   :  { %933 = vmatpush1.bf16.msra.mxu1 %v8754_v38  ;;  %976 = vmatpush1.bf16.msra.mxu0 %v8757_v39  ;;  %v8852_v38 = vld [vmem:[#allocation6 + $0x2d4] ss:$24 sps:$4 sm:$0xff]  }
 0x100   :  { %2810 = vmatprep.subr.bf16.mxu1 %v8762_v40  ;;  %2939 = vmatprep.subr.bf16.mxu0 %v8765_v41  ;;  %v8855_v39 = vld [vmem:[#allocation6 + $0x2dc] ss:$24 sps:$4 sm:$0xff]   ;;  %v8850_v40 = vld [vmem:[#allocation6 + $0x2d0] ss:$24 sps:$4 sm:$0xff]  }
 0x101   :  { %v8853_v41 = vld [vmem:[#allocation6 + $0x2d8] ss:$24 sps:$4 sm:$0xff]  }
 0x102   :  { %951 = vmatmul.mubr.bf16.vlgmr.msra.gmra.mrb[4].mxu1 %v10435_v9  ;;  %994 = vmatmul.mubr.bf16.vlgmr.msra.gmra.mrb[0].mxu0 %v10435_v9 }
 0x103   :  { %2811 = vmatpush1.bf16.msra.mxu1 %v8760_v42  ;;  %2940 = vmatpush1.bf16.msra.mxu0 %v8763_v43  ;;  %v8858_v42 = vld [vmem:[#allocation6 + $0x304] ss:$24 sps:$4 sm:$0xff]  }
 0x104   :  { %2812 = vmatprep.subr.bf16.mxu1 %v8768_v44  ;;  %2941 = vmatprep.subr.bf16.mxu0 %v8771_v45  ;;  %v8861_v43 = vld [vmem:[#allocation6 + $0x30c] ss:$24 sps:$4 sm:$0xff]  }
 0x107   :  { %2813 = vmatpush1.bf16.msra.mxu1 %v8766_v46  ;;  %2942 = vmatpush1.bf16.msra.mxu0 %v8769_v47 }
 0x108   :  { %2814 = vmatprep.subr.bf16.mxu1 %v8774_v48  ;;  %2943 = vmatprep.subr.bf16.mxu0 %v8777_v49  ;;  %v1004_v48 = vlaneseq }
 0x10a   :  { %v10443_v49 = vshrl.u32 %v1004_v48, 7 }
 0x10b   :  { %2815 = vmatpush1.bf16.msra.mxu1 %v8772_v50  ;;  %2944 = vmatpush1.bf16.msra.mxu0 %v8775_v51  ;;  %v164_v50 = vld [vmem:[#allocation15] sm:$0xff] }
 0x10c   :  { %2816 = vmatprep.subr.bf16.mxu1 %v8780_v52  ;;  %2945 = vmatprep.subr.bf16.mxu0 %v8783_v53  ;;  %v10446_v51 = vsub.s32 0, %v10443_v49  ;;  %v165_v52 = vld [vmem:[#allocation15 + $0x8] sm:$0xff] }
 0x10e   :  { %v1007_v53 = vrot.slane %v164_v50, %v10446_v51 }
 0x10f   :  { %2817 = vmatpush1.bf16.msra.mxu1 %v8778_v54  ;;  %2946 = vmatpush1.bf16.msra.mxu0 %v8781_v55  ;;  %v1011_v55 = vrot.slane %v165_v52, %v10446_v51 }
 0x110   :  { %2818 = vmatprep.subr.bf16.mxu1 %v8786_v56  ;;  %2947 = vmatprep.subr.bf16.mxu0 %v8789_v57 }
 0x113   :  { %2819 = vmatpush1.bf16.msra.mxu1 %v8784_v58  ;;  %2948 = vmatpush1.bf16.msra.mxu0 %v8787_v59 }
 0x114   :  { %2820 = vmatprep.subr.bf16.mxu1 %v8792_v60  ;;  %2949 = vmatprep.subr.bf16.mxu0 %v8795_v61 }
 0x117   :  { %2821 = vmatpush1.bf16.msra.mxu1 %v8790_v62  ;;  %2950 = vmatpush1.bf16.msra.mxu0 %v8793_v63 }
 0x118   :  { %2822 = vmatprep.subr.bf16.mxu1 %v8798_v1  ;;  %2951 = vmatprep.subr.bf16.mxu0 %v8801_v2 }
 0x11b   :  { %2823 = vmatpush1.bf16.msra.mxu1 %v8796_v3  ;;  %2952 = vmatpush1.bf16.msra.mxu0 %v8799_v4 }
 0x11c   :  { %2824 = vmatprep.subr.bf16.mxu1 %v8804_v5  ;;  %2953 = vmatprep.subr.bf16.mxu0 %v8807_v6 }
 0x11f   :  { %2825 = vmatpush1.bf16.msra.mxu1 %v8802_v7  ;;  %2954 = vmatpush1.bf16.msra.mxu0 %v8805_v8  ;;  %v8856_v8 = vld [vmem:[#allocation6 + $0x300] ss:$24 sps:$4 sm:$0xff]  }
 0x120   :  { %2826 = vmatprep.subr.bf16.mxu1 %v8810_v10  ;;  %2955 = vmatprep.subr.bf16.mxu0 %v8813_v11  ;;  %v8859_v10 = vld [vmem:[#allocation6 + $0x308] ss:$24 sps:$4 sm:$0xff]  }
 0x123   :  { %2827 = vmatpush1.bf16.msra.mxu1 %v8808_v12  ;;  %2956 = vmatpush1.bf16.msra.mxu0 %v8811_v13  ;;  %v8864_v12 = vld [vmem:[#allocation6 + $0x334] ss:$24 sps:$4 sm:$0xff]  }
 0x124   :  { %2828 = vmatprep.subr.bf16.mxu1 %v8816_v14  ;;  %2957 = vmatprep.subr.bf16.mxu0 %v8819_v15  ;;  %v8867_v13 = vld [vmem:[#allocation6 + $0x33c] ss:$24 sps:$4 sm:$0xff]   ;;  %v8862_v15 = vld [vmem:[#allocation6 + $0x330] ss:$24 sps:$4 sm:$0xff]  }
 0x127   :  { %2829 = vmatpush1.bf16.msra.mxu1 %v8814_v16  ;;  %2958 = vmatpush1.bf16.msra.mxu0 %v8817_v17  ;;  %v8865_v16 = vld [vmem:[#allocation6 + $0x338] ss:$24 sps:$4 sm:$0xff]   ;;  %v8870_v17 = vld [vmem:[#allocation6 + $0x364] ss:$24 sps:$4 sm:$0xff]  }
 0x128   :  { %2830 = vmatprep.subr.bf16.mxu1 %v8822_v18  ;;  %2959 = vmatprep.subr.bf16.mxu0 %v8825_v19  ;;  %v8873_v18 = vld [vmem:[#allocation6 + $0x36c] ss:$24 sps:$4 sm:$0xff]   ;;  %v8868_v19 = vld [vmem:[#allocation6 + $0x360] ss:$24 sps:$4 sm:$0xff]  }
 0x12b   :  { %2831 = vmatpush1.bf16.msra.mxu1 %v8820_v20  ;;  %2960 = vmatpush1.bf16.msra.mxu0 %v8823_v21  ;;  %v8871_v20 = vld [vmem:[#allocation6 + $0x368] ss:$24 sps:$4 sm:$0xff]   ;;  %v8876_v21 = vld [vmem:[#allocation6 + $0x394] ss:$24 sps:$4 sm:$0xff]  }
 0x12c   :  { %2832 = vmatprep.subr.bf16.mxu1 %v8828_v22  ;;  %2961 = vmatprep.subr.bf16.mxu0 %v8831_v23  ;;  %v8879_v22 = vld [vmem:[#allocation6 + $0x39c] ss:$24 sps:$4 sm:$0xff]   ;;  %v8874_v23 = vld [vmem:[#allocation6 + $0x390] ss:$24 sps:$4 sm:$0xff]  }
 0x12f   :  { %2833 = vmatpush1.bf16.msra.mxu1 %v8826_v24  ;;  %2962 = vmatpush1.bf16.msra.mxu0 %v8829_v25  ;;  %v8877_v24 = vld [vmem:[#allocation6 + $0x398] ss:$24 sps:$4 sm:$0xff]   ;;  %v8882_v25 = vld [vmem:[#allocation6 + $0x3c4] ss:$24 sps:$4 sm:$0xff]  }
 0x130   :  { %2834 = vmatprep.subr.bf16.mxu1 %v8834_v26  ;;  %2963 = vmatprep.subr.bf16.mxu0 %v8837_v27  ;;  %v8885_v26 = vld [vmem:[#allocation6 + $0x3cc] ss:$24 sps:$4 sm:$0xff]   ;;  %v8880_v27 = vld [vmem:[#allocation6 + $0x3c0] ss:$24 sps:$4 sm:$0xff]  }
 0x133   :  { %2835 = vmatpush1.bf16.msra.mxu1 %v8832_v28  ;;  %2964 = vmatpush1.bf16.msra.mxu0 %v8835_v29  ;;  %v8883_v28 = vld [vmem:[#allocation6 + $0x3c8] ss:$24 sps:$4 sm:$0xff]   ;;  %v166_v29 = vld [vmem:[#allocation15 + $0x10] sm:$0xff] }
 0x134   :  { %2836 = vmatprep.subr.bf16.mxu1 %v8840_v30  ;;  %2965 = vmatprep.subr.bf16.mxu0 %v8843_v31  ;;  %v168_v30 = vld [vmem:[#allocation15 + $0x20] sm:$0xff]  ;;  %v8888_v31 = vld [vmem:[#allocation6 + $0x3f4] ss:$24 sps:$4 sm:$0xff]  }
 0x137   :  { %2837 = vmatpush1.bf16.msra.mxu1 %v8838_v32  ;;  %2966 = vmatpush1.bf16.msra.mxu0 %v8841_v33  ;;  %v8891_v32 = vld [vmem:[#allocation6 + $0x3fc] ss:$24 sps:$4 sm:$0xff]  }
 0x138   :  { %2838 = vmatprep.subr.bf16.mxu1 %v8846_v34  ;;  %2967 = vmatprep.subr.bf16.mxu0 %v8849_v35  ;;  %v167_v33 = vld [vmem:[#allocation15 + $0x18] sm:$0xff]  ;;  %v169_v34 = vld [vmem:[#allocation15 + $0x28] sm:$0xff] }
 0x139   :  { %v8886_v35 = vld [vmem:[#allocation6 + $0x3f0] ss:$24 sps:$4 sm:$0xff]  }
 0x13b   :  { %2839 = vmatpush1.bf16.msra.mxu1 %v8844_v36  ;;  %2968 = vmatpush1.bf16.msra.mxu0 %v8847_v37  ;;  %v8889_v36 = vld [vmem:[#allocation6 + $0x3f8] ss:$24 sps:$4 sm:$0xff]   ;;  %v1015_v37 = vrot.slane %v166_v29, %v10446_v51  ;;  %v8919_v29 = vld [vmem:[#allocation6 + $0x4e8] ss:$24 sps:$4 sm:$0xff]  }
 0x13c   :  { %2840 = vmatprep.subr.bf16.mxu1 %v8852_v38  ;;  %2969 = vmatprep.subr.bf16.mxu0 %v8855_v39  ;;  %v1023_v38 = vrot.slane %v168_v30, %v10446_v51  ;;  %v1019_v39 = vrot.slane %v167_v33, %v10446_v51  ;;  %v8924_v30 = vld [vmem:[#allocation6 + $0x514] ss:$24 sps:$4 sm:$0xff]   ;;  %v8925_v33 = vld [vmem:[#allocation6 + $0x518] ss:$24 sps:$4 sm:$0xff]  }
 0x13f   :  { %2841 = vmatpush1.bf16.msra.mxu1 %v8850_v40  ;;  %2970 = vmatpush1.bf16.msra.mxu0 %v8853_v41  ;;  %v1027_v40 = vrot.slane %v169_v34, %v10446_v51  ;;  %v8894_v41 = vld [vmem:[#allocation6 + $0x424] ss:$24 sps:$4 sm:$0xff]  }
 0x140   :  { %2853 = vmatprep.subr.bf16.mxu1 %v8858_v42  ;;  %2982 = vmatprep.subr.bf16.mxu0 %v8861_v43  ;;  %v8897_v42 = vld [vmem:[#allocation6 + $0x42c] ss:$24 sps:$4 sm:$0xff]   ;;  %v8903_v51 = vld [vmem:[#allocation6 + $0x45c] ss:$24 sps:$4 sm:$0xff]  }
 0x141   :  { %v8930_v34 = vld [vmem:[#allocation6 + $0x544] ss:$24 sps:$4 sm:$0xff]  }
 0x195   :  { %v540_v44 = vpop.f32.mrb[0].mxu1 }
 0x196   :  { %v542_v45 = vpop.f32.mrb[1].mxu1 }
 0x197   :  { %v544_v46 = vpop.f32.mrb[2].mxu1 }
 0x198   :  { %v546_v47 = vpop.f32.mrb[3].mxu1 }
 0x1b5   :  { %v909_v54 = vpop.f32.mrb[4].mxu0 }
 0x1b6   :  { %v910_v56 = vadd.f32 %v909_v54, %v540_v44  ;;  %v911_v57 = vpop.f32.mrb[5].mxu0 }
 0x1b7   :  { %v912_v58 = vadd.f32 %v911_v57, %v542_v45  ;;  %v913_v59 = vpop.f32.mrb[6].mxu0  ;;  %v8892_v45 = vld [vmem:[#allocation6 + $0x420] ss:$24 sps:$4 sm:$0xff]   ;;  %v8900_v57 = vld [vmem:[#allocation6 + $0x454] ss:$24 sps:$4 sm:$0xff]  }
 0x1b8   :  { %v1028_v60 = vadd.f32 %v1007_v53, %v910_v56  ;;  %v914_v61 = vadd.f32 %v913_v59, %v544_v46  ;;  %v915_v62 = vpop.f32.mrb[7].mxu0  ;;  %v8895_v46 = vld [vmem:[#allocation6 + $0x428] ss:$24 sps:$4 sm:$0xff]  }
 0x1b9   :  { %v1029_v63 = vadd.f32 %v1011_v55, %v912_v58  ;;  %v916_v1 = vadd.f32 %v915_v62, %v546_v47 }
 0x1ba   :  { %v1034_v2 = vadd.f32 %v1007_v53, %v914_v61  ;;  %v1040_v4 = vmax.f32 %v1028_v60, 0.0 }
 0x1bb   :  { %v1035_v3 = vadd.f32 %v1011_v55, %v916_v1  ;;  %v1041_v6 = vmax.f32 %v1029_v63, 0.0 }
 0x1bc   :  { %v1046_v5 = vmax.f32 %v1034_v2, 0.0 }
 0x1bd   :  { %v1047_v7 = vmax.f32 %v1035_v3, 0.0  ;;  %v8898_v3 = vld [vmem:[#allocation6 + $0x450] ss:$24 sps:$4 sm:$0xff]  }
 0x1be   :  { %v10450_v11 = vpack.c.bf16 %v1046_v5, %v1040_v4  ;;  %v8901_v4 = vld [vmem:[#allocation6 + $0x458] ss:$24 sps:$4 sm:$0xff]  }
 0x1bf   :  { %v10452_v14 = vpack.c.bf16 %v1047_v7, %v1041_v6 }
 0x1c1   :  { %2842 = vmatprep.mubr.bf16.mxu1 %v10452_v14  ;;  %2971 = vmatprep.mubr.bf16.mxu0 %v10452_v14 }
 0x1c2   :  { %2843 = vmatmul.mubr.bf16.vlgmr.msra.gmra.mrb[8].mxu1 %v10450_v11  ;;  %2972 = vmatmul.mubr.bf16.vlgmr.msra.gmra.mrb[8].mxu0 %v10450_v11 }
 0x1c3   :  { %2854 = vmatpush1.bf16.msra.mxu1 %v8856_v8  ;;  %2983 = vmatpush1.bf16.msra.mxu0 %v8859_v10 }
 0x1c4   :  { %2855 = vmatprep.subr.bf16.mxu1 %v8864_v12  ;;  %2984 = vmatprep.subr.bf16.mxu0 %v8867_v13  ;;  %v8906_v13 = vld [vmem:[#allocation6 + $0x484] ss:$24 sps:$4 sm:$0xff]  }
 0x1c7   :  { %2856 = vmatpush1.bf16.msra.mxu1 %v8862_v15  ;;  %2985 = vmatpush1.bf16.msra.mxu0 %v8865_v16  ;;  %v8909_v15 = vld [vmem:[#allocation6 + $0x48c] ss:$24 sps:$4 sm:$0xff]  }
 0x1c8   :  { %2857 = vmatprep.subr.bf16.mxu1 %v8870_v17  ;;  %2986 = vmatprep.subr.bf16.mxu0 %v8873_v18 }
 0x1cb   :  { %2858 = vmatpush1.bf16.msra.mxu1 %v8868_v19  ;;  %2987 = vmatpush1.bf16.msra.mxu0 %v8871_v20  ;;  %v8904_v20 = vld [vmem:[#allocation6 + $0x480] ss:$24 sps:$4 sm:$0xff]  }
 0x1cc   :  { %2859 = vmatprep.subr.bf16.mxu1 %v8876_v21  ;;  %2988 = vmatprep.subr.bf16.mxu0 %v8879_v22  ;;  %v8907_v21 = vld [vmem:[#allocation6 + $0x488] ss:$24 sps:$4 sm:$0xff]   ;;  %v8912_v22 = vld [vmem:[#allocation6 + $0x4b4] ss:$24 sps:$4 sm:$0xff]  }
 0x1cf   :  { %2860 = vmatpush1.bf16.msra.mxu1 %v8874_v23  ;;  %2989 = vmatpush1.bf16.msra.mxu0 %v8877_v24  ;;  %v8915_v23 = vld [vmem:[#allocation6 + $0x4bc] ss:$24 sps:$4 sm:$0xff]   ;;  %v8910_v24 = vld [vmem:[#allocation6 + $0x4b0] ss:$24 sps:$4 sm:$0xff]  }
 0x1d0   :  { %2861 = vmatprep.subr.bf16.mxu1 %v8882_v25  ;;  %2990 = vmatprep.subr.bf16.mxu0 %v8885_v26  ;;  %v8913_v25 = vld [vmem:[#allocation6 + $0x4b8] ss:$24 sps:$4 sm:$0xff]   ;;  %v8918_v26 = vld [vmem:[#allocation6 + $0x4e4] ss:$24 sps:$4 sm:$0xff]  }
 0x1d3   :  { %2862 = vmatpush1.bf16.msra.mxu1 %v8880_v27  ;;  %2991 = vmatpush1.bf16.msra.mxu0 %v8883_v28  ;;  %v8921_v27 = vld [vmem:[#allocation6 + $0x4ec] ss:$24 sps:$4 sm:$0xff]   ;;  %v8916_v28 = vld [vmem:[#allocation6 + $0x4e0] ss:$24 sps:$4 sm:$0xff]  }
 0x1d4   :  { %2863 = vmatprep.subr.bf16.mxu1 %v8888_v31  ;;  %2992 = vmatprep.subr.bf16.mxu0 %v8891_v32  ;;  %v8927_v31 = vld [vmem:[#allocation6 + $0x51c] ss:$24 sps:$4 sm:$0xff]   ;;  %v8922_v32 = vld [vmem:[#allocation6 + $0x510] ss:$24 sps:$4 sm:$0xff]  }
 0x1d5   :  { %v952_v43 = vpop.f32.mrb[4].mxu1  ;;  %v995_v44 = vpop.f32.mrb[0].mxu0 }
 0x1d6   :  { %v1030_v47 = vadd.f32 %v1015_v37, %v952_v43  ;;  %v1032_v48 = vadd.f32 %v1023_v38, %v995_v44  ;;  %v954_v50 = vpop.f32.mrb[5].mxu1  ;;  %v997_v52 = vpop.f32.mrb[1].mxu0  ;;  %v8945_v43 = vld [vmem:[#allocation6 + $0x5ac] ss:$24 sps:$4 sm:$0xff]   ;;  %v8940_v44 = vld [vmem:[#allocation6 + $0x5a0] ss:$24 sps:$4 sm:$0xff]  }
 0x1d7   :  { %v1031_v53 = vadd.f32 %v1019_v39, %v954_v50  ;;  %v1033_v54 = vadd.f32 %v1027_v40, %v997_v52  ;;  %2864 = vmatpush1.bf16.msra.mxu1 %v8886_v35  ;;  %2993 = vmatpush1.bf16.msra.mxu0 %v8889_v36  ;;  %v956_v55 = vpop.f32.mrb[6].mxu1  ;;  %v999_v56 = vpop.f32.mrb[2].mxu0  ;;  %v8933_v35 = vld [vmem:[#allocation6 + $0x54c] ss:$24 sps:$4 sm:$0xff]   ;;  %v8928_v36 = vld [vmem:[#allocation6 + $0x540] ss:$24 sps:$4 sm:$0xff]  }
 0x1d8   :  { %v1042_v58 = vmax.f32 %v1030_v47, 0.0  ;;  %v1036_v59 = vadd.f32 %v1015_v37, %v956_v55  ;;  %v1038_v60 = vadd.f32 %v1023_v38, %v999_v56  ;;  %v958_v61 = vpop.f32.mrb[7].mxu1  ;;  %v1001_v62 = vpop.f32.mrb[3].mxu0  ;;  %2865 = vmatprep.subr.bf16.mxu1 %v8894_v41  ;;  %2994 = vmatprep.subr.bf16.mxu0 %v8897_v42  ;;  %v1044_v5 = vmax.f32 %v1032_v48, 0.0  ;;  %v8931_v37 = vld [vmem:[#allocation6 + $0x548] ss:$24 sps:$4 sm:$0xff]  }
 0x1d9   :  { %v1043_v63 = vmax.f32 %v1031_v53, 0.0  ;;  %v1037_v1 = vadd.f32 %v1019_v39, %v958_v61  ;;  %v1039_v2 = vadd.f32 %v1027_v40, %v1001_v62  ;;  %v1045_v8 = vmax.f32 %v1033_v54, 0.0  ;;  %v8936_v38 = vld [vmem:[#allocation6 + $0x574] ss:$24 sps:$4 sm:$0xff]   ;;  %v8934_v40 = vld [vmem:[#allocation6 + $0x570] ss:$24 sps:$4 sm:$0xff]  }
 0x1da   :  { %v1048_v6 = vmax.f32 %v1036_v59, 0.0  ;;  %v1050_v7 = vmax.f32 %v1038_v60, 0.0  ;;  %v8939_v39 = vld [vmem:[#allocation6 + $0x57c] ss:$24 sps:$4 sm:$0xff]   ;;  %v8937_v41 = vld [vmem:[#allocation6 + $0x578] ss:$24 sps:$4 sm:$0xff]  }
 0x1db   :  { %v1049_v10 = vmax.f32 %v1037_v1, 0.0  ;;  %v1051_v12 = vmax.f32 %v1039_v2, 0.0  ;;  %2866 = vmatpush1.bf16.msra.mxu1 %v8892_v45  ;;  %2995 = vmatpush1.bf16.msra.mxu0 %v8895_v46  ;;  %v8942_v42 = vld [vmem:[#allocation6 + $0x5a4] ss:$24 sps:$4 sm:$0xff]   ;;  %v8943_v45 = vld [vmem:[#allocation6 + $0x5a8] ss:$24 sps:$4 sm:$0xff]  }
 0x1dc   :  { %v10462_v16 = vpack.c.bf16 %v1048_v6, %v1042_v58  ;;  %v10464_v17 = vpack.c.bf16 %v1050_v7, %v1044_v5  ;;  %2867 = vmatprep.subr.bf16.mxu1 %v8900_v57  ;;  %2996 = vmatprep.subr.bf16.mxu0 %v8903_v51  ;;  %v8948_v46 = vld [vmem:[#allocation6 + $0x5d4] ss:$24 sps:$4 sm:$0xff]   ;;  %v8946_v48 = vld [vmem:[#allocation6 + $0x5d0] ss:$24 sps:$4 sm:$0xff]   ;;  %v8954_v52 = vld [vmem:[#allocation6 + $0x604] ss:$24 sps:$4 sm:$0xff]  }
 0x1dd   :  { %v10466_v18 = vpack.c.bf16 %v1049_v10, %v1043_v63  ;;  %v10468_v19 = vpack.c.bf16 %v1051_v12, %v1045_v8  ;;  %v8951_v47 = vld [vmem:[#allocation6 + $0x5dc] ss:$24 sps:$4 sm:$0xff]   ;;  %v8949_v50 = vld [vmem:[#allocation6 + $0x5d8] ss:$24 sps:$4 sm:$0xff]   ;;  %v8957_v53 = vld [vmem:[#allocation6 + $0x60c] ss:$24 sps:$4 sm:$0xff]  }
 0x1de   :  { %v8952_v54 = vld [vmem:[#allocation6 + $0x600] ss:$24 sps:$4 sm:$0xff]   ;;  %v8960_v56 = vld [vmem:[#allocation6 + $0x634] ss:$24 sps:$4 sm:$0xff]   ;;  %v8958_v57 = vld [vmem:[#allocation6 + $0x630] ss:$24 sps:$4 sm:$0xff]  }
 0x1df   :  { %2868 = vmatpush1.bf16.msra.mxu1 %v8898_v3  ;;  %2997 = vmatpush1.bf16.msra.mxu0 %v8901_v4  ;;  %v8955_v55 = vld [vmem:[#allocation6 + $0x608] ss:$24 sps:$4 sm:$0xff]   ;;  %v8963_v51 = vld [vmem:[#allocation6 + $0x63c] ss:$24 sps:$4 sm:$0xff]   ;;  %v8961_v58 = vld [vmem:[#allocation6 + $0x638] ss:$24 sps:$4 sm:$0xff]  }
 0x1e0   :  { %2885 = vmatprep.mubr.bf16.mxu1 %v10466_v18  ;;  %3014 = vmatprep.mubr.bf16.mxu0 %v10466_v18  ;;  %v8966_v59 = vld [vmem:[#allocation6 + $0x664] ss:$24 sps:$4 sm:$0xff]   ;;  %v8964_v61 = vld [vmem:[#allocation6 + $0x660] ss:$24 sps:$4 sm:$0xff]   ;;  %v8972_v63 = vld [vmem:[#allocation6 + $0x694] ss:$24 sps:$4 sm:$0xff]  }
 0x1e1   :  { %2869 = vmatprep.subr.bf16.mxu1 %v8906_v13  ;;  %2998 = vmatprep.subr.bf16.mxu0 %v8909_v15  ;;  %v8969_v60 = vld [vmem:[#allocation6 + $0x66c] ss:$24 sps:$4 sm:$0xff]   ;;  %v8967_v62 = vld [vmem:[#allocation6 + $0x668] ss:$24 sps:$4 sm:$0xff]   ;;  %v8975_v1 = vld [vmem:[#allocation6 + $0x69c] ss:$24 sps:$4 sm:$0xff]  }
 0x1e2   :  { %v8970_v2 = vld [vmem:[#allocation6 + $0x690] ss:$24 sps:$4 sm:$0xff]   ;;  %v8978_v4 = vld [vmem:[#allocation6 + $0x6c4] ss:$24 sps:$4 sm:$0xff]   ;;  %v8976_v6 = vld [vmem:[#allocation6 + $0x6c0] ss:$24 sps:$4 sm:$0xff]  }
 0x1e3   :  { %2870 = vmatpush1.bf16.msra.mxu1 %v8904_v20  ;;  %2999 = vmatpush1.bf16.msra.mxu0 %v8907_v21  ;;  %v8973_v3 = vld [vmem:[#allocation6 + $0x698] ss:$24 sps:$4 sm:$0xff]   ;;  %v8981_v5 = vld [vmem:[#allocation6 + $0x6cc] ss:$24 sps:$4 sm:$0xff]   ;;  %v8979_v7 = vld [vmem:[#allocation6 + $0x6c8] ss:$24 sps:$4 sm:$0xff]  }
 0x1e4   :  { %2871 = vmatprep.subr.bf16.mxu1 %v8912_v22  ;;  %3000 = vmatprep.subr.bf16.mxu0 %v8915_v23  ;;  %v8984_v8 = vld [vmem:[#allocation6 + $0x6f4] ss:$24 sps:$4 sm:$0xff]   ;;  %v8982_v12 = vld [vmem:[#allocation6 + $0x6f0] ss:$24 sps:$4 sm:$0xff]   ;;  %v8990_v15 = vld [vmem:[#allocation6 + $0x724] ss:$24 sps:$4 sm:$0xff]  }
 0x1e5   :  { %v8987_v10 = vld [vmem:[#allocation6 + $0x6fc] ss:$24 sps:$4 sm:$0xff]   ;;  %v8985_v13 = vld [vmem:[#allocation6 + $0x6f8] ss:$24 sps:$4 sm:$0xff]   ;;  %v8993_v20 = vld [vmem:[#allocation6 + $0x72c] ss:$24 sps:$4 sm:$0xff]  }
 0x1e6   :  { %v8988_v21 = vld [vmem:[#allocation6 + $0x720] ss:$24 sps:$4 sm:$0xff]   ;;  %v8996_v23 = vld [vmem:[#allocation6 + $0x754] ss:$24 sps:$4 sm:$0xff]  }
 0x1e7   :  { %2872 = vmatpush1.bf16.msra.mxu1 %v8910_v24  ;;  %3001 = vmatpush1.bf16.msra.mxu0 %v8913_v25  ;;  %v8991_v22 = vld [vmem:[#allocation6 + $0x728] ss:$24 sps:$4 sm:$0xff]   ;;  %v8999_v24 = vld [vmem:[#allocation6 + $0x75c] ss:$24 sps:$4 sm:$0xff]  }
 0x1e8   :  { %2873 = vmatprep.subr.bf16.mxu1 %v8918_v26  ;;  %3002 = vmatprep.subr.bf16.mxu0 %v8921_v27  ;;  %v8994_v25 = vld [vmem:[#allocation6 + $0x750] ss:$24 sps:$4 sm:$0xff]   ;;  %v9002_v27 = vld [vmem:[#allocation6 + $0x784] ss:$24 sps:$4 sm:$0xff]  }
 0x1e9   :  { %v8997_v26 = vld [vmem:[#allocation6 + $0x758] ss:$24 sps:$4 sm:$0xff]  }
 0x1eb   :  { %2874 = vmatpush1.bf16.msra.mxu1 %v8916_v28  ;;  %3003 = vmatpush1.bf16.msra.mxu0 %v8919_v29  ;;  %v9005_v28 = vld [vmem:[#allocation6 + $0x78c] ss:$24 sps:$4 sm:$0xff]   ;;  %v9000_v29 = vld [vmem:[#allocation6 + $0x780] ss:$24 sps:$4 sm:$0xff]  }
 0x1ec   :  { %2875 = vmatprep.subr.bf16.mxu1 %v8924_v30  ;;  %3004 = vmatprep.subr.bf16.mxu0 %v8927_v31  ;;  %v9003_v30 = vld [vmem:[#allocation6 + $0x788] ss:$24 sps:$4 sm:$0xff]   ;;  %v9008_v31 = vld [vmem:[#allocation6 + $0x7b4] ss:$24 sps:$4 sm:$0xff]  }
 0x1ef   :  { %2876 = vmatpush1.bf16.msra.mxu1 %v8922_v32  ;;  %3005 = vmatpush1.bf16.msra.mxu0 %v8925_v33  ;;  %v9011_v32 = vld [vmem:[#allocation6 + $0x7bc] ss:$24 sps:$4 sm:$0xff]   ;;  %v9006_v33 = vld [vmem:[#allocation6 + $0x7b0] ss:$24 sps:$4 sm:$0xff]  }
 0x1f0   :  { %2877 = vmatprep.subr.bf16.mxu1 %v8930_v34  ;;  %3006 = vmatprep.subr.bf16.mxu0 %v8933_v35  ;;  %v9009_v34 = vld [vmem:[#allocation6 + $0x7b8] ss:$24 sps:$4 sm:$0xff]   ;;  %v9014_v35 = vld [vmem:[#allocation6 + $0x7e4] ss:$24 sps:$4 sm:$0xff]  }
 0x1f3   :  { %2878 = vmatpush1.bf16.msra.mxu1 %v8928_v36  ;;  %3007 = vmatpush1.bf16.msra.mxu0 %v8931_v37  ;;  %v9017_v36 = vld [vmem:[#allocation6 + $0x7ec] ss:$24 sps:$4 sm:$0xff]   ;;  %v9012_v37 = vld [vmem:[#allocation6 + $0x7e0] ss:$24 sps:$4 sm:$0xff]  }
 0x1f4   :  { %2879 = vmatprep.subr.bf16.mxu1 %v8936_v38  ;;  %3008 = vmatprep.subr.bf16.mxu0 %v8939_v39  ;;  %v9015_v38 = vld [vmem:[#allocation6 + $0x7e8] ss:$24 sps:$4 sm:$0xff]   ;;  %v9020_v39 = vld [vmem:[#allocation6 + $0x814] ss:$24 sps:$4 sm:$0xff]  }
 0x1f7   :  { %2880 = vmatpush1.bf16.msra.mxu1 %v8934_v40  ;;  %3009 = vmatpush1.bf16.msra.mxu0 %v8937_v41  ;;  %v9023_v40 = vld [vmem:[#allocation6 + $0x81c] ss:$24 sps:$4 sm:$0xff]   ;;  %v9018_v41 = vld [vmem:[#allocation6 + $0x810] ss:$24 sps:$4 sm:$0xff]  }
 0x1f8   :  { %2881 = vmatprep.subr.bf16.mxu1 %v8942_v42  ;;  %3010 = vmatprep.subr.bf16.mxu0 %v8945_v43  ;;  %v9021_v42 = vld [vmem:[#allocation6 + $0x818] ss:$24 sps:$4 sm:$0xff]   ;;  %v9026_v43 = vld [vmem:[#allocation6 + $0x844] ss:$24 sps:$4 sm:$0xff]  }
 0x1fb   :  { %2882 = vmatpush1.bf16.msra.mxu1 %v8940_v44  ;;  %3011 = vmatpush1.bf16.msra.mxu0 %v8943_v45  ;;  %v9029_v44 = vld [vmem:[#allocation6 + $0x84c] ss:$24 sps:$4 sm:$0xff]   ;;  %v9024_v45 = vld [vmem:[#allocation6 + $0x840] ss:$24 sps:$4 sm:$0xff]  }
 0x1fc   :  { %2883 = vmatprep.subr.bf16.mxu1 %v8948_v46  ;;  %3012 = vmatprep.subr.bf16.mxu0 %v8951_v47  ;;  %v9027_v46 = vld [vmem:[#allocation6 + $0x848] ss:$24 sps:$4 sm:$0xff]   ;;  %v9032_v47 = vld [vmem:[#allocation6 + $0x874] ss:$24 sps:$4 sm:$0xff]  }
 0x1ff   :  { %2884 = vmatpush1.bf16.msra.mxu1 %v8946_v48  ;;  %3013 = vmatpush1.bf16.msra.mxu0 %v8949_v50  ;;  %v9035_v48 = vld [vmem:[#allocation6 + $0x87c] ss:$24 sps:$4 sm:$0xff]   ;;  %v9030_v50 = vld [vmem:[#allocation6 + $0x870] ss:$24 sps:$4 sm:$0xff]  }
 0x200   :  { %2896 = vmatprep.subr.bf16.mxu1 %v8954_v52  ;;  %3025 = vmatprep.subr.bf16.mxu0 %v8957_v53  ;;  %v9033_v52 = vld [vmem:[#allocation6 + $0x878] ss:$24 sps:$4 sm:$0xff]   ;;  %v9038_v53 = vld [vmem:[#allocation6 + $0x8a4] ss:$24 sps:$4 sm:$0xff]  }
 0x202   :  { %2886 = vmatmul.mubr.bf16.vlgmr.msra.gmra.mrb[8].mxu1 %v10462_v16  ;;  %3015 = vmatmul.mubr.bf16.vlgmr.msra.gmra.mrb[8].mxu0 %v10462_v16 }
 0x203   :  { %2897 = vmatpush1.bf16.msra.mxu1 %v8952_v54  ;;  %2928 = vmatprep.mubr.bf16.mxu1 %v10468_v19  ;;  %v9041_v54 = vld [vmem:[#allocation6 + $0x8ac] ss:$24 sps:$4 sm:$0xff]  }
 0x204   :  { %3026 = vmatpush1.bf16.msra.mxu0 %v8955_v55  ;;  %3057 = vmatprep.mubr.bf16.mxu0 %v10468_v19  ;;  %v9036_v55 = vld [vmem:[#allocation6 + $0x8a0] ss:$24 sps:$4 sm:$0xff]  }
 0x205   :  { %2898 = vmatprep.subr.bf16.mxu1 %v8960_v56  ;;  %3027 = vmatprep.subr.bf16.mxu0 %v8963_v51  ;;  %v9039_v56 = vld [vmem:[#allocation6 + $0x8a8] ss:$24 sps:$4 sm:$0xff]   ;;  %v9047_v51 = vld [vmem:[#allocation6 + $0x8dc] ss:$24 sps:$4 sm:$0xff]  }
 0x207   :  { %2899 = vmatpush1.bf16.msra.mxu1 %v8958_v57  ;;  %v9044_v57 = vld [vmem:[#allocation6 + $0x8d4] ss:$24 sps:$4 sm:$0xff]  }
 0x208   :  { %3028 = vmatpush1.bf16.msra.mxu0 %v8961_v58  ;;  %2900 = vmatprep.subr.bf16.mxu1 %v8966_v59  ;;  %v9042_v58 = vld [vmem:[#allocation6 + $0x8d0] ss:$24 sps:$4 sm:$0xff]  }
 0x209   :  { %3029 = vmatprep.subr.bf16.mxu0 %v8969_v60  ;;  %v9045_v59 = vld [vmem:[#allocation6 + $0x8d8] ss:$24 sps:$4 sm:$0xff]   ;;  %v9050_v60 = vld [vmem:[#allocation6 + $0x14] ss:$24 sps:$4 sm:$0xff]  }
 0x20b   :  { %2901 = vmatpush1.bf16.msra.mxu1 %v8964_v61  ;;  %v9048_v61 = vld [vmem:[#allocation6 + $0x10] ss:$24 sps:$4 sm:$0xff]  }
 0x20c   :  { %3030 = vmatpush1.bf16.msra.mxu0 %v8967_v62  ;;  %2902 = vmatprep.subr.bf16.mxu1 %v8972_v63  ;;  %v9053_v62 = vld [vmem:[#allocation6 + $0x44] ss:$24 sps:$4 sm:$0xff]   ;;  %v9051_v63 = vld [vmem:[#allocation6 + $0x40] ss:$24 sps:$4 sm:$0xff]  }
 0x20d   :  { %3031 = vmatprep.subr.bf16.mxu0 %v8975_v1  ;;  %v9056_v1 = vld [vmem:[#allocation6 + $0x74] ss:$24 sps:$4 sm:$0xff]  }
 0x20f   :  { %2903 = vmatpush1.bf16.msra.mxu1 %v8970_v2  ;;  %v9054_v2 = vld [vmem:[#allocation6 + $0x70] ss:$24 sps:$4 sm:$0xff]  }
 0x210   :  { %3032 = vmatpush1.bf16.msra.mxu0 %v8973_v3  ;;  %2904 = vmatprep.subr.bf16.mxu1 %v8978_v4  ;;  %v9059_v3 = vld [vmem:[#allocation6 + $0xa4] ss:$24 sps:$4 sm:$0xff]   ;;  %v9057_v4 = vld [vmem:[#allocation6 + $0xa0] ss:$24 sps:$4 sm:$0xff]  }
 0x211   :  { %3033 = vmatprep.subr.bf16.mxu0 %v8981_v5  ;;  %v9062_v5 = vld [vmem:[#allocation6 + $0xd4] ss:$24 sps:$4 sm:$0xff]  }
 0x213   :  { %2905 = vmatpush1.bf16.msra.mxu1 %v8976_v6  ;;  %v9060_v6 = vld [vmem:[#allocation6 + $0xd0] ss:$24 sps:$4 sm:$0xff]  }
 0x214   :  { %3034 = vmatpush1.bf16.msra.mxu0 %v8979_v7  ;;  %2906 = vmatprep.subr.bf16.mxu1 %v8984_v8  ;;  %v9065_v7 = vld [vmem:[#allocation6 + $0x104] ss:$24 sps:$4 sm:$0xff]   ;;  %v9063_v8 = vld [vmem:[#allocation6 + $0x100] ss:$24 sps:$4 sm:$0xff]  }
 0x215   :  { %3035 = vmatprep.subr.bf16.mxu0 %v8987_v10  ;;  %v9068_v10 = vld [vmem:[#allocation6 + $0x134] ss:$24 sps:$4 sm:$0xff]  }
 0x217   :  { %2907 = vmatpush1.bf16.msra.mxu1 %v8982_v12  ;;  %v9066_v12 = vld [vmem:[#allocation6 + $0x130] ss:$24 sps:$4 sm:$0xff]  }
 0x218   :  { %3036 = vmatpush1.bf16.msra.mxu0 %v8985_v13  ;;  %2908 = vmatprep.subr.bf16.mxu1 %v8990_v15  ;;  %v9069_v13 = vld [vmem:[#allocation6 + $0x160] ss:$24 sps:$4 sm:$0xff]   ;;  %v9074_v15 = vld [vmem:[#allocation6 + $0x194] ss:$24 sps:$4 sm:$0xff]  }
 0x219   :  { %3037 = vmatprep.subr.bf16.mxu0 %v8993_v20  ;;  %v9170_v20 = vld [vmem:[#allocation7 + $0x4] ss:$8 sps:$4 sm:$0xff]  }
 0x21b   :  { %2909 = vmatpush1.bf16.msra.mxu1 %v8988_v21  ;;  %v9072_v21 = vld [vmem:[#allocation6 + $0x190] ss:$24 sps:$4 sm:$0xff]  }
 0x21c   :  { %3038 = vmatpush1.bf16.msra.mxu0 %v8991_v22  ;;  %2910 = vmatprep.subr.bf16.mxu1 %v8996_v23  ;;  %v9168_v22 = vld [vmem:[#allocation7] ss:$8 sps:$4 sm:$0xff]   ;;  %v9077_v23 = vld [vmem:[#allocation6 + $0x1c4] ss:$24 sps:$4 sm:$0xff]  }
 0x21d   :  { %3039 = vmatprep.subr.bf16.mxu0 %v8999_v24  ;;  %v9176_v24 = vld [vmem:[#allocation7 + $0x14] ss:$8 sps:$4 sm:$0xff]  }
 0x21f   :  { %2911 = vmatpush1.bf16.msra.mxu1 %v8994_v25  ;;  %v9075_v25 = vld [vmem:[#allocation6 + $0x1c0] ss:$24 sps:$4 sm:$0xff]  }
 0x220   :  { %3040 = vmatpush1.bf16.msra.mxu0 %v8997_v26  ;;  %2912 = vmatprep.subr.bf16.mxu1 %v9002_v27  ;;  %v9174_v26 = vld [vmem:[#allocation7 + $0x10] ss:$8 sps:$4 sm:$0xff]   ;;  %v9080_v27 = vld [vmem:[#allocation6 + $0x1f4] ss:$24 sps:$4 sm:$0xff]  }
 0x221   :  { %3041 = vmatprep.subr.bf16.mxu0 %v9005_v28  ;;  %v9182_v28 = vld [vmem:[#allocation7 + $0x24] ss:$8 sps:$4 sm:$0xff]  }
 0x223   :  { %2913 = vmatpush1.bf16.msra.mxu1 %v9000_v29  ;;  %v9078_v29 = vld [vmem:[#allocation6 + $0x1f0] ss:$24 sps:$4 sm:$0xff]  }
 0x224   :  { %3042 = vmatpush1.bf16.msra.mxu0 %v9003_v30  ;;  %2914 = vmatprep.subr.bf16.mxu1 %v9008_v31  ;;  %v9180_v30 = vld [vmem:[#allocation7 + $0x20] ss:$8 sps:$4 sm:$0xff]   ;;  %v9083_v31 = vld [vmem:[#allocation6 + $0x224] ss:$24 sps:$4 sm:$0xff]  }
 0x225   :  { %3043 = vmatprep.subr.bf16.mxu0 %v9011_v32  ;;  %v9188_v32 = vld [vmem:[#allocation7 + $0x34] ss:$8 sps:$4 sm:$0xff]  }
 0x227   :  { %2915 = vmatpush1.bf16.msra.mxu1 %v9006_v33  ;;  %v9081_v33 = vld [vmem:[#allocation6 + $0x220] ss:$24 sps:$4 sm:$0xff]  }
 0x228   :  { %3044 = vmatpush1.bf16.msra.mxu0 %v9009_v34  ;;  %2916 = vmatprep.subr.bf16.mxu1 %v9014_v35  ;;  %v9186_v34 = vld [vmem:[#allocation7 + $0x30] ss:$8 sps:$4 sm:$0xff]   ;;  %v9086_v35 = vld [vmem:[#allocation6 + $0x254] ss:$24 sps:$4 sm:$0xff]  }
 0x229   :  { %3045 = vmatprep.subr.bf16.mxu0 %v9017_v36  ;;  %v9194_v36 = vld [vmem:[#allocation7 + $0x44] ss:$8 sps:$4 sm:$0xff]  }
 0x22b   :  { %2917 = vmatpush1.bf16.msra.mxu1 %v9012_v37  ;;  %v9084_v37 = vld [vmem:[#allocation6 + $0x250] ss:$24 sps:$4 sm:$0xff]  }
 0x22c   :  { %3046 = vmatpush1.bf16.msra.mxu0 %v9015_v38  ;;  %2918 = vmatprep.subr.bf16.mxu1 %v9020_v39  ;;  %v9192_v38 = vld [vmem:[#allocation7 + $0x40] ss:$8 sps:$4 sm:$0xff]   ;;  %v9089_v39 = vld [vmem:[#allocation6 + $0x284] ss:$24 sps:$4 sm:$0xff]  }
 0x22d   :  { %3047 = vmatprep.subr.bf16.mxu0 %v9023_v40  ;;  %v9200_v40 = vld [vmem:[#allocation7 + $0x54] ss:$8 sps:$4 sm:$0xff]  }
 0x22f   :  { %2919 = vmatpush1.bf16.msra.mxu1 %v9018_v41  ;;  %v9087_v41 = vld [vmem:[#allocation6 + $0x280] ss:$24 sps:$4 sm:$0xff]  }
 0x230   :  { %3048 = vmatpush1.bf16.msra.mxu0 %v9021_v42  ;;  %2920 = vmatprep.subr.bf16.mxu1 %v9026_v43  ;;  %v9198_v42 = vld [vmem:[#allocation7 + $0x50] ss:$8 sps:$4 sm:$0xff]   ;;  %v9092_v43 = vld [vmem:[#allocation6 + $0x2b4] ss:$24 sps:$4 sm:$0xff]  }
 0x231   :  { %3049 = vmatprep.subr.bf16.mxu0 %v9029_v44  ;;  %v9206_v44 = vld [vmem:[#allocation7 + $0x64] ss:$8 sps:$4 sm:$0xff]  }
 0x233   :  { %2921 = vmatpush1.bf16.msra.mxu1 %v9024_v45  ;;  %v9090_v45 = vld [vmem:[#allocation6 + $0x2b0] ss:$24 sps:$4 sm:$0xff]  }
 0x234   :  { %3050 = vmatpush1.bf16.msra.mxu0 %v9027_v46  ;;  %2922 = vmatprep.subr.bf16.mxu1 %v9032_v47  ;;  %v9204_v46 = vld [vmem:[#allocation7 + $0x60] ss:$8 sps:$4 sm:$0xff]   ;;  %v9095_v47 = vld [vmem:[#allocation6 + $0x2e4] ss:$24 sps:$4 sm:$0xff]  }
 0x235   :  { %3051 = vmatprep.subr.bf16.mxu0 %v9035_v48  ;;  %v9212_v48 = vld [vmem:[#allocation7 + $0x74] ss:$8 sps:$4 sm:$0xff]  }
 0x237   :  { %2923 = vmatpush1.bf16.msra.mxu1 %v9030_v50  ;;  %v9093_v50 = vld [vmem:[#allocation6 + $0x2e0] ss:$24 sps:$4 sm:$0xff]  }
 0x238   :  { %3052 = vmatpush1.bf16.msra.mxu0 %v9033_v52  ;;  %2924 = vmatprep.subr.bf16.mxu1 %v9038_v53  ;;  %v9210_v52 = vld [vmem:[#allocation7 + $0x70] ss:$8 sps:$4 sm:$0xff]   ;;  %v9098_v53 = vld [vmem:[#allocation6 + $0x314] ss:$24 sps:$4 sm:$0xff]  }
 0x239   :  { %3053 = vmatprep.subr.bf16.mxu0 %v9041_v54  ;;  %v9218_v54 = vld [vmem:[#allocation7 + $0x84] ss:$8 sps:$4 sm:$0xff]  }
 0x23b   :  { %2925 = vmatpush1.bf16.msra.mxu1 %v9036_v55  ;;  %v9096_v55 = vld [vmem:[#allocation6 + $0x310] ss:$24 sps:$4 sm:$0xff]  }
 0x23c   :  { %3054 = vmatpush1.bf16.msra.mxu0 %v9039_v56  ;;  %2926 = vmatprep.subr.bf16.mxu1 %v9044_v57  ;;  %v9216_v56 = vld [vmem:[#allocation7 + $0x80] ss:$8 sps:$4 sm:$0xff]   ;;  %v9101_v57 = vld [vmem:[#allocation6 + $0x344] ss:$24 sps:$4 sm:$0xff]  }
 0x23d   :  { %3055 = vmatprep.subr.bf16.mxu0 %v9047_v51  ;;  %v9219_v51 = vld [vmem:[#allocation7 + $0x90] ss:$8 sps:$4 sm:$0xff]  }
 0x23f   :  { %2927 = vmatpush1.bf16.msra.mxu1 %v9042_v58  ;;  %v9221_v58 = vld [vmem:[#allocation7 + $0x94] ss:$8 sps:$4 sm:$0xff]  }
 0x240   :  { %3056 = vmatpush1.bf16.msra.mxu0 %v9045_v59  ;;  %3068 = vmatprep.subr.bf16.mxu1 %v9050_v60  ;;  %v9099_v59 = vld [vmem:[#allocation6 + $0x340] ss:$24 sps:$4 sm:$0xff]   ;;  %v9224_v60 = vld [vmem:[#allocation7 + $0xa4] ss:$8 sps:$4 sm:$0xff]  }
 0x241   :  { %3799 = vmatprep.subr.bf16.mxu0 %v9170_v20  ;;  %v9234_v20 = vld [vmem:[#allocation7 + $0xe0] ss:$8 sps:$4 sm:$0xff]  }
 0x242   :  { %2929 = vmatmul.mubr.bf16.vlgmr.msra.gmra.mrb[8].mxu1 %v10464_v17 }
 0x243   :  { %3058 = vmatmul.mubr.bf16.vlgmr.msra.gmra.mrb[8].mxu0 %v10464_v17  ;;  %3069 = vmatpush1.bf16.msra.mxu1 %v9048_v61  ;;  %v9104_v61 = vld [vmem:[#allocation6 + $0x374] ss:$24 sps:$4 sm:$0xff]  }
 0x244   :  { %3100 = vmatprep.mubr.bf16.mxu1 %v10452_v14  ;;  %3070 = vmatprep.subr.bf16.mxu1 %v9053_v62  ;;  %v9071_v14 = vld [vmem:[#allocation6 + $0x164] ss:$24 sps:$4 sm:$0xff]   ;;  %v9222_v62 = vld [vmem:[#allocation7 + $0xa0] ss:$8 sps:$4 sm:$0xff]  }
 0x245   :  { %3800 = vmatpush1.bf16.msra.mxu0 %v9168_v22  ;;  %v9239_v22 = vld [vmem:[#allocation7 + $0xf4] ss:$8 sps:$4 sm:$0xff]  }
 0x246   :  { %3801 = vmatprep.subr.bf16.mxu0 %v9176_v24  ;;  %v9237_v24 = vld [vmem:[#allocation7 + $0xf0] ss:$8 sps:$4 sm:$0xff]  }
 0x247   :  { %3071 = vmatpush1.bf16.msra.mxu1 %v9051_v63  ;;  %v9227_v63 = vld [vmem:[#allocation7 + $0xb4] ss:$8 sps:$4 sm:$0xff]  }
 0x248   :  { %3072 = vmatprep.subr.bf16.mxu1 %v9056_v1  ;;  %v9102_v1 = vld [vmem:[#allocation6 + $0x370] ss:$24 sps:$4 sm:$0xff]  }
 0x249   :  { %3802 = vmatpush1.bf16.msra.mxu0 %v9174_v26  ;;  %v9242_v26 = vld [vmem:[#allocation7 + $0x104] ss:$8 sps:$4 sm:$0xff]  }
 0x24a   :  { %3803 = vmatprep.subr.bf16.mxu0 %v9182_v28  ;;  %v9125_v28 = vld [vmem:[#allocation6 + $0x4c4] ss:$24 sps:$4 sm:$0xff]  }
 0x24b   :  { %3073 = vmatpush1.bf16.msra.mxu1 %v9054_v2  ;;  %v9107_v2 = vld [vmem:[#allocation6 + $0x3a4] ss:$24 sps:$4 sm:$0xff]  }
 0x24c   :  { %3074 = vmatprep.subr.bf16.mxu1 %v9059_v3  ;;  %v9230_v3 = vld [vmem:[#allocation7 + $0xc4] ss:$8 sps:$4 sm:$0xff]  }
 0x24d   :  { %3804 = vmatpush1.bf16.msra.mxu0 %v9180_v30  ;;  %v9128_v30 = vld [vmem:[#allocation6 + $0x4f4] ss:$24 sps:$4 sm:$0xff]  }
 0x24e   :  { %3805 = vmatprep.subr.bf16.mxu0 %v9188_v32  ;;  %v9131_v32 = vld [vmem:[#allocation6 + $0x524] ss:$24 sps:$4 sm:$0xff]  }
 0x24f   :  { %3075 = vmatpush1.bf16.msra.mxu1 %v9057_v4  ;;  %v9105_v4 = vld [vmem:[#allocation6 + $0x3a0] ss:$24 sps:$4 sm:$0xff]  }
 0x250   :  { %3076 = vmatprep.subr.bf16.mxu1 %v9062_v5  ;;  %v9228_v5 = vld [vmem:[#allocation7 + $0xc0] ss:$8 sps:$4 sm:$0xff]  }
 0x251   :  { %3806 = vmatpush1.bf16.msra.mxu0 %v9186_v34  ;;  %v9134_v34 = vld [vmem:[#allocation6 + $0x554] ss:$24 sps:$4 sm:$0xff]  }
 0x252   :  { %3807 = vmatprep.subr.bf16.mxu0 %v9194_v36  ;;  %v9137_v36 = vld [vmem:[#allocation6 + $0x584] ss:$24 sps:$4 sm:$0xff]  }
 0x253   :  { %3077 = vmatpush1.bf16.msra.mxu1 %v9060_v6  ;;  %v9233_v6 = vld [vmem:[#allocation7 + $0xd4] ss:$8 sps:$4 sm:$0xff]  }
 0x254   :  { %3078 = vmatprep.subr.bf16.mxu1 %v9065_v7  ;;  %v9108_v7 = vld [vmem:[#allocation6 + $0x3d0] ss:$24 sps:$4 sm:$0xff]  }
 0x255   :  { %3808 = vmatpush1.bf16.msra.mxu0 %v9192_v38  ;;  %v9140_v38 = vld [vmem:[#allocation6 + $0x5b4] ss:$24 sps:$4 sm:$0xff]  }
 0x256   :  { %3809 = vmatprep.subr.bf16.mxu0 %v9200_v40  ;;  %v9143_v40 = vld [vmem:[#allocation6 + $0x5e4] ss:$24 sps:$4 sm:$0xff]  }
 0x257   :  { %3079 = vmatpush1.bf16.msra.mxu1 %v9063_v8  ;;  %v9113_v8 = vld [vmem:[#allocation6 + $0x404] ss:$24 sps:$4 sm:$0xff]  }
 0x258   :  { %3080 = vmatprep.subr.bf16.mxu1 %v9068_v10  ;;  %v9231_v10 = vld [vmem:[#allocation7 + $0xd0] ss:$8 sps:$4 sm:$0xff]  }
 0x259   :  { %3810 = vmatpush1.bf16.msra.mxu0 %v9198_v42  ;;  %v9146_v42 = vld [vmem:[#allocation6 + $0x614] ss:$24 sps:$4 sm:$0xff]  }
 0x25a   :  { %3811 = vmatprep.subr.bf16.mxu0 %v9206_v44  ;;  %v9149_v44 = vld [vmem:[#allocation6 + $0x644] ss:$24 sps:$4 sm:$0xff]  }
 0x25b   :  { %3081 = vmatpush1.bf16.msra.mxu1 %v9066_v12  ;;  %v9111_v12 = vld [vmem:[#allocation6 + $0x400] ss:$24 sps:$4 sm:$0xff]  }
 0x25c   :  { %3082 = vmatprep.subr.bf16.mxu1 %v9071_v14  ;;  %v9116_v14 = vld [vmem:[#allocation6 + $0x434] ss:$24 sps:$4 sm:$0xff]  }
 0x25d   :  { %3812 = vmatpush1.bf16.msra.mxu0 %v9204_v46  ;;  %v9152_v46 = vld [vmem:[#allocation6 + $0x674] ss:$24 sps:$4 sm:$0xff]  }
 0x25e   :  { %3813 = vmatprep.subr.bf16.mxu0 %v9212_v48  ;;  %v9155_v48 = vld [vmem:[#allocation6 + $0x6a4] ss:$24 sps:$4 sm:$0xff]  }
 0x25f   :  { %3083 = vmatpush1.bf16.msra.mxu1 %v9069_v13  ;;  %v9236_v13 = vld [vmem:[#allocation7 + $0xe4] ss:$8 sps:$4 sm:$0xff]  }
 0x260   :  { %3084 = vmatprep.subr.bf16.mxu1 %v9074_v15  ;;  %v9114_v15 = vld [vmem:[#allocation6 + $0x430] ss:$24 sps:$4 sm:$0xff]  }
 0x261   :  { %3814 = vmatpush1.bf16.msra.mxu0 %v9210_v52  ;;  %v9158_v52 = vld [vmem:[#allocation6 + $0x6d4] ss:$24 sps:$4 sm:$0xff]  }
 0x262   :  { %3815 = vmatprep.subr.bf16.mxu0 %v9218_v54  ;;  %v9161_v54 = vld [vmem:[#allocation6 + $0x704] ss:$24 sps:$4 sm:$0xff]  }
 0x263   :  { %3085 = vmatpush1.bf16.msra.mxu1 %v9072_v21  ;;  %v9119_v21 = vld [vmem:[#allocation6 + $0x464] ss:$24 sps:$4 sm:$0xff]  }
 0x264   :  { %3086 = vmatprep.subr.bf16.mxu1 %v9077_v23  ;;  %v9117_v23 = vld [vmem:[#allocation6 + $0x460] ss:$24 sps:$4 sm:$0xff]  }
 0x265   :  { %3816 = vmatpush1.bf16.msra.mxu0 %v9216_v56  ;;  %v9167_v56 = vld [vmem:[#allocation6 + $0x764] ss:$24 sps:$4 sm:$0xff]  }
 0x266   :  { %3817 = vmatprep.subr.bf16.mxu0 %v9221_v58  ;;  %v9171_v58 = vld [vmem:[#allocation6 + $0x790] ss:$24 sps:$4 sm:$0xff]  }
 0x267   :  { %3087 = vmatpush1.bf16.msra.mxu1 %v9075_v25  ;;  %v9122_v25 = vld [vmem:[#allocation6 + $0x494] ss:$24 sps:$4 sm:$0xff]  }
 0x268   :  { %3088 = vmatprep.subr.bf16.mxu1 %v9080_v27  ;;  %v9120_v27 = vld [vmem:[#allocation6 + $0x490] ss:$24 sps:$4 sm:$0xff]  }
 0x269   :  { %3818 = vmatpush1.bf16.msra.mxu0 %v9219_v51  ;;  %v9173_v51 = vld [vmem:[#allocation6 + $0x794] ss:$24 sps:$4 sm:$0xff]  }
 0x26a   :  { %3819 = vmatprep.subr.bf16.mxu0 %v9224_v60  ;;  %v9177_v60 = vld [vmem:[#allocation6 + $0x7c0] ss:$24 sps:$4 sm:$0xff]  }
 0x26b   :  { %3089 = vmatpush1.bf16.msra.mxu1 %v9078_v29  ;;  %v9123_v29 = vld [vmem:[#allocation6 + $0x4c0] ss:$24 sps:$4 sm:$0xff]  }
 0x26c   :  { %3090 = vmatprep.subr.bf16.mxu1 %v9083_v31  ;;  %v9126_v31 = vld [vmem:[#allocation6 + $0x4f0] ss:$24 sps:$4 sm:$0xff]  }
 0x26d   :  { %3820 = vmatpush1.bf16.msra.mxu0 %v9222_v62  ;;  %v9183_v62 = vld [vmem:[#allocation6 + $0x7f0] ss:$24 sps:$4 sm:$0xff]  }
 0x26e   :  { %3821 = vmatprep.subr.bf16.mxu0 %v9227_v63  ;;  %v9191_v63 = vld [vmem:[#allocation6 + $0x824] ss:$24 sps:$4 sm:$0xff]  }
 0x26f   :  { %3091 = vmatpush1.bf16.msra.mxu1 %v9081_v33  ;;  %v9129_v33 = vld [vmem:[#allocation6 + $0x520] ss:$24 sps:$4 sm:$0xff]  }
 0x270   :  { %3092 = vmatprep.subr.bf16.mxu1 %v9086_v35  ;;  %v9132_v35 = vld [vmem:[#allocation6 + $0x550] ss:$24 sps:$4 sm:$0xff]  }
 0x273   :  { %3093 = vmatpush1.bf16.msra.mxu1 %v9084_v37  ;;  %v9135_v37 = vld [vmem:[#allocation6 + $0x580] ss:$24 sps:$4 sm:$0xff]  }
 0x274   :  { %3094 = vmatprep.subr.bf16.mxu1 %v9089_v39  ;;  %v9138_v39 = vld [vmem:[#allocation6 + $0x5b0] ss:$24 sps:$4 sm:$0xff]  }
 0x277   :  { %3095 = vmatpush1.bf16.msra.mxu1 %v9087_v41  ;;  %v9141_v41 = vld [vmem:[#allocation6 + $0x5e0] ss:$24 sps:$4 sm:$0xff]  }
 0x278   :  { %3096 = vmatprep.subr.bf16.mxu1 %v9092_v43  ;;  %v9144_v43 = vld [vmem:[#allocation6 + $0x610] ss:$24 sps:$4 sm:$0xff]  }
 0x27b   :  { %3097 = vmatpush1.bf16.msra.mxu1 %v9090_v45  ;;  %v9147_v45 = vld [vmem:[#allocation6 + $0x640] ss:$24 sps:$4 sm:$0xff]  }
 0x27c   :  { %3098 = vmatprep.subr.bf16.mxu1 %v9095_v47  ;;  %v9150_v47 = vld [vmem:[#allocation6 + $0x670] ss:$24 sps:$4 sm:$0xff]  }
 0x27f   :  { %3099 = vmatpush1.bf16.msra.mxu1 %v9093_v50  ;;  %v9153_v50 = vld [vmem:[#allocation6 + $0x6a0] ss:$24 sps:$4 sm:$0xff]  }
 0x280   :  { %3111 = vmatprep.subr.bf16.mxu1 %v9098_v53  ;;  %v9156_v53 = vld [vmem:[#allocation6 + $0x6d0] ss:$24 sps:$4 sm:$0xff]  }
 0x282   :  { %3101 = vmatmul.mubr.bf16.vlgmr.msra.gmra.mrb[12].mxu1 %v10450_v11  ;;  %v9225_v11 = vld [vmem:[#allocation7 + $0xb0] ss:$8 sps:$4 sm:$0xff]  }
 0x283   :  { %3112 = vmatpush1.bf16.msra.mxu1 %v9096_v55  ;;  %3143 = vmatprep.mubr.bf16.mxu1 %v10466_v18  ;;  %v9110_v18 = vld [vmem:[#allocation6 + $0x3d4] ss:$24 sps:$4 sm:$0xff]  }
 0x284   :  { %3113 = vmatprep.subr.bf16.mxu1 %v9101_v57  ;;  %3822 = vmatpush1.bf16.msra.mxu0 %v9225_v11  ;;  %v9164_v55 = vld [vmem:[#allocation6 + $0x734] ss:$24 sps:$4 sm:$0xff]   ;;  %v9165_v57 = vld [vmem:[#allocation6 + $0x760] ss:$24 sps:$4 sm:$0xff]   ;;  %v9195_v11 = vld [vmem:[#allocation6 + $0x850] ss:$24 sps:$4 sm:$0xff]  }
 0x285   :  { %3823 = vmatprep.subr.bf16.mxu0 %v9230_v3  ;;  %v9203_v3 = vld [vmem:[#allocation6 + $0x884] ss:$24 sps:$4 sm:$0xff]  }
 0x287   :  { %3114 = vmatpush1.bf16.msra.mxu1 %v9099_v59  ;;  %v9179_v59 = vld [vmem:[#allocation6 + $0x7c4] ss:$24 sps:$4 sm:$0xff]  }
 0x288   :  { %3115 = vmatprep.subr.bf16.mxu1 %v9104_v61  ;;  %3824 = vmatpush1.bf16.msra.mxu0 %v9228_v5  ;;  %v9185_v61 = vld [vmem:[#allocation6 + $0x7f4] ss:$24 sps:$4 sm:$0xff]   ;;  %v9207_v5 = vld [vmem:[#allocation6 + $0x8b0] ss:$24 sps:$4 sm:$0xff]  }
 0x289   :  { %3825 = vmatprep.subr.bf16.mxu0 %v9233_v6  ;;  %v9215_v6 = vld [vmem:[#allocation6 + $0x8e4] ss:$24 sps:$4 sm:$0xff]  }
 0x28b   :  { %3116 = vmatpush1.bf16.msra.mxu1 %v9102_v1  ;;  %v9189_v1 = vld [vmem:[#allocation6 + $0x820] ss:$24 sps:$4 sm:$0xff]  }
 0x28c   :  { %3117 = vmatprep.subr.bf16.mxu1 %v9107_v2  ;;  %3826 = vmatpush1.bf16.msra.mxu0 %v9231_v10  ;;  %v9197_v2 = vld [vmem:[#allocation6 + $0x854] ss:$24 sps:$4 sm:$0xff]   ;;  %v10488_v10 = vld [vmem:[#allocation15] sm:$0xff] }
 0x28d   :  { %3827 = vmatprep.subr.bf16.mxu0 %v9236_v13 }
 0x28f   :  { %3118 = vmatpush1.bf16.msra.mxu1 %v9105_v4  ;;  %v9201_v4 = vld [vmem:[#allocation6 + $0x880] ss:$24 sps:$4 sm:$0xff]  }
 0x290   :  { %3119 = vmatprep.subr.bf16.mxu1 %v9110_v18  ;;  %3828 = vmatpush1.bf16.msra.mxu0 %v9234_v20  ;;  %v9209_v18 = vld [vmem:[#allocation6 + $0x8b4] ss:$24 sps:$4 sm:$0xff]  }
 0x291   :  { %3829 = vmatprep.subr.bf16.mxu0 %v9239_v22 }
 0x293   :  { %3120 = vmatpush1.bf16.msra.mxu1 %v9108_v7  ;;  %v9213_v7 = vld [vmem:[#allocation6 + $0x8e0] ss:$24 sps:$4 sm:$0xff]  }
 0x294   :  { %3121 = vmatprep.subr.bf16.mxu1 %v9113_v8  ;;  %3830 = vmatpush1.bf16.msra.mxu0 %v9237_v24  ;;  %v10486_v8 = vsub.s32 1, %v10443_v49 }
 0x295   :  { %3842 = vmatprep.subr.bf16.mxu0 %v9242_v26 }
 0x297   :  { %3122 = vmatpush1.bf16.msra.mxu1 %v9111_v12  ;;  %v1349_v12 = vrot.slane %v10488_v10, %v10486_v8 }
 0x298   :  { %3123 = vmatprep.subr.bf16.mxu1 %v9116_v14  ;;  %v9969_v14 = vld [vmem:[#allocation15 + $0x10] sm:$0xff] }
 0x299   :  { %v1357_v13 = vrot.slane %v9969_v14, %v10486_v8  ;;  %v9281_v14 = vld [vmem:[#allocation7 + $0x1d4] ss:$8 sps:$4 sm:$0xff]  }
 0x29b   :  { %3124 = vmatpush1.bf16.msra.mxu1 %v9114_v15  ;;  %v10493_v15 = vld [vmem:[#allocation15 + $0x8] sm:$0xff] }
 0x29c   :  { %3125 = vmatprep.subr.bf16.mxu1 %v9119_v21  ;;  %v1353_v20 = vrot.slane %v10493_v15, %v10486_v8  ;;  %v9971_v21 = vld [vmem:[#allocation15 + $0x18] sm:$0xff] }
 0x29f   :  { %3126 = vmatpush1.bf16.msra.mxu1 %v9117_v23 }
 0x2a0   :  { %3127 = vmatprep.subr.bf16.mxu1 %v9122_v25 }
 0x2a3   :  { %3128 = vmatpush1.bf16.msra.mxu1 %v9120_v27 }
 0x2a4   :  { %3129 = vmatprep.subr.bf16.mxu1 %v9125_v28 }
 0x2a7   :  { %3130 = vmatpush1.bf16.msra.mxu1 %v9123_v29 }
 0x2a8   :  { %3131 = vmatprep.subr.bf16.mxu1 %v9128_v30 }
 0x2ab   :  { %3132 = vmatpush1.bf16.msra.mxu1 %v9126_v31 }
 0x2ac   :  { %3133 = vmatprep.subr.bf16.mxu1 %v9131_v32 }
 0x2af   :  { %3134 = vmatpush1.bf16.msra.mxu1 %v9129_v33 }
 0x2b0   :  { %3135 = vmatprep.subr.bf16.mxu1 %v9134_v34 }
 0x2b3   :  { %3136 = vmatpush1.bf16.msra.mxu1 %v9132_v35 }
 0x2b4   :  { %3137 = vmatprep.subr.bf16.mxu1 %v9137_v36 }
 0x2b7   :  { %3138 = vmatpush1.bf16.msra.mxu1 %v9135_v37 }
 0x2b8   :  { %3139 = vmatprep.subr.bf16.mxu1 %v9140_v38 }
 0x2bb   :  { %3140 = vmatpush1.bf16.msra.mxu1 %v9138_v39 }
 0x2bc   :  { %3141 = vmatprep.subr.bf16.mxu1 %v9143_v40 }
 0x2bf   :  { %3142 = vmatpush1.bf16.msra.mxu1 %v9141_v41 }
 0x2c0   :  { %3154 = vmatprep.subr.bf16.mxu1 %v9146_v42 }
 0x2c2   :  { %3144 = vmatmul.mubr.bf16.vlgmr.msra.gmra.mrb[12].mxu1 %v10462_v16  ;;  %v9159_v16 = vld [vmem:[#allocation6 + $0x700] ss:$24 sps:$4 sm:$0xff]  }
 0x2c3   :  { %3155 = vmatpush1.bf16.msra.mxu1 %v9144_v43  ;;  %3186 = vmatprep.mubr.bf16.mxu1 %v10468_v19  ;;  %v9162_v19 = vld [vmem:[#allocation6 + $0x730] ss:$24 sps:$4 sm:$0xff]  }
 0x2c4   :  { %3156 = vmatprep.subr.bf16.mxu1 %v9149_v44 }
 0x2c7   :  { %3157 = vmatpush1.bf16.msra.mxu1 %v9147_v45 }
 0x2c8   :  { %3158 = vmatprep.subr.bf16.mxu1 %v9152_v46 }
 0x2cb   :  { %3159 = vmatpush1.bf16.msra.mxu1 %v9150_v47 }
 0x2cc   :  { %3160 = vmatprep.subr.bf16.mxu1 %v9155_v48 }
 0x2cf   :  { %3161 = vmatpush1.bf16.msra.mxu1 %v9153_v50  ;;  %v9240_v50 = vld [vmem:[#allocation7 + $0x100] ss:$8 sps:$4 sm:$0xff]  }
 0x2d0   :  { %3162 = vmatprep.subr.bf16.mxu1 %v9158_v52 }
 0x2d3   :  { %3163 = vmatpush1.bf16.msra.mxu1 %v9156_v53  ;;  %v9245_v53 = vld [vmem:[#allocation7 + $0x114] ss:$8 sps:$4 sm:$0xff]  }
 0x2d4   :  { %3164 = vmatprep.subr.bf16.mxu1 %v9161_v54  ;;  %v9243_v54 = vld [vmem:[#allocation7 + $0x110] ss:$8 sps:$4 sm:$0xff]  }
 0x2d7   :  { %3165 = vmatpush1.bf16.msra.mxu1 %v9159_v16  ;;  %v9248_v16 = vld [vmem:[#allocation7 + $0x124] ss:$8 sps:$4 sm:$0xff]  }
 0x2d8   :  { %3166 = vmatprep.subr.bf16.mxu1 %v9164_v55  ;;  %v9246_v55 = vld [vmem:[#allocation7 + $0x120] ss:$8 sps:$4 sm:$0xff]  }
 0x2db   :  { %3167 = vmatpush1.bf16.msra.mxu1 %v9162_v19  ;;  %v9251_v19 = vld [vmem:[#allocation7 + $0x134] ss:$8 sps:$4 sm:$0xff]  }
 0x2dc   :  { %3168 = vmatprep.subr.bf16.mxu1 %v9167_v56  ;;  %v9249_v56 = vld [vmem:[#allocation7 + $0x130] ss:$8 sps:$4 sm:$0xff]  }
 0x2df   :  { %3169 = vmatpush1.bf16.msra.mxu1 %v9165_v57  ;;  %v9254_v57 = vld [vmem:[#allocation7 + $0x144] ss:$8 sps:$4 sm:$0xff]  }
 0x2e0   :  { %3170 = vmatprep.subr.bf16.mxu1 %v9173_v51  ;;  %v9252_v51 = vld [vmem:[#allocation7 + $0x140] ss:$8 sps:$4 sm:$0xff]  }
 0x2e3   :  { %3171 = vmatpush1.bf16.msra.mxu1 %v9171_v58  ;;  %v9257_v58 = vld [vmem:[#allocation7 + $0x154] ss:$8 sps:$4 sm:$0xff]  }
 0x2e4   :  { %3172 = vmatprep.subr.bf16.mxu1 %v9179_v59  ;;  %v9255_v59 = vld [vmem:[#allocation7 + $0x150] ss:$8 sps:$4 sm:$0xff]  }
 0x2e7   :  { %3173 = vmatpush1.bf16.msra.mxu1 %v9177_v60  ;;  %v9260_v60 = vld [vmem:[#allocation7 + $0x164] ss:$8 sps:$4 sm:$0xff]  }
 0x2e8   :  { %3174 = vmatprep.subr.bf16.mxu1 %v9185_v61  ;;  %v9258_v61 = vld [vmem:[#allocation7 + $0x160] ss:$8 sps:$4 sm:$0xff]  }
 0x2eb   :  { %3175 = vmatpush1.bf16.msra.mxu1 %v9183_v62  ;;  %v9263_v62 = vld [vmem:[#allocation7 + $0x174] ss:$8 sps:$4 sm:$0xff]  }
 0x2ec   :  { %3176 = vmatprep.subr.bf16.mxu1 %v9191_v63  ;;  %v9261_v63 = vld [vmem:[#allocation7 + $0x170] ss:$8 sps:$4 sm:$0xff]  }
 0x2ef   :  { %3177 = vmatpush1.bf16.msra.mxu1 %v9189_v1  ;;  %v9266_v1 = vld [vmem:[#allocation7 + $0x184] ss:$8 sps:$4 sm:$0xff]  }
 0x2f0   :  { %3178 = vmatprep.subr.bf16.mxu1 %v9197_v2  ;;  %v9264_v2 = vld [vmem:[#allocation7 + $0x180] ss:$8 sps:$4 sm:$0xff]  }
 0x2f3   :  { %3179 = vmatpush1.bf16.msra.mxu1 %v9195_v11  ;;  %v9269_v11 = vld [vmem:[#allocation7 + $0x194] ss:$8 sps:$4 sm:$0xff]  }
 0x2f4   :  { %3180 = vmatprep.subr.bf16.mxu1 %v9203_v3  ;;  %v9267_v3 = vld [vmem:[#allocation7 + $0x190] ss:$8 sps:$4 sm:$0xff]  }
 0x2f7   :  { %3181 = vmatpush1.bf16.msra.mxu1 %v9201_v4  ;;  %v9272_v4 = vld [vmem:[#allocation7 + $0x1a4] ss:$8 sps:$4 sm:$0xff]  }
 0x2f8   :  { %3182 = vmatprep.subr.bf16.mxu1 %v9209_v18  ;;  %v9270_v18 = vld [vmem:[#allocation7 + $0x1a0] ss:$8 sps:$4 sm:$0xff]  }
 0x2fb   :  { %3183 = vmatpush1.bf16.msra.mxu1 %v9207_v5  ;;  %v9275_v5 = vld [vmem:[#allocation7 + $0x1b4] ss:$8 sps:$4 sm:$0xff]  }
 0x2fc   :  { %3184 = vmatprep.subr.bf16.mxu1 %v9215_v6  ;;  %v9273_v6 = vld [vmem:[#allocation7 + $0x1b0] ss:$8 sps:$4 sm:$0xff]  }
 0x2ff   :  { %3185 = vmatpush1.bf16.msra.mxu1 %v9213_v7  ;;  %v9278_v7 = vld [vmem:[#allocation7 + $0x1c4] ss:$8 sps:$4 sm:$0xff]  }
 0x302   :  { %3187 = vmatmul.mubr.bf16.vlgmr.msra.gmra.mrb[12].mxu1 %v10464_v17  ;;  %v1361_v17 = vrot.slane %v9971_v21, %v10486_v8  ;;  %v9282_v21 = vld [vmem:[#allocation7 + $0x1e0] ss:$8 sps:$4 sm:$0xff]  }
 0x303   :  { %4309 = vmatprep.mubr.bf16.mxu1 %v10205_v0 }
 0x315   :  { %v2930_v22 = vpop.f32.mrb[8].mxu1 }
 0x316   :  { %v8496_v23 = vadd.f32 %v2930_v22, %v1349_v12  ;;  %v3059_v24 = vpop.f32.mrb[8].mxu0  ;;  %v2932_v25 = vpop.f32.mrb[9].mxu1  ;;  %v9285_v22 = vld [vmem:[#allocation7 + $0x1f0] ss:$8 sps:$4 sm:$0xff]  }
 0x317   :  { %v8500_v26 = vadd.f32 %v3059_v24, %v1357_v13  ;;  %v8497_v27 = vadd.f32 %v2932_v25, %v1353_v20  ;;  %v3061_v28 = vpop.f32.mrb[9].mxu0  ;;  %v2934_v29 = vpop.f32.mrb[10].mxu1  ;;  %v9288_v24 = vld [vmem:[#allocation7 + $0x200] ss:$8 sps:$4 sm:$0xff]   ;;  %v9293_v25 = vld [vmem:[#allocation7 + $0x214] ss:$8 sps:$4 sm:$0xff]  }
 0x318   :  { %v8501_v30 = vadd.f32 %v3061_v28, %v1361_v17  ;;  %v8498_v31 = vadd.f32 %v2934_v29, %v1349_v12  ;;  %v3063_v32 = vpop.f32.mrb[10].mxu0  ;;  %v2936_v33 = vpop.f32.mrb[11].mxu1  ;;  %v3197_v37 = vmax.f32 %v8496_v23, 0.0  ;;  %v9276_v12 = vld [vmem:[#allocation7 + $0x1c0] ss:$8 sps:$4 sm:$0xff]  }
 0x319   :  { %v8502_v34 = vadd.f32 %v3063_v32, %v1357_v13  ;;  %v8499_v35 = vadd.f32 %v2936_v33, %v1353_v20  ;;  %v3065_v36 = vpop.f32.mrb[11].mxu0  ;;  %v3199_v40 = vmax.f32 %v8500_v26, 0.0  ;;  %v3198_v41 = vmax.f32 %v8497_v27, 0.0  ;;  %v9279_v13 = vld [vmem:[#allocation7 + $0x1d0] ss:$8 sps:$4 sm:$0xff]  }
 0x31a   :  { %v3203_v38 = vmax.f32 %v8498_v31, 0.0  ;;  %v8503_v39 = vadd.f32 %v3065_v36, %v1361_v17  ;;  %v3200_v44 = vmax.f32 %v8501_v30, 0.0  ;;  %v9284_v20 = vld [vmem:[#allocation7 + $0x1e4] ss:$8 sps:$4 sm:$0xff]   ;;  %v9287_v17 = vld [vmem:[#allocation7 + $0x1f4] ss:$8 sps:$4 sm:$0xff]  }
 0x31b   :  { %v3205_v42 = vmax.f32 %v8502_v34, 0.0  ;;  %v3204_v43 = vmax.f32 %v8499_v35, 0.0  ;;  %v9290_v23 = vld [vmem:[#allocation7 + $0x204] ss:$8 sps:$4 sm:$0xff]   ;;  %v9336_v26 = vld [vmem:[#allocation10] ss:$24 sps:$4 sm:$0xff]  }
 0x31c   :  { %v3209_v45 = vpack.c.bf16 %v3203_v38, %v3197_v37  ;;  %v3206_v46 = vmax.f32 %v8503_v39, 0.0  ;;  %v9338_v27 = vld [vmem:[#allocation10 + $0x4] ss:$24 sps:$4 sm:$0xff]   ;;  %v9291_v28 = vld [vmem:[#allocation7 + $0x210] ss:$8 sps:$4 sm:$0xff]  }
 0x31d   :  { %v10498_v47 = vpack.c.bf16 %v3205_v42, %v3199_v40  ;;  %v3210_v48 = vpack.c.bf16 %v3204_v43, %v3198_v41  ;;  %v9296_v29 = vld [vmem:[#allocation7 + $0x224] ss:$8 sps:$4 sm:$0xff]   ;;  %4277 = vmatprep.subr.bf16.mxu1 %v9338_v27  ;;  %v9294_v30 = vld [vmem:[#allocation7 + $0x220] ss:$8 sps:$4 sm:$0xff]   ;;  %v9299_v31 = vld [vmem:[#allocation7 + $0x234] ss:$8 sps:$4 sm:$0xff]  }
 0x31e   :  { %v3212_v52 = vpack.c.bf16 %v3206_v46, %v3200_v44  ;;  %4278 = vmatpush1.bf16.msra.mxu1 %v9336_v26  ;;  %v9297_v32 = vld [vmem:[#allocation7 + $0x230] ss:$8 sps:$4 sm:$0xff]   ;;  %v9302_v33 = vld [vmem:[#allocation7 + $0x244] ss:$8 sps:$4 sm:$0xff]   ;;  %v9300_v34 = vld [vmem:[#allocation7 + $0x240] ss:$8 sps:$4 sm:$0xff]  }
 0x31f   :  { %3831 = vmatprep.mubr.bf16.mxu0 %v3210_v48  ;;  %v9305_v35 = vld [vmem:[#allocation7 + $0x254] ss:$8 sps:$4 sm:$0xff]   ;;  %v9303_v36 = vld [vmem:[#allocation7 + $0x250] ss:$8 sps:$4 sm:$0xff]   ;;  %v9308_v37 = vld [vmem:[#allocation7 + $0x264] ss:$8 sps:$4 sm:$0xff]  }
 0x320   :  { %3832 = vmatmul.mubr.bf16.vlgmr.msra.gmra.mrb[12].mxu0 %v3209_v45  ;;  %v9306_v38 = vld [vmem:[#allocation7 + $0x260] ss:$8 sps:$4 sm:$0xff]   ;;  %v9311_v39 = vld [vmem:[#allocation7 + $0x274] ss:$8 sps:$4 sm:$0xff]   ;;  %v9309_v40 = vld [vmem:[#allocation7 + $0x270] ss:$8 sps:$4 sm:$0xff]  }
 0x321   :  { %3843 = vmatpush1.bf16.msra.mxu0 %v9240_v50  ;;  %3874 = vmatprep.mubr.bf16.mxu0 %v3212_v52  ;;  %v9314_v41 = vld [vmem:[#allocation7 + $0x284] ss:$8 sps:$4 sm:$0xff]   ;;  %v9312_v42 = vld [vmem:[#allocation7 + $0x280] ss:$8 sps:$4 sm:$0xff]   ;;  %v9317_v43 = vld [vmem:[#allocation7 + $0x294] ss:$8 sps:$4 sm:$0xff]  }
 0x322   :  { %3844 = vmatprep.subr.bf16.mxu0 %v9245_v53  ;;  %v9315_v44 = vld [vmem:[#allocation7 + $0x290] ss:$8 sps:$4 sm:$0xff]   ;;  %v9320_v45 = vld [vmem:[#allocation7 + $0x2a4] ss:$8 sps:$4 sm:$0xff]   ;;  %v9318_v46 = vld [vmem:[#allocation7 + $0x2a0] ss:$8 sps:$4 sm:$0xff]  }
 0x323   :  { %v9321_v48 = vld [vmem:[#allocation7 + $0x2b0] ss:$8 sps:$4 sm:$0xff]   ;;  %v9326_v50 = vld [vmem:[#allocation7 + $0x2c4] ss:$8 sps:$4 sm:$0xff]   ;;  %v9324_v52 = vld [vmem:[#allocation7 + $0x2c0] ss:$8 sps:$4 sm:$0xff]  }
 0x324   :  { %v9329_v53 = vld [vmem:[#allocation7 + $0x2d4] ss:$8 sps:$4 sm:$0xff]  }
 0x325   :  { %3845 = vmatpush1.bf16.msra.mxu0 %v9243_v54  ;;  %v9327_v54 = vld [vmem:[#allocation7 + $0x2d0] ss:$8 sps:$4 sm:$0xff]   ;;  %v9356_v26 = vld [vmem:[#allocation10 + $0x94] ss:$24 sps:$4 sm:$0xff]   ;;  %v9359_v27 = vld [vmem:[#allocation10 + $0xa4] ss:$24 sps:$4 sm:$0xff]  }
 0x326   :  { %3846 = vmatprep.subr.bf16.mxu0 %v9248_v16  ;;  %v9332_v16 = vld [vmem:[#allocation7 + $0x2e4] ss:$8 sps:$4 sm:$0xff]  }
 0x329   :  { %3847 = vmatpush1.bf16.msra.mxu0 %v9246_v55  ;;  %v9330_v55 = vld [vmem:[#allocation7 + $0x2e0] ss:$8 sps:$4 sm:$0xff]  }
 0x32a   :  { %3848 = vmatprep.subr.bf16.mxu0 %v9251_v19  ;;  %v9335_v19 = vld [vmem:[#allocation7 + $0x2f4] ss:$8 sps:$4 sm:$0xff]  }
 0x32d   :  { %3849 = vmatpush1.bf16.msra.mxu0 %v9249_v56  ;;  %v9333_v56 = vld [vmem:[#allocation7 + $0x2f0] ss:$8 sps:$4 sm:$0xff]  }
 0x32e   :  { %3850 = vmatprep.subr.bf16.mxu0 %v9254_v57  ;;  %v9341_v57 = vld [vmem:[#allocation10 + $0x14] ss:$24 sps:$4 sm:$0xff]  }
 0x331   :  { %3851 = vmatpush1.bf16.msra.mxu0 %v9252_v51  ;;  %v10501_v51 = vld [vmem:[#allocation15 + $0x20] sm:$0xff] }
 0x332   :  { %3852 = vmatprep.subr.bf16.mxu0 %v9257_v58  ;;  %v1365_v58 = vrot.slane %v10501_v51, %v10486_v8 }
 0x335   :  { %3853 = vmatpush1.bf16.msra.mxu0 %v9255_v59  ;;  %v10505_v59 = vld [vmem:[#allocation15 + $0x28] sm:$0xff] }
 0x336   :  { %3854 = vmatprep.subr.bf16.mxu0 %v9260_v60  ;;  %v1369_v60 = vrot.slane %v10505_v59, %v10486_v8  ;;  %v9344_v8 = vld [vmem:[#allocation10 + $0x34] ss:$24 sps:$4 sm:$0xff]  }
 0x337   :  { %4279 = vmatprep.subr.bf16.mxu1 %v9344_v8  ;;  %v9395_v8 = vld [vmem:[#allocation9 + $0x44] ss:$24 sps:$4 sm:$0xff]  }
 0x339   :  { %3855 = vmatpush1.bf16.msra.mxu0 %v9258_v61 }
 0x33a   :  { %3856 = vmatprep.subr.bf16.mxu0 %v9263_v62 }
 0x33d   :  { %3857 = vmatpush1.bf16.msra.mxu0 %v9261_v63 }
 0x33e   :  { %3858 = vmatprep.subr.bf16.mxu0 %v9266_v1 }
 0x341   :  { %3859 = vmatpush1.bf16.msra.mxu0 %v9264_v2 }
 0x342   :  { %3860 = vmatprep.subr.bf16.mxu0 %v9269_v11 }
 0x345   :  { %3861 = vmatpush1.bf16.msra.mxu0 %v9267_v3 }
 0x346   :  { %3862 = vmatprep.subr.bf16.mxu0 %v9272_v4 }
 0x349   :  { %3863 = vmatpush1.bf16.msra.mxu0 %v9270_v18 }
 0x34a   :  { %3864 = vmatprep.subr.bf16.mxu0 %v9275_v5 }
 0x34d   :  { %3865 = vmatpush1.bf16.msra.mxu0 %v9273_v6 }
 0x34e   :  { %3866 = vmatprep.subr.bf16.mxu0 %v9278_v7 }
 0x351   :  { %3867 = vmatpush1.bf16.msra.mxu0 %v9276_v12 }
 0x352   :  { %3868 = vmatprep.subr.bf16.mxu0 %v9281_v14 }
 0x355   :  { %3869 = vmatpush1.bf16.msra.mxu0 %v9279_v13  ;;  %v9339_v13 = vld [vmem:[#allocation10 + $0x10] ss:$24 sps:$4 sm:$0xff]  }
 0x356   :  { %3870 = vmatprep.subr.bf16.mxu0 %v9284_v20  ;;  %v9347_v20 = vld [vmem:[#allocation10 + $0x44] ss:$24 sps:$4 sm:$0xff]  }
 0x359   :  { %3871 = vmatpush1.bf16.msra.mxu0 %v9282_v21  ;;  %v9342_v21 = vld [vmem:[#allocation10 + $0x30] ss:$24 sps:$4 sm:$0xff]  }
 0x35a   :  { %3872 = vmatprep.subr.bf16.mxu0 %v9287_v17  ;;  %v9345_v17 = vld [vmem:[#allocation10 + $0x40] ss:$24 sps:$4 sm:$0xff]   ;;  %4280 = vmatpush1.bf16.msra.mxu1 %v9342_v21 }
 0x35b   :  { %v9393_v21 = vld [vmem:[#allocation9 + $0x40] ss:$24 sps:$4 sm:$0xff]  }
 0x35d   :  { %3873 = vmatpush1.bf16.msra.mxu0 %v9285_v22  ;;  %v9350_v22 = vld [vmem:[#allocation10 + $0x64] ss:$24 sps:$4 sm:$0xff]  }
 0x35e   :  { %3885 = vmatprep.subr.bf16.mxu0 %v9290_v23  ;;  %v9353_v23 = vld [vmem:[#allocation10 + $0x74] ss:$24 sps:$4 sm:$0xff]   ;;  %4281 = vmatprep.subr.bf16.mxu1 %v9350_v22 }
 0x35f   :  { %v9401_v22 = vld [vmem:[#allocation9 + $0x74] ss:$24 sps:$4 sm:$0xff]  }
 0x360   :  { %3875 = vmatmul.mubr.bf16.vlgmr.msra.gmra.mrb[12].mxu0 %v10498_v47  ;;  %v9323_v47 = vld [vmem:[#allocation7 + $0x2b4] ss:$8 sps:$4 sm:$0xff]  }
 0x361   :  { %3886 = vmatpush1.bf16.msra.mxu0 %v9288_v24  ;;  %v9348_v24 = vld [vmem:[#allocation10 + $0x60] ss:$24 sps:$4 sm:$0xff]  }
 0x362   :  { %3887 = vmatprep.subr.bf16.mxu0 %v9293_v25  ;;  %v9351_v25 = vld [vmem:[#allocation10 + $0x70] ss:$24 sps:$4 sm:$0xff]   ;;  %4282 = vmatpush1.bf16.msra.mxu1 %v9348_v24 }
 0x363   :  { %4283 = vmatprep.subr.bf16.mxu1 %v9356_v26  ;;  %v9399_v24 = vld [vmem:[#allocation9 + $0x70] ss:$24 sps:$4 sm:$0xff]   ;;  %v9407_v26 = vld [vmem:[#allocation9 + $0xa4] ss:$24 sps:$4 sm:$0xff]  }
 0x365   :  { %3888 = vmatpush1.bf16.msra.mxu0 %v9291_v28  ;;  %v9354_v28 = vld [vmem:[#allocation10 + $0x90] ss:$24 sps:$4 sm:$0xff]  }
 0x366   :  { %3889 = vmatprep.subr.bf16.mxu0 %v9296_v29  ;;  %v9357_v29 = vld [vmem:[#allocation10 + $0xa0] ss:$24 sps:$4 sm:$0xff]   ;;  %4284 = vmatpush1.bf16.msra.mxu1 %v9354_v28 }
 0x367   :  { %v9405_v28 = vld [vmem:[#allocation9 + $0xa0] ss:$24 sps:$4 sm:$0xff]  }
 0x369   :  { %3890 = vmatpush1.bf16.msra.mxu0 %v9294_v30  ;;  %v9362_v30 = vld [vmem:[#allocation10 + $0xc4] ss:$24 sps:$4 sm:$0xff]  }
 0x36a   :  { %3891 = vmatprep.subr.bf16.mxu0 %v9299_v31  ;;  %v9365_v31 = vld [vmem:[#allocation10 + $0xd4] ss:$24 sps:$4 sm:$0xff]   ;;  %4285 = vmatprep.subr.bf16.mxu1 %v9362_v30 }
 0x36b   :  { %v9413_v30 = vld [vmem:[#allocation9 + $0xd4] ss:$24 sps:$4 sm:$0xff]  }
 0x36d   :  { %3892 = vmatpush1.bf16.msra.mxu0 %v9297_v32  ;;  %v9360_v32 = vld [vmem:[#allocation10 + $0xc0] ss:$24 sps:$4 sm:$0xff]  }
 0x36e   :  { %3893 = vmatprep.subr.bf16.mxu0 %v9302_v33  ;;  %v9363_v33 = vld [vmem:[#allocation10 + $0xd0] ss:$24 sps:$4 sm:$0xff]   ;;  %4286 = vmatpush1.bf16.msra.mxu1 %v9360_v32 }
 0x36f   :  { %v9411_v32 = vld [vmem:[#allocation9 + $0xd0] ss:$24 sps:$4 sm:$0xff]  }
 0x371   :  { %3894 = vmatpush1.bf16.msra.mxu0 %v9300_v34  ;;  %v9368_v34 = vld [vmem:[#allocation10 + $0xf4] ss:$24 sps:$4 sm:$0xff]  }
 0x372   :  { %3895 = vmatprep.subr.bf16.mxu0 %v9305_v35  ;;  %v9371_v35 = vld [vmem:[#allocation10 + $0x104] ss:$24 sps:$4 sm:$0xff]   ;;  %4287 = vmatprep.subr.bf16.mxu1 %v9368_v34 }
 0x373   :  { %v9419_v34 = vld [vmem:[#allocation9 + $0x104] ss:$24 sps:$4 sm:$0xff]  }
 0x375   :  { %3896 = vmatpush1.bf16.msra.mxu0 %v9303_v36  ;;  %v9366_v36 = vld [vmem:[#allocation10 + $0xf0] ss:$24 sps:$4 sm:$0xff]  }
 0x376   :  { %3897 = vmatprep.subr.bf16.mxu0 %v9308_v37  ;;  %v9369_v37 = vld [vmem:[#allocation10 + $0x100] ss:$24 sps:$4 sm:$0xff]   ;;  %4288 = vmatpush1.bf16.msra.mxu1 %v9366_v36 }
 0x377   :  { %v9417_v36 = vld [vmem:[#allocation9 + $0x100] ss:$24 sps:$4 sm:$0xff]  }
 0x379   :  { %3898 = vmatpush1.bf16.msra.mxu0 %v9306_v38  ;;  %v9374_v38 = vld [vmem:[#allocation10 + $0x124] ss:$24 sps:$4 sm:$0xff]  }
 0x37a   :  { %3899 = vmatprep.subr.bf16.mxu0 %v9311_v39  ;;  %v9377_v39 = vld [vmem:[#allocation10 + $0x134] ss:$24 sps:$4 sm:$0xff]   ;;  %4289 = vmatprep.subr.bf16.mxu1 %v9374_v38 }
 0x37b   :  { %v9425_v38 = vld [vmem:[#allocation9 + $0x134] ss:$24 sps:$4 sm:$0xff]  }
 0x37d   :  { %3900 = vmatpush1.bf16.msra.mxu0 %v9309_v40  ;;  %v9372_v40 = vld [vmem:[#allocation10 + $0x120] ss:$24 sps:$4 sm:$0xff]  }
 0x37e   :  { %3901 = vmatprep.subr.bf16.mxu0 %v9314_v41  ;;  %v9375_v41 = vld [vmem:[#allocation10 + $0x130] ss:$24 sps:$4 sm:$0xff]   ;;  %4290 = vmatpush1.bf16.msra.mxu1 %v9372_v40 }
 0x37f   :  { %v9423_v40 = vld [vmem:[#allocation9 + $0x130] ss:$24 sps:$4 sm:$0xff]  }
 0x381   :  { %3902 = vmatpush1.bf16.msra.mxu0 %v9312_v42  ;;  %v9378_v42 = vld [vmem:[#allocation10 + $0x150] ss:$24 sps:$4 sm:$0xff]  }
 0x382   :  { %3903 = vmatprep.subr.bf16.mxu0 %v9317_v43  ;;  %v9380_v43 = vld [vmem:[#allocation10 + $0x154] ss:$24 sps:$4 sm:$0xff]  }
 0x383   :  { %4291 = vmatprep.subr.bf16.mxu1 %v9380_v43  ;;  %v9426_v43 = vld [vmem:[#allocation10 + $0x158] ss:$24 sps:$4 sm:$0xff]  }
 0x384   :  { %4292 = vmatpush1.bf16.msra.mxu1 %v9378_v42  ;;  %v9431_v42 = vld [vmem:[#allocation9 + $0x164] ss:$24 sps:$4 sm:$0xff]  }
 0x385   :  { %3904 = vmatpush1.bf16.msra.mxu0 %v9315_v44  ;;  %v9381_v44 = vld [vmem:[#allocation10 + $0x160] ss:$24 sps:$4 sm:$0xff]  }
 0x386   :  { %3905 = vmatprep.subr.bf16.mxu0 %v9320_v45  ;;  %v9383_v45 = vld [vmem:[#allocation10 + $0x164] ss:$24 sps:$4 sm:$0xff]  }
 0x389   :  { %3906 = vmatpush1.bf16.msra.mxu0 %v9318_v46  ;;  %v9386_v46 = vld [vmem:[#allocation10 + $0xc] ss:$24 sps:$4 sm:$0xff]  }
 0x38a   :  { %3907 = vmatprep.subr.bf16.mxu0 %v9323_v47  ;;  %v9389_v47 = vld [vmem:[#allocation9 + $0x14] ss:$24 sps:$4 sm:$0xff]   ;;  %4320 = vmatprep.subr.bf16.mxu1 %v9386_v46  ;;  %v9482_v46 = vld [vmem:[#allocation12 + $0x4] ss:$24 sps:$4 sm:$0xff]  }
 0x38d   :  { %3908 = vmatpush1.bf16.msra.mxu0 %v9321_v48  ;;  %v3313_v48 = vsub.s32 4, %v10443_v49 }
 0x38e   :  { %3909 = vmatprep.subr.bf16.mxu0 %v9326_v50 }
 0x38f   :  { %v3314_v50 = vrot.slane %v10488_v10, %v3313_v48 }
 0x391   :  { %3910 = vmatpush1.bf16.msra.mxu0 %v9324_v52  ;;  %v3318_v52 = vrot.slane %v10493_v15, %v3313_v48  ;;  %v9437_v48 = vld [vmem:[#allocation9 + $0x34] ss:$24 sps:$4 sm:$0xff]  }
 0x392   :  { %3911 = vmatprep.subr.bf16.mxu0 %v9329_v53 }
 0x395   :  { %3912 = vmatpush1.bf16.msra.mxu0 %v9327_v54 }
 0x396   :  { %3913 = vmatprep.subr.bf16.mxu0 %v9332_v16 }
 0x399   :  { %3914 = vmatpush1.bf16.msra.mxu0 %v9330_v55 }
 0x39a   :  { %3915 = vmatprep.subr.bf16.mxu0 %v9335_v19 }
 0x39d   :  { %3916 = vmatpush1.bf16.msra.mxu0 %v9333_v56 }
 0x39e   :  { %4363 = vmatprep.subr.bf16.mxu0 %v9341_v57 }
 0x3d5   :  { %v3188_v61 = vpop.f32.mrb[12].mxu1 }
 0x3d6   :  { %v8504_v62 = vadd.f32 %v3188_v61, %v1365_v58  ;;  %v3190_v63 = vpop.f32.mrb[13].mxu1 }
 0x3d7   :  { %v8505_v1 = vadd.f32 %v3190_v63, %v1369_v60  ;;  %v3192_v2 = vpop.f32.mrb[14].mxu1 }
 0x3d8   :  { %v8506_v11 = vadd.f32 %v3192_v2, %v1365_v58  ;;  %v3194_v3 = vpop.f32.mrb[15].mxu1  ;;  %v3201_v18 = vmax.f32 %v8504_v62, 0.0 }
 0x3d9   :  { %v8507_v4 = vadd.f32 %v3194_v3, %v1369_v60  ;;  %v3202_v6 = vmax.f32 %v8505_v1, 0.0  ;;  %v158_v1 = vld [vmem:[%s10612_s0 + $0x10] sm:$0xff] }
 0x3da   :  { %v3207_v5 = vmax.f32 %v8506_v11, 0.0  ;;  %v161_v11 = vld [vmem:[%s10612_s0 + $0x28] sm:$0xff] }
 0x3db   :  { %v3208_v7 = vmax.f32 %v8507_v4, 0.0 }
 0x3dc   :  { %v3213_v12 = vpack.c.bf16 %v3207_v5, %v3201_v18 }
 0x3dd   :  { %v3214_v14 = vpack.c.bf16 %v3208_v7, %v3202_v6  ;;  %v9384_v7 = vld [vmem:[#allocation10 + $0x8] ss:$24 sps:$4 sm:$0xff]  }
 0x3df   :  { %3917 = vmatprep.mubr.bf16.mxu0 %v3214_v14 }
 0x3e0   :  { %3918 = vmatmul.mubr.bf16.vlgmr.msra.gmra.mrb[12].mxu0 %v3213_v12  ;;  %v9387_v12 = vld [vmem:[#allocation9 + $0x10] ss:$24 sps:$4 sm:$0xff]  }
 0x3e1   :  { %4364 = vmatpush1.bf16.msra.mxu0 %v9339_v13  ;;  %4395 = vmatprep.mubr.bf16.mxu0 %v10205_v0  ;;  %v9392_v13 = vld [vmem:[#allocation10 + $0x3c] ss:$24 sps:$4 sm:$0xff]  }
 0x3e2   :  { %4365 = vmatprep.subr.bf16.mxu0 %v9347_v20  ;;  %v9390_v20 = vld [vmem:[#allocation10 + $0x38] ss:$24 sps:$4 sm:$0xff]  }
 0x3e5   :  { %4366 = vmatpush1.bf16.msra.mxu0 %v9345_v17  ;;  %v9398_v17 = vld [vmem:[#allocation10 + $0x6c] ss:$24 sps:$4 sm:$0xff]  }
 0x3e6   :  { %4367 = vmatprep.subr.bf16.mxu0 %v9353_v23  ;;  %v9396_v23 = vld [vmem:[#allocation10 + $0x68] ss:$24 sps:$4 sm:$0xff]  }
 0x3e9   :  { %4368 = vmatpush1.bf16.msra.mxu0 %v9351_v25  ;;  %v9404_v25 = vld [vmem:[#allocation10 + $0x9c] ss:$24 sps:$4 sm:$0xff]  }
 0x3ea   :  { %4369 = vmatprep.subr.bf16.mxu0 %v9359_v27  ;;  %v9402_v27 = vld [vmem:[#allocation10 + $0x98] ss:$24 sps:$4 sm:$0xff]  }
 0x3ed   :  { %4370 = vmatpush1.bf16.msra.mxu0 %v9357_v29  ;;  %v9410_v29 = vld [vmem:[#allocation10 + $0xcc] ss:$24 sps:$4 sm:$0xff]  }
 0x3ee   :  { %4371 = vmatprep.subr.bf16.mxu0 %v9365_v31  ;;  %v9408_v31 = vld [vmem:[#allocation10 + $0xc8] ss:$24 sps:$4 sm:$0xff]  }
 0x3f1   :  { %4372 = vmatpush1.bf16.msra.mxu0 %v9363_v33  ;;  %v9416_v33 = vld [vmem:[#allocation10 + $0xfc] ss:$24 sps:$4 sm:$0xff]  }
 0x3f2   :  { %4373 = vmatprep.subr.bf16.mxu0 %v9371_v35  ;;  %v9414_v35 = vld [vmem:[#allocation10 + $0xf8] ss:$24 sps:$4 sm:$0xff]  }
 0x3f5   :  { %4374 = vmatpush1.bf16.msra.mxu0 %v9369_v37  ;;  %v9422_v37 = vld [vmem:[#allocation10 + $0x12c] ss:$24 sps:$4 sm:$0xff]  }
 0x3f6   :  { %4375 = vmatprep.subr.bf16.mxu0 %v9377_v39  ;;  %v9420_v39 = vld [vmem:[#allocation10 + $0x128] ss:$24 sps:$4 sm:$0xff]  }
 0x3f9   :  { %4376 = vmatpush1.bf16.msra.mxu0 %v9375_v41  ;;  %v9428_v41 = vld [vmem:[#allocation10 + $0x15c] ss:$24 sps:$4 sm:$0xff]  }
 0x3fa   :  { %4377 = vmatprep.subr.bf16.mxu0 %v9383_v45  ;;  %v9434_v45 = vld [vmem:[#allocation9 + $0x4] ss:$24 sps:$4 sm:$0xff]  }
 0x3fd   :  { %4378 = vmatpush1.bf16.msra.mxu0 %v9381_v44  ;;  %v9429_v44 = vld [vmem:[#allocation9 + $0x160] ss:$24 sps:$4 sm:$0xff]  }
 0x3fe   :  { %4732 = vmatprep.subr.bf16.mxu0 %v9389_v47  ;;  %v9432_v47 = vld [vmem:[#allocation9] ss:$24 sps:$4 sm:$0xff]  }
 0x4b3   :  { %v3919_v53 = vpop.f32.mrb[12].mxu0 }
 0x4b4   :  { %v8508_v54 = vadd.f32 %v3919_v53, %v3314_v50  ;;  %v3921_v16 = vpop.f32.mrb[13].mxu0  ;;  %v9435_v53 = vld [vmem:[#allocation9 + $0x30] ss:$24 sps:$4 sm:$0xff]  }
 0x4b5   :  { %v8509_v55 = vadd.f32 %v3921_v16, %v3318_v52  ;;  %v3923_v19 = vpop.f32.mrb[14].mxu0  ;;  %v9486_v16 = vld [vmem:[#allocation12 + $0x30] ss:$24 sps:$4 sm:$0xff]  }
 0x4b6   :  { %7501 = vst [vmem:[%s10622_s10 + $0x8] sm:$0xff] %v8508_v54  ;;  %v8510_v56 = vadd.f32 %v3923_v19, %v3314_v50  ;;  %v3925_v57 = vpop.f32.mrb[15].mxu0  ;;  %v9480_v50 = vld [vmem:[#allocation12] ss:$24 sps:$4 sm:$0xff]  }
 0x4b7   :  { %v3928_v58 = vmax.f32 %v8509_v55, -4.0  ;;  %v8511_v60 = vadd.f32 %v3925_v57, %v3318_v52  ;;  %v9488_v52 = vld [vmem:[#allocation12 + $0x34] ss:$24 sps:$4 sm:$0xff]   ;;  %v9494_v55 = vld [vmem:[#allocation12 + $0x64] ss:$24 sps:$4 sm:$0xff]  }
 0x4b8   :  { %7502 = vst [vmem:[%s10622_s10 + $0x20] sm:$0xff] %v8510_v56  ;;  %v9438_v19 = vld [vmem:[#allocation9 + $0x60] ss:$24 sps:$4 sm:$0xff]  }
 0x4b9   :  { %v3930_v10 = vmin.f32 %v3928_v58, 15.0  ;;  %v3929_v61 = vmax.f32 %v8511_v60, -4.0  ;;  %v9492_v57 = vld [vmem:[#allocation12 + $0x60] ss:$24 sps:$4 sm:$0xff]   ;;  %v9500_v58 = vld [vmem:[#allocation12 + $0x94] ss:$24 sps:$4 sm:$0xff]  }
 0x4ba   :  { %v9441_v60 = vld [vmem:[#allocation9 + $0x90] ss:$24 sps:$4 sm:$0xff]  }
 0x4bb   :  { %v3932_v15 = vmul.f32 1.442695, %v3930_v10  ;;  %v3931_v62 = vmin.f32 %v3929_v61, 15.0  ;;  %v9446_v10 = vld [vmem:[#allocation9 + $0xc4] ss:$24 sps:$4 sm:$0xff]  }
 0x4bc   :  { %v9498_v61 = vld [vmem:[#allocation12 + $0x90] ss:$24 sps:$4 sm:$0xff]  }
 0x4bd   :  { %9960 = vpow2.f32 %v3932_v15  ;;  %v3934_v63 = vmul.f32 1.442695, %v3931_v62  ;;  %v9506_v15 = vld [vmem:[#allocation12 + $0xc4] ss:$24 sps:$4 sm:$0xff]   ;;  %v9444_v62 = vld [vmem:[#allocation9 + $0xc0] ss:$24 sps:$4 sm:$0xff]  }
 0x4bf   :  { %9962 = vpow2.f32 %v3934_v63  ;;  %v9449_v63 = vld [vmem:[#allocation9 + $0xf4] ss:$24 sps:$4 sm:$0xff]  }
 0x4c7   :  { %v9961_v2 = vpop.eup %9960 }
 0x4c8   :  { %7503 = vst [vmem:[%s10622_s10 + $0x10] sm:$0xff] %v9961_v2  ;;  %v3936_v3 = vmul.f32 %v9961_v2, %v158_v1  ;;  %v9504_v1 = vld [vmem:[#allocation12 + $0xc0] ss:$24 sps:$4 sm:$0xff]   ;;  %v9512_v2 = vld [vmem:[#allocation12 + $0xf4] ss:$24 sps:$4 sm:$0xff]  }
 0x4c9   :  { %v9963_v4 = vpop.eup %9962 }
 0x4ca   :  { %7504 = vst [vmem:[%s10622_s10 + $0x28] sm:$0xff] %v9963_v4  ;;  %v3937_v18 = vmul.f32 %v9963_v4, %v161_v11  ;;  %v3938_v5 = vadd.f32 %v8508_v54, %v3936_v3  ;;  %v9440_v54 = vld [vmem:[#allocation9 + $0x64] ss:$24 sps:$4 sm:$0xff]   ;;  %v9447_v11 = vld [vmem:[#allocation9 + $0xf0] ss:$24 sps:$4 sm:$0xff]  }
 0x4cb   :  { %v9452_v3 = vld [vmem:[#allocation9 + $0x124] ss:$24 sps:$4 sm:$0xff]   ;;  %v9510_v4 = vld [vmem:[#allocation12 + $0xf0] ss:$24 sps:$4 sm:$0xff]  }
 0x4cc   :  { %v3939_v6 = vadd.f32 %v8510_v56, %v3937_v18  ;;  %v9443_v56 = vld [vmem:[#allocation9 + $0x94] ss:$24 sps:$4 sm:$0xff]   ;;  %v9450_v18 = vld [vmem:[#allocation9 + $0x120] ss:$24 sps:$4 sm:$0xff]  }
 0x4ce   :  { %v10531_v14 = vpack.c.bf16 %v3939_v6, %v3938_v5  ;;  %v9455_v5 = vld [vmem:[#allocation9 + $0x154] ss:$24 sps:$4 sm:$0xff]   ;;  %v9453_v6 = vld [vmem:[#allocation9 + $0x150] ss:$24 sps:$4 sm:$0xff]  }
 0x4d0   :  { %4310 = vmatmul.mubr.bf16.vlgmr.msra.gmra.mrb[16].mxu1 %v10531_v14  ;;  %4396 = vmatmul.mubr.bf16.vlgmr.msra.gmra.mrb[16].mxu0 %v10531_v14 }
 0x4d1   :  { %4321 = vmatpush1.bf16.msra.mxu1 %v9384_v7  ;;  %4733 = vmatpush1.bf16.msra.mxu0 %v9387_v12  ;;  %v9458_v7 = vld [vmem:[#allocation9 + $0xc] ss:$24 sps:$4 sm:$0xff]   ;;  %v9456_v12 = vld [vmem:[#allocation9 + $0x8] ss:$24 sps:$4 sm:$0xff]  }
 0x4d2   :  { %4322 = vmatprep.subr.bf16.mxu1 %v9392_v13  ;;  %4734 = vmatprep.subr.bf16.mxu0 %v9395_v8  ;;  %v9459_v13 = vld [vmem:[#allocation9 + $0x38] ss:$24 sps:$4 sm:$0xff]   ;;  %v9464_v8 = vld [vmem:[#allocation9 + $0x6c] ss:$24 sps:$4 sm:$0xff]  }
 0x4d3   :  { %4352 = vmatprep.mubr.bf16.mxu1 %v10205_v0  ;;  %4764 = vmatprep.mubr.bf16.mxu0 %v10205_v0 }
 0x4d5   :  { %4323 = vmatpush1.bf16.msra.mxu1 %v9390_v20  ;;  %4735 = vmatpush1.bf16.msra.mxu0 %v9393_v21  ;;  %v9462_v20 = vld [vmem:[#allocation9 + $0x68] ss:$24 sps:$4 sm:$0xff]   ;;  %v9467_v21 = vld [vmem:[#allocation9 + $0x9c] ss:$24 sps:$4 sm:$0xff]  }
 0x4d6   :  { %4324 = vmatprep.subr.bf16.mxu1 %v9398_v17  ;;  %4736 = vmatprep.subr.bf16.mxu0 %v9401_v22  ;;  %v9465_v17 = vld [vmem:[#allocation9 + $0x98] ss:$24 sps:$4 sm:$0xff]   ;;  %v9470_v22 = vld [vmem:[#allocation9 + $0xcc] ss:$24 sps:$4 sm:$0xff]  }
 0x4d9   :  { %4325 = vmatpush1.bf16.msra.mxu1 %v9396_v23  ;;  %4737 = vmatpush1.bf16.msra.mxu0 %v9399_v24  ;;  %v9468_v23 = vld [vmem:[#allocation9 + $0xc8] ss:$24 sps:$4 sm:$0xff]   ;;  %v9473_v24 = vld [vmem:[#allocation9 + $0xfc] ss:$24 sps:$4 sm:$0xff]  }
 0x4da   :  { %4326 = vmatprep.subr.bf16.mxu1 %v9404_v25  ;;  %4738 = vmatprep.subr.bf16.mxu0 %v9407_v26  ;;  %v9471_v25 = vld [vmem:[#allocation9 + $0xf8] ss:$24 sps:$4 sm:$0xff]   ;;  %v9476_v26 = vld [vmem:[#allocation9 + $0x12c] ss:$24 sps:$4 sm:$0xff]  }
 0x4dd   :  { %4327 = vmatpush1.bf16.msra.mxu1 %v9402_v27  ;;  %4739 = vmatpush1.bf16.msra.mxu0 %v9405_v28  ;;  %v9479_v27 = vld [vmem:[#allocation9 + $0x15c] ss:$24 sps:$4 sm:$0xff]   ;;  %v9477_v28 = vld [vmem:[#allocation9 + $0x158] ss:$24 sps:$4 sm:$0xff]  }
 0x4de   :  { %4328 = vmatprep.subr.bf16.mxu1 %v9410_v29  ;;  %4740 = vmatprep.subr.bf16.mxu0 %v9413_v30  ;;  %v9485_v29 = vld [vmem:[#allocation12 + $0xc] ss:$24 sps:$4 sm:$0xff]   ;;  %v9483_v30 = vld [vmem:[#allocation12 + $0x8] ss:$24 sps:$4 sm:$0xff]  }
 0x4e1   :  { %4329 = vmatpush1.bf16.msra.mxu1 %v9408_v31  ;;  %4741 = vmatpush1.bf16.msra.mxu0 %v9411_v32  ;;  %v9491_v31 = vld [vmem:[#allocation12 + $0x3c] ss:$24 sps:$4 sm:$0xff]   ;;  %v9489_v32 = vld [vmem:[#allocation12 + $0x38] ss:$24 sps:$4 sm:$0xff]  }
 0x4e2   :  { %4330 = vmatprep.subr.bf16.mxu1 %v9416_v33  ;;  %4742 = vmatprep.subr.bf16.mxu0 %v9419_v34  ;;  %v9497_v33 = vld [vmem:[#allocation12 + $0x6c] ss:$24 sps:$4 sm:$0xff]   ;;  %v9495_v34 = vld [vmem:[#allocation12 + $0x68] ss:$24 sps:$4 sm:$0xff]  }
 0x4e5   :  { %4331 = vmatpush1.bf16.msra.mxu1 %v9414_v35  ;;  %4743 = vmatpush1.bf16.msra.mxu0 %v9417_v36  ;;  %v9503_v35 = vld [vmem:[#allocation12 + $0x9c] ss:$24 sps:$4 sm:$0xff]   ;;  %v9501_v36 = vld [vmem:[#allocation12 + $0x98] ss:$24 sps:$4 sm:$0xff]  }
 0x4e6   :  { %4332 = vmatprep.subr.bf16.mxu1 %v9422_v37  ;;  %4744 = vmatprep.subr.bf16.mxu0 %v9425_v38  ;;  %v9509_v37 = vld [vmem:[#allocation12 + $0xcc] ss:$24 sps:$4 sm:$0xff]   ;;  %v9507_v38 = vld [vmem:[#allocation12 + $0xc8] ss:$24 sps:$4 sm:$0xff]  }
 0x4e9   :  { %4333 = vmatpush1.bf16.msra.mxu1 %v9420_v39  ;;  %4745 = vmatpush1.bf16.msra.mxu0 %v9423_v40  ;;  %v9515_v39 = vld [vmem:[#allocation12 + $0xfc] ss:$24 sps:$4 sm:$0xff]   ;;  %v9513_v40 = vld [vmem:[#allocation12 + $0xf8] ss:$24 sps:$4 sm:$0xff]  }
 0x4ea   :  { %4334 = vmatprep.subr.bf16.mxu1 %v9428_v41  ;;  %4746 = vmatprep.subr.bf16.mxu0 %v9431_v42  ;;  %v9521_v41 = vld [vmem:[#allocation12 + $0x12c] ss:$24 sps:$4 sm:$0xff]   ;;  %v9516_v42 = vld [vmem:[#allocation12 + $0x120] ss:$24 sps:$4 sm:$0xff]  }
 0x4ed   :  { %4335 = vmatpush1.bf16.msra.mxu1 %v9426_v43  ;;  %4747 = vmatpush1.bf16.msra.mxu0 %v9429_v44  ;;  %v9519_v43 = vld [vmem:[#allocation12 + $0x128] ss:$24 sps:$4 sm:$0xff]   ;;  %v9524_v44 = vld [vmem:[#allocation12 + $0x154] ss:$24 sps:$4 sm:$0xff]  }
 0x4ee   :  { %4646 = vmatprep.subr.bf16.mxu1 %v9434_v45  ;;  %6581 = vmatprep.subr.bf16.mxu0 %v9482_v46  ;;  %v9527_v45 = vld [vmem:[#allocation12 + $0x15c] ss:$24 sps:$4 sm:$0xff]   ;;  %v9522_v46 = vld [vmem:[#allocation12 + $0x150] ss:$24 sps:$4 sm:$0xff]  }
 0x4f0   :  { %4353 = vmatmul.mubr.bf16.vlgmr.msra.gmra.mrb[20].mxu1 %v10531_v14  ;;  %4765 = vmatmul.mubr.bf16.vlgmr.msra.gmra.mrb[16].mxu0 %v10435_v9  ;;  %v9461_v14 = vld [vmem:[#allocation9 + $0x3c] ss:$24 sps:$4 sm:$0xff]  }
 0x4f1   :  { %4647 = vmatpush1.bf16.msra.mxu1 %v9432_v47  ;;  %4678 = vmatprep.mubr.bf16.mxu1 %v10205_v0  ;;  %v9525_v47 = vld [vmem:[#allocation12 + $0x158] ss:$24 sps:$4 sm:$0xff]  }
 0x4f2   :  { %4648 = vmatprep.subr.bf16.mxu1 %v9437_v48  ;;  %6582 = vmatpush1.bf16.msra.mxu0 %v9480_v50  ;;  %v9528_v48 = vld [vmem:[#allocation12 + $0x180] ss:$24 sps:$4 sm:$0xff]   ;;  %v9530_v50 = vld [vmem:[#allocation12 + $0x184] ss:$24 sps:$4 sm:$0xff]  }
 0x4f3   :  { %6583 = vmatprep.subr.bf16.mxu0 %v9488_v52  ;;  %v9533_v52 = vld [vmem:[#allocation12 + $0x18c] ss:$24 sps:$4 sm:$0xff]  }
 0x4f5   :  { %4649 = vmatpush1.bf16.msra.mxu1 %v9435_v53  ;;  %v9536_v53 = vld [vmem:[#allocation12 + $0x1b4] ss:$24 sps:$4 sm:$0xff]  }
 0x4f6   :  { %4650 = vmatprep.subr.bf16.mxu1 %v9440_v54  ;;  %6584 = vmatpush1.bf16.msra.mxu0 %v9486_v16  ;;  %v9531_v54 = vld [vmem:[#allocation12 + $0x188] ss:$24 sps:$4 sm:$0xff]  }
 0x4f7   :  { %6585 = vmatprep.subr.bf16.mxu0 %v9494_v55  ;;  %v9534_v16 = vld [vmem:[#allocation12 + $0x1b0] ss:$24 sps:$4 sm:$0xff]   ;;  %v9539_v55 = vld [vmem:[#allocation12 + $0x1bc] ss:$24 sps:$4 sm:$0xff]  }
 0x4f9   :  { %4651 = vmatpush1.bf16.msra.mxu1 %v9438_v19  ;;  %v9542_v19 = vld [vmem:[#allocation12 + $0x1e4] ss:$24 sps:$4 sm:$0xff]  }
 0x4fa   :  { %4652 = vmatprep.subr.bf16.mxu1 %v9443_v56  ;;  %6586 = vmatpush1.bf16.msra.mxu0 %v9492_v57  ;;  %v9537_v56 = vld [vmem:[#allocation12 + $0x1b8] ss:$24 sps:$4 sm:$0xff]  }
 0x4fb   :  { %6587 = vmatprep.subr.bf16.mxu0 %v9500_v58  ;;  %v9540_v57 = vld [vmem:[#allocation12 + $0x1e0] ss:$24 sps:$4 sm:$0xff]   ;;  %v9545_v58 = vld [vmem:[#allocation12 + $0x1ec] ss:$24 sps:$4 sm:$0xff]  }
 0x4fd   :  { %4653 = vmatpush1.bf16.msra.mxu1 %v9441_v60  ;;  %v9548_v60 = vld [vmem:[#allocation12 + $0x214] ss:$24 sps:$4 sm:$0xff]  }
 0x4fe   :  { %4654 = vmatprep.subr.bf16.mxu1 %v9446_v10  ;;  %6588 = vmatpush1.bf16.msra.mxu0 %v9498_v61  ;;  %v9543_v10 = vld [vmem:[#allocation12 + $0x1e8] ss:$24 sps:$4 sm:$0xff]  }
 0x4ff   :  { %6589 = vmatprep.subr.bf16.mxu0 %v9506_v15  ;;  %v9546_v61 = vld [vmem:[#allocation12 + $0x210] ss:$24 sps:$4 sm:$0xff]   ;;  %v9551_v15 = vld [vmem:[#allocation12 + $0x21c] ss:$24 sps:$4 sm:$0xff]  }
 0x501   :  { %4655 = vmatpush1.bf16.msra.mxu1 %v9444_v62  ;;  %v9554_v62 = vld [vmem:[#allocation12 + $0x244] ss:$24 sps:$4 sm:$0xff]  }
 0x502   :  { %4656 = vmatprep.subr.bf16.mxu1 %v9449_v63  ;;  %6590 = vmatpush1.bf16.msra.mxu0 %v9504_v1  ;;  %v9549_v63 = vld [vmem:[#allocation12 + $0x218] ss:$24 sps:$4 sm:$0xff]  }
 0x503   :  { %6591 = vmatprep.subr.bf16.mxu0 %v9512_v2  ;;  %v9552_v1 = vld [vmem:[#allocation12 + $0x240] ss:$24 sps:$4 sm:$0xff]   ;;  %v9557_v2 = vld [vmem:[#allocation12 + $0x24c] ss:$24 sps:$4 sm:$0xff]  }
 0x505   :  { %4657 = vmatpush1.bf16.msra.mxu1 %v9447_v11  ;;  %v9560_v11 = vld [vmem:[#allocation12 + $0x274] ss:$24 sps:$4 sm:$0xff]  }
 0x506   :  { %4658 = vmatprep.subr.bf16.mxu1 %v9452_v3  ;;  %6592 = vmatpush1.bf16.msra.mxu0 %v9510_v4  ;;  %v9555_v3 = vld [vmem:[#allocation12 + $0x248] ss:$24 sps:$4 sm:$0xff]  }
 0x507   :  { %v9558_v4 = vld [vmem:[#allocation12 + $0x270] ss:$24 sps:$4 sm:$0xff]  }
 0x509   :  { %4659 = vmatpush1.bf16.msra.mxu1 %v9450_v18  ;;  %v9563_v18 = vld [vmem:[#allocation12 + $0x27c] ss:$24 sps:$4 sm:$0xff]  }
 0x50a   :  { %4660 = vmatprep.subr.bf16.mxu1 %v9455_v5  ;;  %v9561_v5 = vld [vmem:[#allocation12 + $0x278] ss:$24 sps:$4 sm:$0xff]  }
 0x50d   :  { %4661 = vmatpush1.bf16.msra.mxu1 %v9453_v6  ;;  %v9566_v6 = vld [vmem:[#allocation12 + $0x2a4] ss:$24 sps:$4 sm:$0xff]  }
 0x50e   :  { %4689 = vmatprep.subr.bf16.mxu1 %v9458_v7  ;;  %v9569_v7 = vld [vmem:[#allocation12 + $0x2ac] ss:$24 sps:$4 sm:$0xff]  }
 0x510   :  { %4679 = vmatmul.mubr.bf16.vlgmr.msra.gmra.mrb[16].mxu1 %v10435_v9 }
 0x511   :  { %4690 = vmatpush1.bf16.msra.mxu1 %v9456_v12  ;;  %4721 = vmatprep.mubr.bf16.mxu1 %v10205_v0  ;;  %v9474_v0 = vld [vmem:[#allocation9 + $0x128] ss:$24 sps:$4 sm:$0xff]  }
 0x512   :  { %4691 = vmatprep.subr.bf16.mxu1 %v9461_v14  ;;  %v9564_v12 = vld [vmem:[#allocation12 + $0x2a0] ss:$24 sps:$4 sm:$0xff]  }
 0x513   :  { %v9567_v14 = vld [vmem:[#allocation12 + $0x2a8] ss:$24 sps:$4 sm:$0xff]  }
 0x515   :  { %4692 = vmatpush1.bf16.msra.mxu1 %v9459_v13  ;;  %v9572_v13 = vld [vmem:[#allocation12 + $0x2d4] ss:$24 sps:$4 sm:$0xff]  }
 0x516   :  { %4693 = vmatprep.subr.bf16.mxu1 %v9464_v8  ;;  %v9575_v8 = vld [vmem:[#allocation12 + $0x2dc] ss:$24 sps:$4 sm:$0xff]  }
 0x519   :  { %4694 = vmatpush1.bf16.msra.mxu1 %v9462_v20  ;;  %v9570_v20 = vld [vmem:[#allocation12 + $0x2d0] ss:$24 sps:$4 sm:$0xff]  }
 0x51a   :  { %4695 = vmatprep.subr.bf16.mxu1 %v9467_v21  ;;  %v9573_v21 = vld [vmem:[#allocation12 + $0x2d8] ss:$24 sps:$4 sm:$0xff]  }
 0x51d   :  { %4696 = vmatpush1.bf16.msra.mxu1 %v9465_v17  ;;  %v9578_v17 = vld [vmem:[#allocation12 + $0x304] ss:$24 sps:$4 sm:$0xff]  }
 0x51e   :  { %4697 = vmatprep.subr.bf16.mxu1 %v9470_v22  ;;  %v9581_v22 = vld [vmem:[#allocation12 + $0x30c] ss:$24 sps:$4 sm:$0xff]  }
 0x521   :  { %4698 = vmatpush1.bf16.msra.mxu1 %v9468_v23  ;;  %v10544_v23 = vsub.s32 2, %v10443_v49 }
 0x522   :  { %4699 = vmatprep.subr.bf16.mxu1 %v9473_v24 }
 0x523   :  { %v4794_v24 = vrot.slane %v10501_v51, %v10544_v23  ;;  %v9974_v51 = vld [vmem:[#allocation15] sm:$0xff] }
 0x525   :  { %4700 = vmatpush1.bf16.msra.mxu1 %v9471_v25  ;;  %v4798_v25 = vrot.slane %v10505_v59, %v10544_v23  ;;  %v9975_v59 = vld [vmem:[#allocation15 + $0x8] sm:$0xff] }
 0x526   :  { %4701 = vmatprep.subr.bf16.mxu1 %v9476_v26 }
 0x529   :  { %4702 = vmatpush1.bf16.msra.mxu1 %v9474_v0 }
 0x52a   :  { %4703 = vmatprep.subr.bf16.mxu1 %v9479_v27 }
 0x52d   :  { %4704 = vmatpush1.bf16.msra.mxu1 %v9477_v28 }
 0x52e   :  { %6710 = vmatprep.subr.bf16.mxu1 %v9485_v29 }
 0x530   :  { %4722 = vmatmul.mubr.bf16.vlgmr.msra.gmra.mrb[20].mxu1 %v10435_v9  ;;  %v9518_v9 = vld [vmem:[#allocation12 + $0x124] ss:$24 sps:$4 sm:$0xff]  }
 0x531   :  { %6711 = vmatpush1.bf16.msra.mxu1 %v9483_v30  ;;  %6593 = vmatprep.subr.bf16.mxu0 %v9518_v9 }
 0x532   :  { %6712 = vmatprep.subr.bf16.mxu1 %v9491_v31  ;;  %6594 = vmatpush1.bf16.msra.mxu0 %v9516_v42 }
 0x533   :  { %6595 = vmatprep.subr.bf16.mxu0 %v9524_v44 }
 0x535   :  { %6713 = vmatpush1.bf16.msra.mxu1 %v9489_v32 }
 0x536   :  { %6714 = vmatprep.subr.bf16.mxu1 %v9497_v33  ;;  %6596 = vmatpush1.bf16.msra.mxu0 %v9522_v46 }
 0x537   :  { %6597 = vmatprep.subr.bf16.mxu0 %v9530_v50 }
 0x539   :  { %6715 = vmatpush1.bf16.msra.mxu1 %v9495_v34 }
 0x53a   :  { %6716 = vmatprep.subr.bf16.mxu1 %v9503_v35  ;;  %6598 = vmatpush1.bf16.msra.mxu0 %v9528_v48 }
 0x53b   :  { %6599 = vmatprep.subr.bf16.mxu0 %v9536_v53 }
 0x53d   :  { %6717 = vmatpush1.bf16.msra.mxu1 %v9501_v36 }
 0x53e   :  { %6718 = vmatprep.subr.bf16.mxu1 %v9509_v37  ;;  %6600 = vmatpush1.bf16.msra.mxu0 %v9534_v16 }
 0x53f   :  { %6601 = vmatprep.subr.bf16.mxu0 %v9542_v19  ;;  %v9579_v19 = vld [vmem:[#allocation12 + $0x308] ss:$24 sps:$4 sm:$0xff]  }
 0x541   :  { %6719 = vmatpush1.bf16.msra.mxu1 %v9507_v38 }
 0x542   :  { %6720 = vmatprep.subr.bf16.mxu1 %v9515_v39  ;;  %6602 = vmatpush1.bf16.msra.mxu0 %v9540_v57  ;;  %v4778_v39 = vrot.slane %v9974_v51, %v10544_v23  ;;  %v9587_v57 = vld [vmem:[#allocation12 + $0x33c] ss:$24 sps:$4 sm:$0xff]  }
 0x543   :  { %6603 = vmatprep.subr.bf16.mxu0 %v9548_v60  ;;  %v9585_v60 = vld [vmem:[#allocation12 + $0x338] ss:$24 sps:$4 sm:$0xff]  }
 0x545   :  { %6721 = vmatpush1.bf16.msra.mxu1 %v9513_v40  ;;  %v4782_v40 = vrot.slane %v9975_v59, %v10544_v23  ;;  %v9629_v59 = vld [vmem:[#allocation12 + $0x48c] ss:$24 sps:$4 sm:$0xff]  }
 0x546   :  { %6722 = vmatprep.subr.bf16.mxu1 %v9521_v41  ;;  %6604 = vmatpush1.bf16.msra.mxu0 %v9546_v61  ;;  %v9593_v61 = vld [vmem:[#allocation12 + $0x36c] ss:$24 sps:$4 sm:$0xff]  }
 0x547   :  { %6605 = vmatprep.subr.bf16.mxu0 %v9554_v62  ;;  %v9591_v62 = vld [vmem:[#allocation12 + $0x368] ss:$24 sps:$4 sm:$0xff]  }
 0x549   :  { %6723 = vmatpush1.bf16.msra.mxu1 %v9519_v43 }
 0x54a   :  { %6724 = vmatprep.subr.bf16.mxu1 %v9527_v45  ;;  %6606 = vmatpush1.bf16.msra.mxu0 %v9552_v1  ;;  %v9599_v1 = vld [vmem:[#allocation12 + $0x39c] ss:$24 sps:$4 sm:$0xff]  }
 0x54b   :  { %6607 = vmatprep.subr.bf16.mxu0 %v9560_v11  ;;  %v9597_v11 = vld [vmem:[#allocation12 + $0x398] ss:$24 sps:$4 sm:$0xff]  }
 0x54d   :  { %6725 = vmatpush1.bf16.msra.mxu1 %v9525_v47 }
 0x54e   :  { %6726 = vmatprep.subr.bf16.mxu1 %v9533_v52  ;;  %6608 = vmatpush1.bf16.msra.mxu0 %v9558_v4  ;;  %v9605_v4 = vld [vmem:[#allocation12 + $0x3cc] ss:$24 sps:$4 sm:$0xff]  }
 0x54f   :  { %6609 = vmatprep.subr.bf16.mxu0 %v9566_v6  ;;  %v9608_v6 = vld [vmem:[#allocation12 + $0x3f4] ss:$24 sps:$4 sm:$0xff]  }
 0x551   :  { %6727 = vmatpush1.bf16.msra.mxu1 %v9531_v54 }
 0x552   :  { %6728 = vmatprep.subr.bf16.mxu1 %v9539_v55  ;;  %6610 = vmatpush1.bf16.msra.mxu0 %v9564_v12  ;;  %v9576_v55 = vld [vmem:[#allocation12 + $0x300] ss:$24 sps:$4 sm:$0xff]   ;;  %v9606_v12 = vld [vmem:[#allocation12 + $0x3f0] ss:$24 sps:$4 sm:$0xff]  }
 0x553   :  { %6611 = vmatprep.subr.bf16.mxu0 %v9572_v13  ;;  %v10564_v13 = vld [vmem:[#allocation15 + $0x10] sm:$0xff] }
 0x555   :  { %6729 = vmatpush1.bf16.msra.mxu1 %v9537_v56  ;;  %v9584_v56 = vld [vmem:[#allocation12 + $0x334] ss:$24 sps:$4 sm:$0xff]  }
 0x556   :  { %6730 = vmatprep.subr.bf16.mxu1 %v9545_v58  ;;  %6612 = vmatpush1.bf16.msra.mxu0 %v9570_v20  ;;  %v9582_v58 = vld [vmem:[#allocation12 + $0x330] ss:$24 sps:$4 sm:$0xff]   ;;  %v9614_v20 = vld [vmem:[#allocation12 + $0x424] ss:$24 sps:$4 sm:$0xff]  }
 0x557   :  { %6624 = vmatprep.subr.bf16.mxu0 %v9578_v17  ;;  %v10568_v17 = vld [vmem:[#allocation15 + $0x18] sm:$0xff] }
 0x559   :  { %6731 = vmatpush1.bf16.msra.mxu1 %v9543_v10  ;;  %v9590_v10 = vld [vmem:[#allocation12 + $0x364] ss:$24 sps:$4 sm:$0xff]  }
 0x55a   :  { %6732 = vmatprep.subr.bf16.mxu1 %v9551_v15  ;;  %v9588_v15 = vld [vmem:[#allocation12 + $0x360] ss:$24 sps:$4 sm:$0xff]  }
 0x55d   :  { %6733 = vmatpush1.bf16.msra.mxu1 %v9549_v63  ;;  %v9596_v63 = vld [vmem:[#allocation12 + $0x394] ss:$24 sps:$4 sm:$0xff]  }
 0x55e   :  { %6734 = vmatprep.subr.bf16.mxu1 %v9557_v2  ;;  %v9594_v2 = vld [vmem:[#allocation12 + $0x390] ss:$24 sps:$4 sm:$0xff]  }
 0x561   :  { %6735 = vmatpush1.bf16.msra.mxu1 %v9555_v3  ;;  %v9602_v3 = vld [vmem:[#allocation12 + $0x3c4] ss:$24 sps:$4 sm:$0xff]  }
 0x562   :  { %6736 = vmatprep.subr.bf16.mxu1 %v9563_v18  ;;  %v9600_v18 = vld [vmem:[#allocation12 + $0x3c0] ss:$24 sps:$4 sm:$0xff]  }
 0x565   :  { %6737 = vmatpush1.bf16.msra.mxu1 %v9561_v5  ;;  %v9603_v5 = vld [vmem:[#allocation12 + $0x3c8] ss:$24 sps:$4 sm:$0xff]  }
 0x566   :  { %6738 = vmatprep.subr.bf16.mxu1 %v9569_v7  ;;  %v9611_v7 = vld [vmem:[#allocation12 + $0x3fc] ss:$24 sps:$4 sm:$0xff]  }
 0x569   :  { %6739 = vmatpush1.bf16.msra.mxu1 %v9567_v14  ;;  %v9609_v14 = vld [vmem:[#allocation12 + $0x3f8] ss:$24 sps:$4 sm:$0xff]  }
 0x56a   :  { %6740 = vmatprep.subr.bf16.mxu1 %v9575_v8  ;;  %v4786_v8 = vrot.slane %v10564_v13, %v10544_v23 }
 0x56d   :  { %6741 = vmatpush1.bf16.msra.mxu1 %v9573_v21  ;;  %v9617_v21 = vld [vmem:[#allocation12 + $0x42c] ss:$24 sps:$4 sm:$0xff]  }
 0x56e   :  { %6753 = vmatprep.subr.bf16.mxu1 %v9581_v22  ;;  %v4790_v22 = vrot.slane %v10568_v17, %v10544_v23  ;;  %v9621_v23 = vld [vmem:[#allocation12 + $0x458] ss:$24 sps:$4 sm:$0xff]  }
 0x5c3   :  { %v4766_v26 = vpop.f32.mrb[16].mxu0 }
 0x5c4   :  { %v4803_v0 = vadd.f32 %v4794_v24, %v4766_v26  ;;  %v4768_v27 = vpop.f32.mrb[17].mxu0  ;;  %v9615_v26 = vld [vmem:[#allocation12 + $0x428] ss:$24 sps:$4 sm:$0xff]  }
 0x5c5   :  { %v4804_v28 = vadd.f32 %v4798_v25, %v4768_v27  ;;  %v4770_v29 = vpop.f32.mrb[18].mxu0 }
 0x5c6   :  { %v4809_v30 = vadd.f32 %v4794_v24, %v4770_v29  ;;  %v4772_v31 = vpop.f32.mrb[19].mxu0  ;;  %v4815_v33 = vmax.f32 %v4803_v0, 0.0  ;;  %v9623_v29 = vld [vmem:[#allocation12 + $0x45c] ss:$24 sps:$4 sm:$0xff]  }
 0x5c7   :  { %v4810_v32 = vadd.f32 %v4798_v25, %v4772_v31  ;;  %v4816_v35 = vmax.f32 %v4804_v28, 0.0  ;;  %v9612_v25 = vld [vmem:[#allocation12 + $0x420] ss:$24 sps:$4 sm:$0xff]   ;;  %v9620_v28 = vld [vmem:[#allocation12 + $0x454] ss:$24 sps:$4 sm:$0xff]  }
 0x5c8   :  { %v4821_v34 = vmax.f32 %v4809_v30, 0.0 }
 0x5c9   :  { %v4822_v36 = vmax.f32 %v4810_v32, 0.0 }
 0x5ca   :  { %v10550_v37 = vpack.c.bf16 %v4821_v34, %v4815_v33 }
 0x5cb   :  { %v10552_v38 = vpack.c.bf16 %v4822_v36, %v4816_v35  ;;  %v9618_v35 = vld [vmem:[#allocation12 + $0x450] ss:$24 sps:$4 sm:$0xff]  }
 0x5e3   :  { %v4680_v9 = vpop.f32.mrb[16].mxu1 }
 0x5e4   :  { %v4799_v41 = vadd.f32 %v4778_v39, %v4680_v9  ;;  %v4682_v42 = vpop.f32.mrb[17].mxu1 }
 0x5e5   :  { %v4800_v43 = vadd.f32 %v4782_v40, %v4682_v42  ;;  %v4684_v44 = vpop.f32.mrb[18].mxu1 }
 0x5e6   :  { %v4805_v45 = vadd.f32 %v4778_v39, %v4684_v44  ;;  %v4686_v46 = vpop.f32.mrb[19].mxu1  ;;  %v4811_v48 = vmax.f32 %v4799_v41, 0.0  ;;  %v9626_v39 = vld [vmem:[#allocation12 + $0x484] ss:$24 sps:$4 sm:$0xff]   ;;  %v9627_v44 = vld [vmem:[#allocation12 + $0x488] ss:$24 sps:$4 sm:$0xff]  }
 0x5e7   :  { %v4806_v47 = vadd.f32 %v4782_v40, %v4686_v46  ;;  %v4812_v52 = vmax.f32 %v4800_v43, 0.0  ;;  %v9624_v43 = vld [vmem:[#allocation12 + $0x480] ss:$24 sps:$4 sm:$0xff]   ;;  %v9635_v46 = vld [vmem:[#allocation12 + $0x4bc] ss:$24 sps:$4 sm:$0xff]  }
 0x5e8   :  { %v4817_v50 = vmax.f32 %v4805_v45, 0.0  ;;  %v9632_v45 = vld [vmem:[#allocation12 + $0x4b4] ss:$24 sps:$4 sm:$0xff]  }
 0x5e9   :  { %v4818_v53 = vmax.f32 %v4806_v47, 0.0  ;;  %v9630_v47 = vld [vmem:[#allocation12 + $0x4b0] ss:$24 sps:$4 sm:$0xff]  }
 0x5ea   :  { %v10556_v54 = vpack.c.bf16 %v4817_v50, %v4811_v48  ;;  %v9633_v48 = vld [vmem:[#allocation12 + $0x4b8] ss:$24 sps:$4 sm:$0xff]   ;;  %v9638_v50 = vld [vmem:[#allocation12 + $0x4e4] ss:$24 sps:$4 sm:$0xff]  }
 0x5eb   :  { %v10558_v16 = vpack.c.bf16 %v4818_v53, %v4812_v52  ;;  %v9641_v52 = vld [vmem:[#allocation12 + $0x4ec] ss:$24 sps:$4 sm:$0xff]   ;;  %v9636_v53 = vld [vmem:[#allocation12 + $0x4e0] ss:$24 sps:$4 sm:$0xff]  }
 0x5ed   :  { %6613 = vmatprep.mubr.bf16.mxu0 %v10558_v16  ;;  %6742 = vmatprep.mubr.bf16.mxu1 %v10558_v16 }
 0x5ee   :  { %6614 = vmatmul.mubr.bf16.vlgmr.msra.gmra.mrb[20].mxu0 %v10556_v54  ;;  %6743 = vmatmul.mubr.bf16.vlgmr.msra.gmra.mrb[24].mxu1 %v10556_v54 }
 0x5ef   :  { %6625 = vmatpush1.bf16.msra.mxu0 %v9576_v55  ;;  %6754 = vmatpush1.bf16.msra.mxu1 %v9579_v19  ;;  %v9639_v55 = vld [vmem:[#allocation12 + $0x4e8] ss:$24 sps:$4 sm:$0xff]   ;;  %v9644_v19 = vld [vmem:[#allocation12 + $0x514] ss:$24 sps:$4 sm:$0xff]  }
 0x5f0   :  { %6626 = vmatprep.subr.bf16.mxu0 %v9584_v56  ;;  %6755 = vmatprep.subr.bf16.mxu1 %v9587_v57  ;;  %v9647_v56 = vld [vmem:[#allocation12 + $0x51c] ss:$24 sps:$4 sm:$0xff]   ;;  %v9642_v57 = vld [vmem:[#allocation12 + $0x510] ss:$24 sps:$4 sm:$0xff]  }
 0x5f3   :  { %6627 = vmatpush1.bf16.msra.mxu0 %v9582_v58  ;;  %6756 = vmatpush1.bf16.msra.mxu1 %v9585_v60  ;;  %v9645_v58 = vld [vmem:[#allocation12 + $0x518] ss:$24 sps:$4 sm:$0xff]   ;;  %v9650_v60 = vld [vmem:[#allocation12 + $0x544] ss:$24 sps:$4 sm:$0xff]  }
 0x5f4   :  { %6628 = vmatprep.subr.bf16.mxu0 %v9590_v10  ;;  %6757 = vmatprep.subr.bf16.mxu1 %v9593_v61  ;;  %v9653_v10 = vld [vmem:[#allocation12 + $0x54c] ss:$24 sps:$4 sm:$0xff]   ;;  %v9648_v61 = vld [vmem:[#allocation12 + $0x540] ss:$24 sps:$4 sm:$0xff]  }
 0x5f7   :  { %6629 = vmatpush1.bf16.msra.mxu0 %v9588_v15  ;;  %6758 = vmatpush1.bf16.msra.mxu1 %v9591_v62  ;;  %v9651_v15 = vld [vmem:[#allocation12 + $0x548] ss:$24 sps:$4 sm:$0xff]   ;;  %v9656_v62 = vld [vmem:[#allocation12 + $0x574] ss:$24 sps:$4 sm:$0xff]  }
 0x5f8   :  { %6630 = vmatprep.subr.bf16.mxu0 %v9596_v63  ;;  %6759 = vmatprep.subr.bf16.mxu1 %v9599_v1  ;;  %v9659_v63 = vld [vmem:[#allocation12 + $0x57c] ss:$24 sps:$4 sm:$0xff]   ;;  %v9654_v1 = vld [vmem:[#allocation12 + $0x570] ss:$24 sps:$4 sm:$0xff]  }
 0x5fb   :  { %6631 = vmatpush1.bf16.msra.mxu0 %v9594_v2  ;;  %6760 = vmatpush1.bf16.msra.mxu1 %v9597_v11  ;;  %v9657_v2 = vld [vmem:[#allocation12 + $0x578] ss:$24 sps:$4 sm:$0xff]   ;;  %v9662_v11 = vld [vmem:[#allocation12 + $0x5a4] ss:$24 sps:$4 sm:$0xff]  }
 0x5fc   :  { %6632 = vmatprep.subr.bf16.mxu0 %v9602_v3  ;;  %6761 = vmatprep.subr.bf16.mxu1 %v9605_v4  ;;  %v9665_v3 = vld [vmem:[#allocation12 + $0x5ac] ss:$24 sps:$4 sm:$0xff]   ;;  %v9660_v4 = vld [vmem:[#allocation12 + $0x5a0] ss:$24 sps:$4 sm:$0xff]  }
 0x5ff   :  { %6633 = vmatpush1.bf16.msra.mxu0 %v9600_v18  ;;  %6762 = vmatpush1.bf16.msra.mxu1 %v9603_v5  ;;  %v9663_v18 = vld [vmem:[#allocation12 + $0x5a8] ss:$24 sps:$4 sm:$0xff]   ;;  %v9668_v5 = vld [vmem:[#allocation12 + $0x5d4] ss:$24 sps:$4 sm:$0xff]  }
 0x600   :  { %6634 = vmatprep.subr.bf16.mxu0 %v9608_v6  ;;  %6763 = vmatprep.subr.bf16.mxu1 %v9611_v7  ;;  %v9671_v6 = vld [vmem:[#allocation12 + $0x5dc] ss:$24 sps:$4 sm:$0xff]   ;;  %v9666_v7 = vld [vmem:[#allocation12 + $0x5d0] ss:$24 sps:$4 sm:$0xff]  }
 0x603   :  { %6635 = vmatpush1.bf16.msra.mxu0 %v9606_v12  ;;  %6764 = vmatpush1.bf16.msra.mxu1 %v9609_v14  ;;  %v4723_v24 = vpop.f32.mrb[20].mxu1  ;;  %v9669_v12 = vld [vmem:[#allocation12 + $0x5d8] ss:$24 sps:$4 sm:$0xff]   ;;  %v9674_v14 = vld [vmem:[#allocation12 + $0x604] ss:$24 sps:$4 sm:$0xff]  }
 0x604   :  { %v4801_v0 = vadd.f32 %v4786_v8, %v4723_v24  ;;  %v4725_v27 = vpop.f32.mrb[21].mxu1  ;;  %6636 = vmatprep.subr.bf16.mxu0 %v9614_v20  ;;  %6765 = vmatprep.subr.bf16.mxu1 %v9617_v21  ;;  %v9672_v20 = vld [vmem:[#allocation12 + $0x600] ss:$24 sps:$4 sm:$0xff]   ;;  %v9683_v24 = vld [vmem:[#allocation12 + $0x63c] ss:$24 sps:$4 sm:$0xff]  }
 0x605   :  { %v4802_v30 = vadd.f32 %v4790_v22, %v4725_v27  ;;  %v4727_v31 = vpop.f32.mrb[22].mxu1  ;;  %v9675_v21 = vld [vmem:[#allocation12 + $0x608] ss:$24 sps:$4 sm:$0xff]   ;;  %v9689_v27 = vld [vmem:[#allocation12 + $0x66c] ss:$24 sps:$4 sm:$0xff]  }
 0x606   :  { %v4807_v32 = vadd.f32 %v4786_v8, %v4727_v31  ;;  %v4729_v33 = vpop.f32.mrb[23].mxu1  ;;  %v4813_v36 = vmax.f32 %v4801_v0, 0.0  ;;  %v9677_v8 = vld [vmem:[#allocation12 + $0x60c] ss:$24 sps:$4 sm:$0xff]   ;;  %v9695_v31 = vld [vmem:[#allocation12 + $0x69c] ss:$24 sps:$4 sm:$0xff]  }
 0x607   :  { %v4808_v34 = vadd.f32 %v4790_v22, %v4729_v33  ;;  %6637 = vmatpush1.bf16.msra.mxu0 %v9612_v25  ;;  %6766 = vmatpush1.bf16.msra.mxu1 %v9615_v26  ;;  %v4814_v40 = vmax.f32 %v4802_v30, 0.0  ;;  %v9680_v22 = vld [vmem:[#allocation12 + $0x634] ss:$24 sps:$4 sm:$0xff]   ;;  %v9678_v25 = vld [vmem:[#allocation12 + $0x630] ss:$24 sps:$4 sm:$0xff]  }
 0x608   :  { %v4819_v51 = vmax.f32 %v4807_v32, 0.0  ;;  %6638 = vmatprep.subr.bf16.mxu0 %v9620_v28  ;;  %6767 = vmatprep.subr.bf16.mxu1 %v9623_v29  ;;  %v9681_v26 = vld [vmem:[#allocation12 + $0x638] ss:$24 sps:$4 sm:$0xff]   ;;  %v9686_v0 = vld [vmem:[#allocation12 + $0x664] ss:$24 sps:$4 sm:$0xff]  }
 0x609   :  { %v4820_v9 = vmax.f32 %v4808_v34, 0.0  ;;  %v9684_v28 = vld [vmem:[#allocation12 + $0x660] ss:$24 sps:$4 sm:$0xff]   ;;  %v9692_v30 = vld [vmem:[#allocation12 + $0x694] ss:$24 sps:$4 sm:$0xff]  }
 0x60a   :  { %v10572_v41 = vpack.c.bf16 %v4819_v51, %v4813_v36  ;;  %v9687_v29 = vld [vmem:[#allocation12 + $0x668] ss:$24 sps:$4 sm:$0xff]   ;;  %v9693_v33 = vld [vmem:[#allocation12 + $0x698] ss:$24 sps:$4 sm:$0xff]   ;;  %v9698_v34 = vld [vmem:[#allocation12 + $0x6c4] ss:$24 sps:$4 sm:$0xff]  }
 0x60b   :  { %v10574_v42 = vpack.c.bf16 %v4820_v9, %v4814_v40  ;;  %6639 = vmatpush1.bf16.msra.mxu0 %v9618_v35  ;;  %6768 = vmatpush1.bf16.msra.mxu1 %v9621_v23  ;;  %v9690_v32 = vld [vmem:[#allocation12 + $0x690] ss:$24 sps:$4 sm:$0xff]   ;;  %v9701_v35 = vld [vmem:[#allocation12 + $0x6cc] ss:$24 sps:$4 sm:$0xff]   ;;  %v9696_v23 = vld [vmem:[#allocation12 + $0x6c0] ss:$24 sps:$4 sm:$0xff]  }
 0x60c   :  { %6640 = vmatprep.subr.bf16.mxu0 %v9626_v39  ;;  %6769 = vmatprep.subr.bf16.mxu1 %v9629_v59  ;;  %v9699_v36 = vld [vmem:[#allocation12 + $0x6c8] ss:$24 sps:$4 sm:$0xff]   ;;  %v9704_v51 = vld [vmem:[#allocation12 + $0x6f4] ss:$24 sps:$4 sm:$0xff]   ;;  %v9705_v40 = vld [vmem:[#allocation12 + $0x6f8] ss:$24 sps:$4 sm:$0xff]  }
 0x60d   :  { %6656 = vmatprep.mubr.bf16.mxu0 %v10574_v42  ;;  %6785 = vmatprep.mubr.bf16.mxu1 %v10574_v42  ;;  %v9707_v39 = vld [vmem:[#allocation12 + $0x6fc] ss:$24 sps:$4 sm:$0xff]   ;;  %v9702_v59 = vld [vmem:[#allocation12 + $0x6f0] ss:$24 sps:$4 sm:$0xff]  }
 0x60e   :  { %v9710_v9 = vld [vmem:[#allocation12 + $0x724] ss:$24 sps:$4 sm:$0xff]  }
 0x60f   :  { %6641 = vmatpush1.bf16.msra.mxu0 %v9624_v43  ;;  %6770 = vmatpush1.bf16.msra.mxu1 %v9627_v44  ;;  %v9713_v43 = vld [vmem:[#allocation12 + $0x72c] ss:$24 sps:$4 sm:$0xff]   ;;  %v9708_v44 = vld [vmem:[#allocation12 + $0x720] ss:$24 sps:$4 sm:$0xff]  }
 0x610   :  { %6642 = vmatprep.subr.bf16.mxu0 %v9632_v45  ;;  %6771 = vmatprep.subr.bf16.mxu1 %v9635_v46  ;;  %v9711_v45 = vld [vmem:[#allocation12 + $0x728] ss:$24 sps:$4 sm:$0xff]   ;;  %v9716_v46 = vld [vmem:[#allocation12 + $0x754] ss:$24 sps:$4 sm:$0xff]  }
 0x613   :  { %6643 = vmatpush1.bf16.msra.mxu0 %v9630_v47  ;;  %6772 = vmatpush1.bf16.msra.mxu1 %v9633_v48  ;;  %v9719_v47 = vld [vmem:[#allocation12 + $0x75c] ss:$24 sps:$4 sm:$0xff]   ;;  %v9714_v48 = vld [vmem:[#allocation12 + $0x750] ss:$24 sps:$4 sm:$0xff]  }
 0x614   :  { %6644 = vmatprep.subr.bf16.mxu0 %v9638_v50  ;;  %6773 = vmatprep.subr.bf16.mxu1 %v9641_v52  ;;  %v9717_v50 = vld [vmem:[#allocation12 + $0x758] ss:$24 sps:$4 sm:$0xff]   ;;  %v9722_v52 = vld [vmem:[#allocation12 + $0x784] ss:$24 sps:$4 sm:$0xff]  }
 0x617   :  { %6645 = vmatpush1.bf16.msra.mxu0 %v9636_v53  ;;  %6774 = vmatpush1.bf16.msra.mxu1 %v9639_v55  ;;  %v9725_v53 = vld [vmem:[#allocation12 + $0x78c] ss:$24 sps:$4 sm:$0xff]   ;;  %v9720_v55 = vld [vmem:[#allocation12 + $0x780] ss:$24 sps:$4 sm:$0xff]  }
 0x618   :  { %6646 = vmatprep.subr.bf16.mxu0 %v9644_v19  ;;  %6775 = vmatprep.subr.bf16.mxu1 %v9647_v56  ;;  %v9723_v19 = vld [vmem:[#allocation12 + $0x788] ss:$24 sps:$4 sm:$0xff]   ;;  %v9728_v56 = vld [vmem:[#allocation12 + $0x7b4] ss:$24 sps:$4 sm:$0xff]  }
 0x61b   :  { %6647 = vmatpush1.bf16.msra.mxu0 %v9642_v57  ;;  %6776 = vmatpush1.bf16.msra.mxu1 %v9645_v58  ;;  %v9731_v57 = vld [vmem:[#allocation12 + $0x7bc] ss:$24 sps:$4 sm:$0xff]   ;;  %v9726_v58 = vld [vmem:[#allocation12 + $0x7b0] ss:$24 sps:$4 sm:$0xff]  }
 0x61c   :  { %6648 = vmatprep.subr.bf16.mxu0 %v9650_v60  ;;  %6777 = vmatprep.subr.bf16.mxu1 %v9653_v10  ;;  %v9729_v60 = vld [vmem:[#allocation12 + $0x7b8] ss:$24 sps:$4 sm:$0xff]   ;;  %v9734_v10 = vld [vmem:[#allocation12 + $0x7e4] ss:$24 sps:$4 sm:$0xff]  }
 0x61f   :  { %6649 = vmatpush1.bf16.msra.mxu0 %v9648_v61  ;;  %6778 = vmatpush1.bf16.msra.mxu1 %v9651_v15  ;;  %v9737_v61 = vld [vmem:[#allocation12 + $0x7ec] ss:$24 sps:$4 sm:$0xff]   ;;  %v9732_v15 = vld [vmem:[#allocation12 + $0x7e0] ss:$24 sps:$4 sm:$0xff]  }
 0x620   :  { %6650 = vmatprep.subr.bf16.mxu0 %v9656_v62  ;;  %6779 = vmatprep.subr.bf16.mxu1 %v9659_v63  ;;  %v9735_v62 = vld [vmem:[#allocation12 + $0x7e8] ss:$24 sps:$4 sm:$0xff]   ;;  %v9740_v63 = vld [vmem:[#allocation12 + $0x814] ss:$24 sps:$4 sm:$0xff]  }
 0x623   :  { %6651 = vmatpush1.bf16.msra.mxu0 %v9654_v1  ;;  %6780 = vmatpush1.bf16.msra.mxu1 %v9657_v2  ;;  %v9743_v1 = vld [vmem:[#allocation12 + $0x81c] ss:$24 sps:$4 sm:$0xff]   ;;  %v9738_v2 = vld [vmem:[#allocation12 + $0x810] ss:$24 sps:$4 sm:$0xff]  }
 0x624   :  { %6652 = vmatprep.subr.bf16.mxu0 %v9662_v11  ;;  %6781 = vmatprep.subr.bf16.mxu1 %v9665_v3  ;;  %v9741_v11 = vld [vmem:[#allocation12 + $0x818] ss:$24 sps:$4 sm:$0xff]   ;;  %v9746_v3 = vld [vmem:[#allocation12 + $0x844] ss:$24 sps:$4 sm:$0xff]  }
 0x627   :  { %6653 = vmatpush1.bf16.msra.mxu0 %v9660_v4  ;;  %6782 = vmatpush1.bf16.msra.mxu1 %v9663_v18  ;;  %v9749_v4 = vld [vmem:[#allocation12 + $0x84c] ss:$24 sps:$4 sm:$0xff]   ;;  %v9744_v18 = vld [vmem:[#allocation12 + $0x840] ss:$24 sps:$4 sm:$0xff]  }
 0x628   :  { %6654 = vmatprep.subr.bf16.mxu0 %v9668_v5  ;;  %6783 = vmatprep.subr.bf16.mxu1 %v9671_v6  ;;  %v9747_v5 = vld [vmem:[#allocation12 + $0x848] ss:$24 sps:$4 sm:$0xff]   ;;  %v9752_v6 = vld [vmem:[#allocation12 + $0x874] ss:$24 sps:$4 sm:$0xff]  }
 0x62b   :  { %6655 = vmatpush1.bf16.msra.mxu0 %v9666_v7  ;;  %6784 = vmatpush1.bf16.msra.mxu1 %v9669_v12  ;;  %v9755_v7 = vld [vmem:[#allocation12 + $0x87c] ss:$24 sps:$4 sm:$0xff]   ;;  %v9750_v12 = vld [vmem:[#allocation12 + $0x870] ss:$24 sps:$4 sm:$0xff]  }
 0x62c   :  { %6667 = vmatprep.subr.bf16.mxu0 %v9674_v14  ;;  %6796 = vmatprep.subr.bf16.mxu1 %v9677_v8  ;;  %v9753_v14 = vld [vmem:[#allocation12 + $0x878] ss:$24 sps:$4 sm:$0xff]   ;;  %v9758_v8 = vld [vmem:[#allocation12 + $0x8a4] ss:$24 sps:$4 sm:$0xff]  }
 0x62e   :  { %6657 = vmatmul.mubr.bf16.vlgmr.msra.gmra.mrb[20].mxu0 %v10572_v41  ;;  %6786 = vmatmul.mubr.bf16.vlgmr.msra.gmra.mrb[24].mxu1 %v10572_v41 }
 0x62f   :  { %6668 = vmatpush1.bf16.msra.mxu0 %v9672_v20  ;;  %6699 = vmatprep.mubr.bf16.mxu0 %v10552_v38  ;;  %v9761_v20 = vld [vmem:[#allocation12 + $0x8ac] ss:$24 sps:$4 sm:$0xff]  }
 0x630   :  { %6797 = vmatpush1.bf16.msra.mxu1 %v9675_v21  ;;  %6828 = vmatprep.mubr.bf16.mxu1 %v10552_v38  ;;  %v9756_v21 = vld [vmem:[#allocation12 + $0x8a0] ss:$24 sps:$4 sm:$0xff]  }
 0x631   :  { %6669 = vmatprep.subr.bf16.mxu0 %v9680_v22  ;;  %6798 = vmatprep.subr.bf16.mxu1 %v9683_v24  ;;  %v9759_v22 = vld [vmem:[#allocation12 + $0x8a8] ss:$24 sps:$4 sm:$0xff]   ;;  %v9764_v24 = vld [vmem:[#allocation12 + $0x8d4] ss:$24 sps:$4 sm:$0xff]  }
 0x633   :  { %6670 = vmatpush1.bf16.msra.mxu0 %v9678_v25  ;;  %v9767_v25 = vld [vmem:[#allocation12 + $0x8dc] ss:$24 sps:$4 sm:$0xff]  }
 0x634   :  { %6799 = vmatpush1.bf16.msra.mxu1 %v9681_v26  ;;  %6671 = vmatprep.subr.bf16.mxu0 %v9686_v0  ;;  %v9762_v26 = vld [vmem:[#allocation12 + $0x8d0] ss:$24 sps:$4 sm:$0xff]  }
 0x635   :  { %6800 = vmatprep.subr.bf16.mxu1 %v9689_v27  ;;  %v9765_v0 = vld [vmem:[#allocation12 + $0x8d8] ss:$24 sps:$4 sm:$0xff]   ;;  %v9770_v27 = vld [vmem:[#allocation12 + $0x14] ss:$24 sps:$4 sm:$0xff]  }
 0x637   :  { %6672 = vmatpush1.bf16.msra.mxu0 %v9684_v28  ;;  %v9768_v28 = vld [vmem:[#allocation12 + $0x10] ss:$24 sps:$4 sm:$0xff]  }
 0x638   :  { %6801 = vmatpush1.bf16.msra.mxu1 %v9687_v29  ;;  %6673 = vmatprep.subr.bf16.mxu0 %v9692_v30  ;;  %v9773_v29 = vld [vmem:[#allocation12 + $0x44] ss:$24 sps:$4 sm:$0xff]   ;;  %v9771_v30 = vld [vmem:[#allocation12 + $0x40] ss:$24 sps:$4 sm:$0xff]  }
 0x639   :  { %6802 = vmatprep.subr.bf16.mxu1 %v9695_v31  ;;  %v9776_v31 = vld [vmem:[#allocation12 + $0x74] ss:$24 sps:$4 sm:$0xff]  }
 0x63b   :  { %6674 = vmatpush1.bf16.msra.mxu0 %v9690_v32  ;;  %v9774_v32 = vld [vmem:[#allocation12 + $0x70] ss:$24 sps:$4 sm:$0xff]  }
 0x63c   :  { %6803 = vmatpush1.bf16.msra.mxu1 %v9693_v33  ;;  %6675 = vmatprep.subr.bf16.mxu0 %v9698_v34  ;;  %v9779_v33 = vld [vmem:[#allocation12 + $0xa4] ss:$24 sps:$4 sm:$0xff]   ;;  %v9777_v34 = vld [vmem:[#allocation12 + $0xa0] ss:$24 sps:$4 sm:$0xff]  }
 0x63d   :  { %6804 = vmatprep.subr.bf16.mxu1 %v9701_v35  ;;  %v9782_v35 = vld [vmem:[#allocation12 + $0xd4] ss:$24 sps:$4 sm:$0xff]  }
 0x63f   :  { %6676 = vmatpush1.bf16.msra.mxu0 %v9696_v23  ;;  %v9780_v23 = vld [vmem:[#allocation12 + $0xd0] ss:$24 sps:$4 sm:$0xff]  }
 0x640   :  { %6805 = vmatpush1.bf16.msra.mxu1 %v9699_v36  ;;  %6677 = vmatprep.subr.bf16.mxu0 %v9704_v51  ;;  %v9785_v36 = vld [vmem:[#allocation12 + $0x104] ss:$24 sps:$4 sm:$0xff]   ;;  %v9783_v51 = vld [vmem:[#allocation12 + $0x100] ss:$24 sps:$4 sm:$0xff]  }
 0x641   :  { %6806 = vmatprep.subr.bf16.mxu1 %v9707_v39  ;;  %v9788_v39 = vld [vmem:[#allocation12 + $0x134] ss:$24 sps:$4 sm:$0xff]  }
 0x643   :  { %6678 = vmatpush1.bf16.msra.mxu0 %v9702_v59  ;;  %v9791_v59 = vld [vmem:[#allocation12 + $0x164] ss:$24 sps:$4 sm:$0xff]  }
 0x644   :  { %6807 = vmatpush1.bf16.msra.mxu1 %v9705_v40  ;;  %6679 = vmatprep.subr.bf16.mxu0 %v9710_v9  ;;  %v9789_v40 = vld [vmem:[#allocation12 + $0x160] ss:$24 sps:$4 sm:$0xff]   ;;  %v9794_v9 = vld [vmem:[#allocation12 + $0x194] ss:$24 sps:$4 sm:$0xff]  }
 0x645   :  { %6808 = vmatprep.subr.bf16.mxu1 %v9713_v43  ;;  %v9792_v43 = vld [vmem:[#allocation12 + $0x190] ss:$24 sps:$4 sm:$0xff]  }
 0x647   :  { %6680 = vmatpush1.bf16.msra.mxu0 %v9708_v44  ;;  %v9797_v44 = vld [vmem:[#allocation12 + $0x1c4] ss:$24 sps:$4 sm:$0xff]  }
 0x648   :  { %6809 = vmatpush1.bf16.msra.mxu1 %v9711_v45  ;;  %6681 = vmatprep.subr.bf16.mxu0 %v9716_v46  ;;  %v9795_v45 = vld [vmem:[#allocation12 + $0x1c0] ss:$24 sps:$4 sm:$0xff]   ;;  %v9800_v46 = vld [vmem:[#allocation12 + $0x1f4] ss:$24 sps:$4 sm:$0xff]  }
 0x649   :  { %6810 = vmatprep.subr.bf16.mxu1 %v9719_v47  ;;  %v9798_v47 = vld [vmem:[#allocation12 + $0x1f0] ss:$24 sps:$4 sm:$0xff]  }
 0x64b   :  { %6682 = vmatpush1.bf16.msra.mxu0 %v9714_v48  ;;  %v9803_v48 = vld [vmem:[#allocation12 + $0x224] ss:$24 sps:$4 sm:$0xff]  }
 0x64c   :  { %6811 = vmatpush1.bf16.msra.mxu1 %v9717_v50  ;;  %6683 = vmatprep.subr.bf16.mxu0 %v9722_v52  ;;  %v9801_v50 = vld [vmem:[#allocation12 + $0x220] ss:$24 sps:$4 sm:$0xff]   ;;  %v9806_v52 = vld [vmem:[#allocation12 + $0x254] ss:$24 sps:$4 sm:$0xff]  }
 0x64d   :  { %6812 = vmatprep.subr.bf16.mxu1 %v9725_v53  ;;  %v9804_v53 = vld [vmem:[#allocation12 + $0x250] ss:$24 sps:$4 sm:$0xff]  }
 0x64f   :  { %6684 = vmatpush1.bf16.msra.mxu0 %v9720_v55  ;;  %v9809_v55 = vld [vmem:[#allocation12 + $0x284] ss:$24 sps:$4 sm:$0xff]  }
 0x650   :  { %6813 = vmatpush1.bf16.msra.mxu1 %v9723_v19  ;;  %6685 = vmatprep.subr.bf16.mxu0 %v9728_v56  ;;  %v9807_v19 = vld [vmem:[#allocation12 + $0x280] ss:$24 sps:$4 sm:$0xff]   ;;  %v9812_v56 = vld [vmem:[#allocation12 + $0x2b4] ss:$24 sps:$4 sm:$0xff]  }
 0x651   :  { %6814 = vmatprep.subr.bf16.mxu1 %v9731_v57  ;;  %v9810_v57 = vld [vmem:[#allocation12 + $0x2b0] ss:$24 sps:$4 sm:$0xff]  }
 0x653   :  { %6686 = vmatpush1.bf16.msra.mxu0 %v9726_v58  ;;  %v9815_v58 = vld [vmem:[#allocation12 + $0x2e4] ss:$24 sps:$4 sm:$0xff]  }
 0x654   :  { %6815 = vmatpush1.bf16.msra.mxu1 %v9729_v60  ;;  %6687 = vmatprep.subr.bf16.mxu0 %v9734_v10  ;;  %v9813_v60 = vld [vmem:[#allocation12 + $0x2e0] ss:$24 sps:$4 sm:$0xff]   ;;  %v9818_v10 = vld [vmem:[#allocation12 + $0x314] ss:$24 sps:$4 sm:$0xff]  }
 0x655   :  { %6816 = vmatprep.subr.bf16.mxu1 %v9737_v61  ;;  %v9912_v61 = vld [vmem:[#allocation13 + $0x40] sm:$0xff]  }
 0x657   :  { %6688 = vmatpush1.bf16.msra.mxu0 %v9732_v15  ;;  %v9816_v15 = vld [vmem:[#allocation12 + $0x310] ss:$24 sps:$4 sm:$0xff]  }
 0x658   :  { %6817 = vmatpush1.bf16.msra.mxu1 %v9735_v62  ;;  %6689 = vmatprep.subr.bf16.mxu0 %v9740_v63  ;;  %v9913_v62 = vld [vmem:[#allocation13] sm:$0xff]  }
 0x659   :  { %6818 = vmatprep.subr.bf16.mxu1 %v9743_v1  ;;  %v9821_v63 = vld [vmem:[#allocation12 + $0x344] ss:$24 sps:$4 sm:$0xff]   ;;  %v9914_v1 = vld [vmem:[#allocation13 + $0x48] sm:$0xff]  }
 0x65b   :  { %6690 = vmatpush1.bf16.msra.mxu0 %v9738_v2  ;;  %v9915_v2 = vld [vmem:[#allocation13 + $0x8] sm:$0xff]  }
 0x65c   :  { %6819 = vmatpush1.bf16.msra.mxu1 %v9741_v11  ;;  %6691 = vmatprep.subr.bf16.mxu0 %v9746_v3  ;;  %v9916_v11 = vld [vmem:[#allocation13 + $0x50] sm:$0xff]   ;;  %v9819_v3 = vld [vmem:[#allocation12 + $0x340] ss:$24 sps:$4 sm:$0xff]  }
 0x65d   :  { %6820 = vmatprep.subr.bf16.mxu1 %v9749_v4  ;;  %v9824_v4 = vld [vmem:[#allocation12 + $0x374] ss:$24 sps:$4 sm:$0xff]  }
 0x65f   :  { %6692 = vmatpush1.bf16.msra.mxu0 %v9744_v18  ;;  %v9917_v18 = vld [vmem:[#allocation13 + $0x10] sm:$0xff]  }
 0x660   :  { %6821 = vmatpush1.bf16.msra.mxu1 %v9747_v5  ;;  %6693 = vmatprep.subr.bf16.mxu0 %v9752_v6  ;;  %v9918_v5 = vld [vmem:[#allocation13 + $0x58] sm:$0xff]   ;;  %v9822_v6 = vld [vmem:[#allocation12 + $0x370] ss:$24 sps:$4 sm:$0xff]  }
 0x661   :  { %6822 = vmatprep.subr.bf16.mxu1 %v9755_v7  ;;  %v9827_v7 = vld [vmem:[#allocation12 + $0x3a4] ss:$24 sps:$4 sm:$0xff]  }
 0x663   :  { %6694 = vmatpush1.bf16.msra.mxu0 %v9750_v12  ;;  %v9920_v12 = vld [vmem:[#allocation13 + $0x60] sm:$0xff]  }
 0x664   :  { %6823 = vmatpush1.bf16.msra.mxu1 %v9753_v14  ;;  %6695 = vmatprep.subr.bf16.mxu0 %v9758_v8  ;;  %v9825_v14 = vld [vmem:[#allocation12 + $0x3a0] ss:$24 sps:$4 sm:$0xff]  }
 0x665   :  { %6824 = vmatprep.subr.bf16.mxu1 %v9761_v20  ;;  %v9921_v8 = vld [vmem:[#allocation13 + $0x20] sm:$0xff]   ;;  %v9922_v20 = vld [vmem:[#allocation13 + $0x68] sm:$0xff]  }
 0x667   :  { %6696 = vmatpush1.bf16.msra.mxu0 %v9756_v21  ;;  %v9828_v21 = vld [vmem:[#allocation12 + $0x3d0] ss:$24 sps:$4 sm:$0xff]  }
 0x668   :  { %6825 = vmatpush1.bf16.msra.mxu1 %v9759_v22  ;;  %6697 = vmatprep.subr.bf16.mxu0 %v9764_v24  ;;  %v9833_v22 = vld [vmem:[#allocation12 + $0x404] ss:$24 sps:$4 sm:$0xff]   ;;  %v9923_v24 = vld [vmem:[#allocation13 + $0x28] sm:$0xff]  }
 0x669   :  { %6826 = vmatprep.subr.bf16.mxu1 %v9767_v25  ;;  %v9831_v25 = vld [vmem:[#allocation12 + $0x400] ss:$24 sps:$4 sm:$0xff]  }
 0x66b   :  { %6698 = vmatpush1.bf16.msra.mxu0 %v9762_v26  ;;  %v9836_v26 = vld [vmem:[#allocation12 + $0x434] ss:$24 sps:$4 sm:$0xff]  }
 0x66c   :  { %6827 = vmatpush1.bf16.msra.mxu1 %v9765_v0  ;;  %6839 = vmatprep.subr.bf16.mxu0 %v9770_v27  ;;  %v9924_v0 = vld [vmem:[#allocation13 + $0x70] sm:$0xff]  }
 0x66d   :  { %8426 = vmatprep.subr.bf16.mxu1 %v9912_v61  ;;  %v9834_v27 = vld [vmem:[#allocation12 + $0x430] ss:$24 sps:$4 sm:$0xff]   ;;  %v9881_v61 = vld [vmem:[#allocation12 + $0x704] ss:$24 sps:$4 sm:$0xff]  }
 0x66e   :  { %6700 = vmatmul.mubr.bf16.vlgmr.msra.gmra.mrb[20].mxu0 %v10550_v37 }
 0x66f   :  { %6829 = vmatmul.mubr.bf16.vlgmr.msra.gmra.mrb[24].mxu1 %v10550_v37  ;;  %6840 = vmatpush1.bf16.msra.mxu0 %v9768_v28  ;;  %v9925_v28 = vld [vmem:[#allocation13 + $0x30] sm:$0xff]  }
 0x670   :  { %6871 = vmatprep.mubr.bf16.mxu0 %v10558_v16  ;;  %6841 = vmatprep.subr.bf16.mxu0 %v9773_v29  ;;  %v9786_v16 = vld [vmem:[#allocation12 + $0x130] ss:$24 sps:$4 sm:$0xff]   ;;  %v9839_v29 = vld [vmem:[#allocation12 + $0x464] ss:$24 sps:$4 sm:$0xff]  }
 0x671   :  { %8427 = vmatpush3.bf16.msra.mxu1 %v9913_v62  ;;  %v9887_v62 = vld [vmem:[#allocation12 + $0x764] ss:$24 sps:$4 sm:$0xff]  }
 0x672   :  { %8428 = vmatprep.subr.bf16.mxu1 %v9914_v1  ;;  %v9890_v1 = vld [vmem:[#allocation12 + $0x794] ss:$24 sps:$4 sm:$0xff]  }
 0x673   :  { %6842 = vmatpush1.bf16.msra.mxu0 %v9771_v30  ;;  %v9926_v30 = vld [vmem:[#allocation13 + $0x78] sm:$0xff]  }
 0x674   :  { %6843 = vmatprep.subr.bf16.mxu0 %v9776_v31  ;;  %v9837_v31 = vld [vmem:[#allocation12 + $0x460] ss:$24 sps:$4 sm:$0xff]  }
 0x675   :  { %8429 = vmatpush3.bf16.msra.mxu1 %v9915_v2  ;;  %v9888_v2 = vld [vmem:[#allocation12 + $0x790] ss:$24 sps:$4 sm:$0xff]  }
 0x676   :  { %8430 = vmatprep.subr.bf16.mxu1 %v9916_v11  ;;  %v9893_v11 = vld [vmem:[#allocation12 + $0x7c4] ss:$24 sps:$4 sm:$0xff]  }
 0x677   :  { %6844 = vmatpush1.bf16.msra.mxu0 %v9774_v32  ;;  %v9927_v32 = vld [vmem:[#allocation13 + $0x38] sm:$0xff]  }
 0x678   :  { %6845 = vmatprep.subr.bf16.mxu0 %v9779_v33  ;;  %v9842_v33 = vld [vmem:[#allocation12 + $0x494] ss:$24 sps:$4 sm:$0xff]  }
 0x679   :  { %8431 = vmatpush3.bf16.msra.mxu1 %v9917_v18  ;;  %v9894_v18 = vld [vmem:[#allocation12 + $0x7f0] ss:$24 sps:$4 sm:$0xff]  }
 0x67a   :  { %8432 = vmatprep.subr.bf16.mxu1 %v9918_v5  ;;  %v9899_v5 = vld [vmem:[#allocation12 + $0x824] ss:$24 sps:$4 sm:$0xff]  }
 0x67b   :  { %6846 = vmatpush1.bf16.msra.mxu0 %v9777_v34  ;;  %v9928_v34 = vld [vmem:[#allocation13 + $0xc0] sm:$0xff]  }
 0x67c   :  { %6847 = vmatprep.subr.bf16.mxu0 %v9782_v35  ;;  %v9840_v35 = vld [vmem:[#allocation12 + $0x490] ss:$24 sps:$4 sm:$0xff]  }
 0x67f   :  { %6848 = vmatpush1.bf16.msra.mxu0 %v9780_v23  ;;  %v9845_v23 = vld [vmem:[#allocation12 + $0x4c4] ss:$24 sps:$4 sm:$0xff]  }
 0x680   :  { %6849 = vmatprep.subr.bf16.mxu0 %v9785_v36  ;;  %v9843_v36 = vld [vmem:[#allocation12 + $0x4c0] ss:$24 sps:$4 sm:$0xff]  }
 0x683   :  { %6850 = vmatpush1.bf16.msra.mxu0 %v9783_v51  ;;  %v9848_v51 = vld [vmem:[#allocation12 + $0x4f4] ss:$24 sps:$4 sm:$0xff]  }
 0x684   :  { %6851 = vmatprep.subr.bf16.mxu0 %v9788_v39  ;;  %v9846_v39 = vld [vmem:[#allocation12 + $0x4f0] ss:$24 sps:$4 sm:$0xff]  }
 0x687   :  { %6852 = vmatpush1.bf16.msra.mxu0 %v9786_v16  ;;  %v9851_v16 = vld [vmem:[#allocation12 + $0x524] ss:$24 sps:$4 sm:$0xff]  }
 0x688   :  { %6853 = vmatprep.subr.bf16.mxu0 %v9791_v59  ;;  %v9849_v59 = vld [vmem:[#allocation12 + $0x520] ss:$24 sps:$4 sm:$0xff]  }
 0x68b   :  { %6854 = vmatpush1.bf16.msra.mxu0 %v9789_v40  ;;  %v9854_v40 = vld [vmem:[#allocation12 + $0x554] ss:$24 sps:$4 sm:$0xff]  }
 0x68c   :  { %6855 = vmatprep.subr.bf16.mxu0 %v9794_v9  ;;  %v9852_v9 = vld [vmem:[#allocation12 + $0x550] ss:$24 sps:$4 sm:$0xff]  }
 0x68f   :  { %6856 = vmatpush1.bf16.msra.mxu0 %v9792_v43  ;;  %v9857_v43 = vld [vmem:[#allocation12 + $0x584] ss:$24 sps:$4 sm:$0xff]  }
 0x690   :  { %6857 = vmatprep.subr.bf16.mxu0 %v9797_v44  ;;  %v9855_v44 = vld [vmem:[#allocation12 + $0x580] ss:$24 sps:$4 sm:$0xff]  }
 0x693   :  { %6858 = vmatpush1.bf16.msra.mxu0 %v9795_v45  ;;  %v9860_v45 = vld [vmem:[#allocation12 + $0x5b4] ss:$24 sps:$4 sm:$0xff]  }
 0x694   :  { %6859 = vmatprep.subr.bf16.mxu0 %v9800_v46  ;;  %v9858_v46 = vld [vmem:[#allocation12 + $0x5b0] ss:$24 sps:$4 sm:$0xff]  }
 0x697   :  { %6860 = vmatpush1.bf16.msra.mxu0 %v9798_v47  ;;  %v9863_v47 = vld [vmem:[#allocation12 + $0x5e4] ss:$24 sps:$4 sm:$0xff]  }
 0x698   :  { %6861 = vmatprep.subr.bf16.mxu0 %v9803_v48  ;;  %v9861_v48 = vld [vmem:[#allocation12 + $0x5e0] ss:$24 sps:$4 sm:$0xff]  }
 0x69b   :  { %6862 = vmatpush1.bf16.msra.mxu0 %v9801_v50  ;;  %v9866_v50 = vld [vmem:[#allocation12 + $0x614] ss:$24 sps:$4 sm:$0xff]  }
 0x69c   :  { %6863 = vmatprep.subr.bf16.mxu0 %v9806_v52  ;;  %v9864_v52 = vld [vmem:[#allocation12 + $0x610] ss:$24 sps:$4 sm:$0xff]  }
 0x69f   :  { %6864 = vmatpush1.bf16.msra.mxu0 %v9804_v53  ;;  %v9869_v53 = vld [vmem:[#allocation12 + $0x644] ss:$24 sps:$4 sm:$0xff]  }
 0x6a0   :  { %6865 = vmatprep.subr.bf16.mxu0 %v9809_v55  ;;  %v9867_v55 = vld [vmem:[#allocation12 + $0x640] ss:$24 sps:$4 sm:$0xff]  }
 0x6a3   :  { %6866 = vmatpush1.bf16.msra.mxu0 %v9807_v19  ;;  %v9872_v19 = vld [vmem:[#allocation12 + $0x674] ss:$24 sps:$4 sm:$0xff]  }
 0x6a4   :  { %6867 = vmatprep.subr.bf16.mxu0 %v9812_v56  ;;  %v9870_v56 = vld [vmem:[#allocation12 + $0x670] ss:$24 sps:$4 sm:$0xff]  }
 0x6a7   :  { %6868 = vmatpush1.bf16.msra.mxu0 %v9810_v57  ;;  %v9875_v57 = vld [vmem:[#allocation12 + $0x6a4] ss:$24 sps:$4 sm:$0xff]  }
 0x6a8   :  { %6869 = vmatprep.subr.bf16.mxu0 %v9815_v58  ;;  %v9873_v58 = vld [vmem:[#allocation12 + $0x6a0] ss:$24 sps:$4 sm:$0xff]  }
 0x6ab   :  { %6870 = vmatpush1.bf16.msra.mxu0 %v9813_v60  ;;  %v9878_v60 = vld [vmem:[#allocation12 + $0x6d4] ss:$24 sps:$4 sm:$0xff]  }
 0x6ac   :  { %6882 = vmatprep.subr.bf16.mxu0 %v9818_v10  ;;  %v9876_v10 = vld [vmem:[#allocation12 + $0x6d0] ss:$24 sps:$4 sm:$0xff]  }
 0x6ae   :  { %6872 = vmatmul.mubr.bf16.vlgmr.msra.gmra.mrb[24].mxu0 %v10556_v54  ;;  %v9919_v54 = vld [vmem:[#allocation13 + $0x18] sm:$0xff]  }
 0x6af   :  { %6883 = vmatpush1.bf16.msra.mxu0 %v9816_v15  ;;  %6914 = vmatprep.mubr.bf16.mxu0 %v10574_v42  ;;  %v9830_v42 = vld [vmem:[#allocation12 + $0x3d4] ss:$24 sps:$4 sm:$0xff]  }
 0x6b0   :  { %6884 = vmatprep.subr.bf16.mxu0 %v9821_v63  ;;  %8433 = vmatpush3.bf16.msra.mxu1 %v9919_v54  ;;  %v9884_v15 = vld [vmem:[#allocation12 + $0x734] ss:$24 sps:$4 sm:$0xff]   ;;  %v9885_v63 = vld [vmem:[#allocation12 + $0x760] ss:$24 sps:$4 sm:$0xff]   ;;  %v9900_v54 = vld [vmem:[#allocation12 + $0x850] ss:$24 sps:$4 sm:$0xff]  }
 0x6b1   :  { %8434 = vmatprep.subr.bf16.mxu1 %v9920_v12  ;;  %v9905_v12 = vld [vmem:[#allocation12 + $0x884] ss:$24 sps:$4 sm:$0xff]  }
 0x6b3   :  { %6885 = vmatpush1.bf16.msra.mxu0 %v9819_v3  ;;  %v9891_v3 = vld [vmem:[#allocation12 + $0x7c0] ss:$24 sps:$4 sm:$0xff]  }
 0x6b4   :  { %6886 = vmatprep.subr.bf16.mxu0 %v9824_v4  ;;  %8435 = vmatpush3.bf16.msra.mxu1 %v9921_v8  ;;  %v9896_v4 = vld [vmem:[#allocation12 + $0x7f4] ss:$24 sps:$4 sm:$0xff]   ;;  %v9906_v8 = vld [vmem:[#allocation12 + $0x8b0] ss:$24 sps:$4 sm:$0xff]  }
 0x6b5   :  { %8436 = vmatprep.subr.bf16.mxu1 %v9922_v20  ;;  %v9911_v20 = vld [vmem:[#allocation12 + $0x8e4] ss:$24 sps:$4 sm:$0xff]  }
 0x6b7   :  { %6887 = vmatpush1.bf16.msra.mxu0 %v9822_v6  ;;  %v9897_v6 = vld [vmem:[#allocation12 + $0x820] ss:$24 sps:$4 sm:$0xff]  }
 0x6b8   :  { %6888 = vmatprep.subr.bf16.mxu0 %v9827_v7  ;;  %8437 = vmatpush3.bf16.msra.mxu1 %v9923_v24  ;;  %v9902_v7 = vld [vmem:[#allocation12 + $0x854] ss:$24 sps:$4 sm:$0xff]   ;;  %v10593_v24 = vld [vmem:[#allocation15] sm:$0xff] }
 0x6b9   :  { %8438 = vmatprep.subr.bf16.mxu1 %v9924_v0  ;;  %v9979_v0 = vld [vmem:[#allocation15 + $0x8] sm:$0xff] }
 0x6bb   :  { %6889 = vmatpush1.bf16.msra.mxu0 %v9825_v14  ;;  %v9903_v14 = vld [vmem:[#allocation12 + $0x880] ss:$24 sps:$4 sm:$0xff]  }
 0x6bc   :  { %6890 = vmatprep.subr.bf16.mxu0 %v9830_v42  ;;  %8439 = vmatpush3.bf16.msra.mxu1 %v9925_v28  ;;  %v9908_v42 = vld [vmem:[#allocation12 + $0x8b4] ss:$24 sps:$4 sm:$0xff]  }
 0x6bd   :  { %8440 = vmatprep.subr.bf16.mxu1 %v9926_v30 }
 0x6bf   :  { %6891 = vmatpush1.bf16.msra.mxu0 %v9828_v21  ;;  %v9909_v21 = vld [vmem:[#allocation12 + $0x8e0] ss:$24 sps:$4 sm:$0xff]  }
 0x6c0   :  { %6892 = vmatprep.subr.bf16.mxu0 %v9833_v22  ;;  %8441 = vmatpush3.bf16.msra.mxu1 %v9927_v32  ;;  %v10591_v22 = vsub.s32 3, %v10443_v49 }
 0x6c1   :  { %8448 = vmatprep.subr.bf16.mxu1 %v9928_v34 }
 0x6c2   :  { %v5132_v28 = vrot.slane %v10568_v17, %v10591_v22 }
 0x6c3   :  { %6893 = vmatpush1.bf16.msra.mxu0 %v9831_v25  ;;  %v5120_v25 = vrot.slane %v10593_v24, %v10591_v22 }
 0x6c4   :  { %6894 = vmatprep.subr.bf16.mxu0 %v9836_v26  ;;  %v5128_v26 = vrot.slane %v10564_v13, %v10591_v22 }
 0x6c7   :  { %6895 = vmatpush1.bf16.msra.mxu0 %v9834_v27  ;;  %v5124_v27 = vrot.slane %v9979_v0, %v10591_v22  ;;  %v9959_v0 = vld [vmem:[#allocation13 + $0x138] sm:$0xff]  }
 0x6c8   :  { %6896 = vmatprep.subr.bf16.mxu0 %v9839_v29 }
 0x6cb   :  { %6897 = vmatpush1.bf16.msra.mxu0 %v9837_v31 }
 0x6cc   :  { %6898 = vmatprep.subr.bf16.mxu0 %v9842_v33 }
 0x6cf   :  { %6899 = vmatpush1.bf16.msra.mxu0 %v9840_v35 }
 0x6d0   :  { %6900 = vmatprep.subr.bf16.mxu0 %v9845_v23 }
 0x6d3   :  { %6901 = vmatpush1.bf16.msra.mxu0 %v9843_v36 }
 0x6d4   :  { %6902 = vmatprep.subr.bf16.mxu0 %v9848_v51 }
 0x6d7   :  { %6903 = vmatpush1.bf16.msra.mxu0 %v9846_v39 }
 0x6d8   :  { %6904 = vmatprep.subr.bf16.mxu0 %v9851_v16 }
 0x6db   :  { %6905 = vmatpush1.bf16.msra.mxu0 %v9849_v59 }
 0x6dc   :  { %6906 = vmatprep.subr.bf16.mxu0 %v9854_v40 }
 0x6df   :  { %6907 = vmatpush1.bf16.msra.mxu0 %v9852_v9 }
 0x6e0   :  { %6908 = vmatprep.subr.bf16.mxu0 %v9857_v43 }
 0x6e3   :  { %6909 = vmatpush1.bf16.msra.mxu0 %v9855_v44 }
 0x6e4   :  { %6910 = vmatprep.subr.bf16.mxu0 %v9860_v45 }
 0x6e7   :  { %6911 = vmatpush1.bf16.msra.mxu0 %v9858_v46 }
 0x6e8   :  { %6912 = vmatprep.subr.bf16.mxu0 %v9863_v47 }
 0x6eb   :  { %6913 = vmatpush1.bf16.msra.mxu0 %v9861_v48 }
 0x6ec   :  { %6925 = vmatprep.subr.bf16.mxu0 %v9866_v50 }
 0x6ee   :  { %6915 = vmatmul.mubr.bf16.vlgmr.msra.gmra.mrb[24].mxu0 %v10572_v41  ;;  %v9879_v41 = vld [vmem:[#allocation12 + $0x700] ss:$24 sps:$4 sm:$0xff]  }
 0x6ef   :  { %6926 = vmatpush1.bf16.msra.mxu0 %v9864_v52  ;;  %6957 = vmatprep.mubr.bf16.mxu0 %v10552_v38  ;;  %v9882_v38 = vld [vmem:[#allocation12 + $0x730] ss:$24 sps:$4 sm:$0xff]  }
 0x6f0   :  { %6927 = vmatprep.subr.bf16.mxu0 %v9869_v53 }
 0x6f3   :  { %6928 = vmatpush1.bf16.msra.mxu0 %v9867_v55  ;;  %v9929_v55 = vld [vmem:[#allocation13 + $0x80] sm:$0xff]  }
 0x6f4   :  { %6929 = vmatprep.subr.bf16.mxu0 %v9872_v19 }
 0x6f7   :  { %6930 = vmatpush1.bf16.msra.mxu0 %v9870_v56  ;;  %v9930_v56 = vld [vmem:[#allocation13 + $0xc8] sm:$0xff]  }
 0x6f8   :  { %6931 = vmatprep.subr.bf16.mxu0 %v9875_v57  ;;  %v9931_v57 = vld [vmem:[#allocation13 + $0x88] sm:$0xff]  }
 0x6fb   :  { %6932 = vmatpush1.bf16.msra.mxu0 %v9873_v58  ;;  %v9932_v58 = vld [vmem:[#allocation13 + $0xd0] sm:$0xff]  }
 0x6fc   :  { %6933 = vmatprep.subr.bf16.mxu0 %v9878_v60  ;;  %v9933_v60 = vld [vmem:[#allocation13 + $0x90] sm:$0xff]  }
 0x6ff   :  { %6934 = vmatpush1.bf16.msra.mxu0 %v9876_v10  ;;  %v9934_v10 = vld [vmem:[#allocation13 + $0xd8] sm:$0xff]  }
 0x700   :  { %6935 = vmatprep.subr.bf16.mxu0 %v9881_v61  ;;  %v9935_v61 = vld [vmem:[#allocation13 + $0x98] sm:$0xff]  }
 0x703   :  { %6936 = vmatpush1.bf16.msra.mxu0 %v9879_v41  ;;  %v9936_v41 = vld [vmem:[#allocation13 + $0xe0] sm:$0xff]  }
 0x704   :  { %6937 = vmatprep.subr.bf16.mxu0 %v9884_v15  ;;  %v9937_v15 = vld [vmem:[#allocation13 + $0xa0] sm:$0xff]  }
 0x707   :  { %6938 = vmatpush1.bf16.msra.mxu0 %v9882_v38  ;;  %v9938_v38 = vld [vmem:[#allocation13 + $0xe8] sm:$0xff]  }
 0x708   :  { %6939 = vmatprep.subr.bf16.mxu0 %v9887_v62  ;;  %v9939_v62 = vld [vmem:[#allocation13 + $0xa8] sm:$0xff]  }
 0x70b   :  { %6940 = vmatpush1.bf16.msra.mxu0 %v9885_v63  ;;  %v9940_v63 = vld [vmem:[#allocation13 + $0xf0] sm:$0xff]  }
 0x70c   :  { %6941 = vmatprep.subr.bf16.mxu0 %v9890_v1  ;;  %v9941_v1 = vld [vmem:[#allocation13 + $0xb0] sm:$0xff]  }
 0x70f   :  { %6942 = vmatpush1.bf16.msra.mxu0 %v9888_v2  ;;  %v9942_v2 = vld [vmem:[#allocation13 + $0xf8] sm:$0xff]  }
 0x710   :  { %6943 = vmatprep.subr.bf16.mxu0 %v9893_v11  ;;  %v9943_v11 = vld [vmem:[#allocation13 + $0xb8] sm:$0xff]  }
 0x713   :  { %6944 = vmatpush1.bf16.msra.mxu0 %v9891_v3  ;;  %v9944_v3 = vld [vmem:[#allocation13 + $0x140] sm:$0xff]  }
 0x714   :  { %6945 = vmatprep.subr.bf16.mxu0 %v9896_v4  ;;  %v9945_v4 = vld [vmem:[#allocation13 + $0x100] sm:$0xff]  }
 0x717   :  { %6946 = vmatpush1.bf16.msra.mxu0 %v9894_v18  ;;  %v9946_v18 = vld [vmem:[#allocation13 + $0x148] sm:$0xff]  }
 0x718   :  { %6947 = vmatprep.subr.bf16.mxu0 %v9899_v5  ;;  %v9947_v5 = vld [vmem:[#allocation13 + $0x108] sm:$0xff]  }
 0x71b   :  { %6948 = vmatpush1.bf16.msra.mxu0 %v9897_v6  ;;  %v9948_v6 = vld [vmem:[#allocation13 + $0x150] sm:$0xff]  }
 0x71c   :  { %6949 = vmatprep.subr.bf16.mxu0 %v9902_v7  ;;  %v9949_v7 = vld [vmem:[#allocation13 + $0x110] sm:$0xff]  }
 0x71f   :  { %6950 = vmatpush1.bf16.msra.mxu0 %v9900_v54  ;;  %v9950_v54 = vld [vmem:[#allocation13 + $0x158] sm:$0xff]  }
 0x720   :  { %6951 = vmatprep.subr.bf16.mxu0 %v9905_v12  ;;  %v9951_v12 = vld [vmem:[#allocation13 + $0x118] sm:$0xff]  }
 0x723   :  { %6952 = vmatpush1.bf16.msra.mxu0 %v9903_v14  ;;  %v9952_v14 = vld [vmem:[#allocation13 + $0x160] sm:$0xff]  }
 0x724   :  { %6953 = vmatprep.subr.bf16.mxu0 %v9908_v42  ;;  %v9953_v42 = vld [vmem:[#allocation13 + $0x120] sm:$0xff]  }
 0x727   :  { %6954 = vmatpush1.bf16.msra.mxu0 %v9906_v8  ;;  %v9954_v8 = vld [vmem:[#allocation13 + $0x168] sm:$0xff]  }
 0x728   :  { %6955 = vmatprep.subr.bf16.mxu0 %v9911_v20  ;;  %v9955_v20 = vld [vmem:[#allocation13 + $0x128] sm:$0xff]  }
 0x72b   :  { %6956 = vmatpush1.bf16.msra.mxu0 %v9909_v21  ;;  %v9956_v21 = vld [vmem:[#allocation13 + $0x170] sm:$0xff]  }
 0x72e   :  { %6958 = vmatmul.mubr.bf16.vlgmr.msra.gmra.mrb[24].mxu0 %v10550_v37 }
 0x741   :  { %v6701_v29 = vpop.f32.mrb[20].mxu0 }
 0x742   :  { %v8512_v30 = vadd.f32 %v6701_v29, %v5120_v25  ;;  %v6830_v37 = vpop.f32.mrb[24].mxu1  ;;  %v6703_v31 = vpop.f32.mrb[21].mxu0  ;;  %v9981_v29 = vld [vmem:[#allocation15 + $0x28] sm:$0xff] }
 0x743   :  { %v8516_v32 = vadd.f32 %v6830_v37, %v5128_v26  ;;  %v8513_v33 = vadd.f32 %v6703_v31, %v5124_v27  ;;  %v6832_v34 = vpop.f32.mrb[25].mxu1  ;;  %v6705_v35 = vpop.f32.mrb[22].mxu0 }
 0x744   :  { %v8517_v23 = vadd.f32 %v6832_v34, %v5132_v28  ;;  %v8514_v36 = vadd.f32 %v6705_v35, %v5120_v25  ;;  %v6834_v51 = vpop.f32.mrb[26].mxu1  ;;  %v6707_v39 = vpop.f32.mrb[23].mxu0  ;;  %v6968_v40 = vmax.f32 %v8512_v30, 0.0  ;;  %v9957_v25 = vld [vmem:[#allocation13 + $0x130] sm:$0xff]   ;;  %v5140_v30 = vrot.slane %v9981_v29, %v10591_v22 }
 0x745   :  { %v8518_v16 = vadd.f32 %v6834_v51, %v5128_v26  ;;  %v8515_v13 = vadd.f32 %v6707_v39, %v5124_v27  ;;  %v6836_v59 = vpop.f32.mrb[27].mxu1  ;;  %v6970_v44 = vmax.f32 %v8516_v32, 0.0  ;;  %v6969_v17 = vmax.f32 %v8513_v33, 0.0  ;;  %v9958_v26 = vld [vmem:[#allocation13 + $0x178] sm:$0xff]   ;;  %v9980_v27 = vld [vmem:[#allocation15 + $0x20] sm:$0xff] }
 0x746   :  { %v6974_v9 = vmax.f32 %v8514_v36, 0.0  ;;  %v8519_v43 = vadd.f32 %v6836_v59, %v5132_v28  ;;  %v6971_v47 = vmax.f32 %v8517_v23, 0.0  ;;  %v5136_v28 = vrot.slane %v9980_v27, %v10591_v22 }
 0x747   :  { %v6976_v45 = vmax.f32 %v8518_v16, 0.0  ;;  %v6975_v46 = vmax.f32 %v8515_v13, 0.0 }
 0x748   :  { %v6980_v48 = vpack.c.bf16 %v6974_v9, %v6968_v40  ;;  %v6977_v50 = vmax.f32 %v8519_v43, 0.0 }
 0x749   :  { %v6982_v52 = vpack.c.bf16 %v6976_v45, %v6970_v44  ;;  %v6981_v53 = vpack.c.bf16 %v6975_v46, %v6969_v17  ;;  %v7084_v46 = vsub.s32 5, %v10443_v49 }
 0x74a   :  { %v6983_v19 = vpack.c.bf16 %v6977_v50, %v6971_v47 }
 0x74b   :  { %7406 = vmatprep.mubr.bf16.mxu1 %v6981_v53  ;;  %v7085_v47 = vrot.slane %v10593_v24, %v7084_v46 }
 0x74c   :  { %7407 = vmatmul.mubr.bf16.vlgmr.msra.gmra.mrb[28].mxu1 %v6980_v48 }
 0x74d   :  { %8449 = vmatpush3.bf16.msra.mxu1 %v9929_v55  ;;  %7447 = vmatprep.mubr.bf16.mxu1 %v6983_v19 }
 0x74e   :  { %8450 = vmatprep.subr.bf16.mxu1 %v9930_v56 }
 0x751   :  { %8451 = vmatpush3.bf16.msra.mxu1 %v9931_v57 }
 0x752   :  { %8452 = vmatprep.subr.bf16.mxu1 %v9932_v58 }
 0x755   :  { %8453 = vmatpush3.bf16.msra.mxu1 %v9933_v60 }
 0x756   :  { %8454 = vmatprep.subr.bf16.mxu1 %v9934_v10 }
 0x759   :  { %8455 = vmatpush3.bf16.msra.mxu1 %v9935_v61 }
 0x75a   :  { %8456 = vmatprep.subr.bf16.mxu1 %v9936_v41 }
 0x75d   :  { %8457 = vmatpush3.bf16.msra.mxu1 %v9937_v15 }
 0x75e   :  { %8458 = vmatprep.subr.bf16.mxu1 %v9938_v38 }
 0x761   :  { %8459 = vmatpush3.bf16.msra.mxu1 %v9939_v62 }
 0x762   :  { %8460 = vmatprep.subr.bf16.mxu1 %v9940_v63 }
 0x765   :  { %8461 = vmatpush3.bf16.msra.mxu1 %v9941_v1 }
 0x766   :  { %8462 = vmatprep.subr.bf16.mxu1 %v9942_v2 }
 0x769   :  { %8463 = vmatpush3.bf16.msra.mxu1 %v9943_v11 }
 0x76a   :  { %8470 = vmatprep.subr.bf16.mxu1 %v9944_v3 }
 0x76c   :  { %7448 = vmatmul.mubr.bf16.vlgmr.msra.gmra.mrb[32].mxu1 %v6982_v52 }
 0x76d   :  { %8471 = vmatpush3.bf16.msra.mxu1 %v9945_v4 }
 0x76e   :  { %8472 = vmatprep.subr.bf16.mxu1 %v9946_v18 }
 0x771   :  { %8473 = vmatpush3.bf16.msra.mxu1 %v9947_v5 }
 0x772   :  { %8474 = vmatprep.subr.bf16.mxu1 %v9948_v6 }
 0x775   :  { %8475 = vmatpush3.bf16.msra.mxu1 %v9949_v7 }
 0x776   :  { %8476 = vmatprep.subr.bf16.mxu1 %v9950_v54 }
 0x779   :  { %8477 = vmatpush3.bf16.msra.mxu1 %v9951_v12 }
 0x77a   :  { %8478 = vmatprep.subr.bf16.mxu1 %v9952_v14 }
 0x77d   :  { %8479 = vmatpush3.bf16.msra.mxu1 %v9953_v42 }
 0x77e   :  { %8480 = vmatprep.subr.bf16.mxu1 %v9954_v8 }
 0x781   :  { %8481 = vmatpush3.bf16.msra.mxu1 %v9955_v20 }
 0x782   :  { %8482 = vmatprep.subr.bf16.mxu1 %v9956_v21 }
 0x785   :  { %8483 = vmatpush3.bf16.msra.mxu1 %v9957_v25 }
 0x786   :  { %8484 = vmatprep.subr.bf16.mxu1 %v9958_v26 }
 0x789   :  { %8485 = vmatpush3.bf16.msra.mxu1 %v9959_v0 }
 0x801   :  { %v6959_v37 = vpop.f32.mrb[24].mxu0 }
 0x802   :  { %v8520_v31 = vadd.f32 %v6959_v37, %v5136_v28  ;;  %v6961_v32 = vpop.f32.mrb[25].mxu0 }
 0x803   :  { %v8521_v33 = vadd.f32 %v6961_v32, %v5140_v30  ;;  %v6963_v34 = vpop.f32.mrb[26].mxu0 }
 0x804   :  { %v8522_v35 = vadd.f32 %v6963_v34, %v5136_v28  ;;  %v6965_v23 = vpop.f32.mrb[27].mxu0  ;;  %v6972_v51 = vmax.f32 %v8520_v31, 0.0 }
 0x805   :  { %v8523_v36 = vadd.f32 %v6965_v23, %v5140_v30  ;;  %v6973_v16 = vmax.f32 %v8521_v33, 0.0 }
 0x806   :  { %v6978_v39 = vmax.f32 %v8522_v35, 0.0 }
 0x807   :  { %v6979_v13 = vmax.f32 %v8523_v36, 0.0 }
 0x808   :  { %v6984_v59 = vpack.c.bf16 %v6978_v39, %v6972_v51 }
 0x809   :  { %v6985_v40 = vpack.c.bf16 %v6979_v13, %v6973_v16 }
 0x80b   :  { %7488 = vmatprep.mubr.bf16.mxu1 %v6985_v40 }
 0x80c   :  { %7489 = vmatmul.mubr.bf16.vlgmr.msra.gmra.mrb[36].mxu1 %v6984_v59 }
 0x81f   :  { %v8442_v9 = vpop.f32.mrb[28].mxu1 }
 0x820   :  { %v8443_v43 = vpop.f32.mrb[29].mxu1 }
 0x821   :  { %v8444_v44 = vadd.f32 %v8443_v43, %v8442_v9  ;;  %v8445_v22 = vpop.f32.mrb[30].mxu1 }
 0x822   :  { %v8446_v17 = vpop.f32.mrb[31].mxu1 }
 0x823   :  { %v8447_v45 = vadd.f32 %v8446_v17, %v8445_v22  ;;  %v7409_v52 = vadd.f32 %v8444_v44, %v7085_v47 }
 0x825   :  { %v7412_v56 = vadd.f32 %v8447_v45, %v7085_v47 }
 0x83f   :  { %v8464_v48 = vpop.f32.mrb[32].mxu1 }
 0x840   :  { %v8465_v50 = vpop.f32.mrb[33].mxu1 }
 0x841   :  { %v8466_v53 = vadd.f32 %v8465_v50, %v8464_v48  ;;  %v8467_v55 = vpop.f32.mrb[34].mxu1 }
 0x842   :  { %v8468_v19 = vpop.f32.mrb[35].mxu1 }
 0x843   :  { %v7450_v57 = vadd.f32 %v8466_v53, %v7409_v52  ;;  %v8469_v58 = vadd.f32 %v8468_v19, %v8467_v55 }
 0x845   :  { %v7453_v60 = vadd.f32 %v8469_v58, %v7412_v56 }
 0x8df   :  { %v8486_v10 = vpop.f32.mrb[36].mxu1 }
 0x8e0   :  { %v8487_v61 = vpop.f32.mrb[37].mxu1 }
 0x8e1   :  { %v8488_v41 = vadd.f32 %v8487_v61, %v8486_v10  ;;  %v8489_v15 = vpop.f32.mrb[38].mxu1 }
 0x8e2   :  { %v8490_v38 = vpop.f32.mrb[39].mxu1 }
 0x8e3   :  { %v7491_v62 = vadd.f32 %v8488_v41, %v7450_v57  ;;  %v8491_v63 = vadd.f32 %v8490_v38, %v8489_v15 }
 0x8e5   :  { %9964 = vtanh.f32 %v7491_v62  ;;  %v7494_v49 = vadd.f32 %v8491_v63, %v7453_v60 }
 0x8e7   :  { %9966 = vtanh.f32 %v7494_v49 }
 0x8ef   :  { %v9965_v24 = vpop.eup %9964 }
 0x8f0   :  { %7499 = vst [vmem:[%s10622_s10] sm:$0xff] %v9965_v24 }
 0x8f1   :  { %v9967_v1 = vpop.eup %9966 }
 0x8f2   :  { %7500 = vst [vmem:[%s10622_s10 + $0x18] sm:$0xff] %v9967_v1 }
 0x8f3   :  { %7509 = vsyncpa [#allocation3], 1 }
 0x8f4   :  { %7510 = vsyncpa [#allocation5], 1 }
 0x8f5   :  { %7511 = vsyncpa [#allocation8], 1 }
 0x8f6   :  { %7512 = vsyncpa [#allocation11], 1 }
 0x8f7   :  { %7513 = vsyncpa [#allocation14], 1 }

</bundles_post_ra>
